<compile_context>
chip_gen: v7x
topology: tpu7x:2x2x1
jax: 0.10.0
libtpu: 0.0.40
codegen_flags: <defaults>
</compile_context>

<pallas_src>
import functools

import jax
import jax.numpy as jnp
from jax.experimental import pallas as pl
from jax.experimental.pallas import tpu as pltpu


def _round_up(v, m):
    return ((v + m - 1) // m) * m


# ----------------------------------------------------------------------------
# Pallas kernel: one grid step = bt batch lanes, all filters, all time.
# ----------------------------------------------------------------------------
def _xeegnet_kernel(x_ref, w2_ref, w1_ref, shift_ref, o_ref, *,
                    C, F, K1, Tp, tc, bsub):
    """x_ref: VMEM (C, S8, bt); w2_ref: SMEM (F, C); w1_ref: SMEM (F, K1)
    (BN scale and 1/sqrt(Tp) folded in); shift_ref: SMEM (F,) (1/sqrt(Tp)
    folded in); o_ref: VMEM (F, bt), batch on lanes."""
    _, S8, bt = x_ref.shape
    nsub = bt // bsub
    nr = min(8, K1)                       # distinct sublane phases of the taps

    for j in range(nsub):                                 # 128-lane sub-tiles
        lo, hi = j * bsub, (j + 1) * bsub
        for f in range(F):                                # filters (small)
            pooled = jnp.zeros((1, bsub), jnp.float32)
            for t0 in range(0, Tp, tc):                   # 8-aligned chunks
                tl = min(tc, Tp - t0)                     # outputs this chunk
                ul = _round_up(tl + K1 - 1, 8)            # u rows needed
                assert t0 + ul <= S8                      # static, by padding

                # Spatial (depthwise) mix first — commutes with the 1xK1
                # temporal conv.  Scalars come from SMEM (sregs): full-width
                # scalar*vector FMAs, no per-iteration broadcast_in_dim.
                u = w2_ref[f, 0] * x_ref[0, t0:t0 + ul, lo:hi].astype(jnp.float32)
                for c in range(1, C):
                    u = u + w2_ref[f, c] * x_ref[c, t0:t0 + ul, lo:hi].astype(jnp.float32)

                # Valid temporal FIR (cross-correlation, like nn.Conv2d) with
                # tap index k = 8*g + r: one sublane-shifted copy of u per
                # phase r (<= 7 shift passes), then every tap is an 8-aligned
                # slice + full-width VPU FMA.
                acc = None
                for r in range(nr):
                    g_cnt = (K1 - 1 - r) // 8 + 1
                    u_r = u[r:r + 8 * (g_cnt - 1) + tl, :]      # one shift pass
                    for g in range(g_cnt):
                        term = w1_ref[f, 8 * g + r] * u_r[8 * g:8 * g + tl, :]
                        acc = term if acc is None else acc + term

                # BN shift, square, accumulate pooled sum (mean factor is
                # already folded into w1f/shift).
                z = acc + shift_ref[f]
                pooled = pooled + jnp.sum(z * z, axis=0, keepdims=True)

            # dB log activation; direct lane-full row store (no concatenate).
            o_ref[f:f + 1, lo:hi] = 10.0 * jnp.log10(jnp.clip(pooled, 1e-7, 1e4))


# ----------------------------------------------------------------------------
# Wrapper: parameter folding, lane-dense layout plumbing, pallas_call.
# ----------------------------------------------------------------------------
def xeegnet_encoder_forward(x, w1, w2, gamma, beta, rmean, rvar,
                            eps=1e-5, bt=None, bsub=128, tc=None):
    """x: (B, Chans, Samples); w1: (F1,1,1,K1); w2: (F2,1,Chans,1)."""
    B, C, S = x.shape
    F1, K1 = int(w1.shape[0]), int(w1.shape[-1])
    F2 = int(w2.shape[0])
    if F2 % F1 != 0:
        raise ValueError("F2 must be a multiple of F1 for the depthwise conv2")
    Tp = S - K1 + 1
    if Tp <= 0:
        raise ValueError(f"temporal kernel K1={K1} longer than Samples={S}")

    # Fold the eval-mode BatchNorm scale and the 1/Tp pooling mean into the
    # temporal FIR weights / shift (scale both by 1/sqrt(Tp)).
    inv_std = 1.0 / jnp.sqrt(rvar.astype(jnp.float32) + eps)
    scale = gamma.astype(jnp.float32) * inv_std                       # (F2,)
    shift = beta.astype(jnp.float32) - rmean.astype(jnp.float32) * scale
    pool_s = float(Tp) ** -0.5
    w1_per_out = jnp.repeat(w1.reshape(F1, K1).astype(jnp.float32),
                            F2 // F1, axis=0)                         # (F2, K1)
    w1f = (scale * pool_s)[:, None] * w1_per_out                      # (F2, K1)
    shiftf = shift * pool_s                                           # (F2,)
    w2m = w2.reshape(F2, C).astype(jnp.float32)                       # (F2, C)

    # ---- tiling parameters --------------------------------------------------
    S8 = _round_up(S, 8)
    if tc is None:
        tc = min(128, _round_up(Tp, 8))       # bounds live vregs vs Samples
    tc = max(8, _round_up(tc, 8))
    if bt is None:
        # Amortize per-grid-step pipeline overhead, but keep >= 2 parallel
        # grid steps when the batch allows (v7x has 2 TensorCores).
        bt = max(128, min(512, pl.cdiv(B, 256) * 128))
    bt = max(bsub, _round_up(bt, bsub))
    # Keep the double-buffered per-step x block comfortably inside v7x VMEM.
    per_lane_bytes = C * S8 * x.dtype.itemsize
    max_bt = max(bsub, ((12 * 2 ** 20) // (per_lane_bytes * bsub)) * bsub)
    bt = min(bt, max_bt)
    Bp = pl.cdiv(B, bt) * bt

    # Lane-dense layout: batch on the last (lane) axis.  Padded lanes compute
    # harmless finite values (sliced off); padded time rows are never read by
    # any FIR tap.  Kept in the input's native dtype, cast to f32 in-kernel.
    # TODO(synk): hand x over already in (Chans, Samples, Batch) layout to
    # avoid this transpose copy in HBM for bandwidth-bound batches.
    xt = jnp.transpose(x, (1, 2, 0))                                  # (C, S, B)
    xt = jnp.pad(xt, ((0, 0), (0, S8 - S), (0, Bp - B)))              # (C, S8, Bp)

    kernel = functools.partial(_xeegnet_kernel, C=C, F=F2, K1=K1, Tp=Tp,
                               tc=tc, bsub=bsub)

    in_block_bytes = per_lane_bytes * bt
    vmem_limit = int(min(64 * 2 ** 20,
                         max(32 * 2 ** 20, 3 * in_block_bytes + 2 * 2 ** 20)))

    out = pl.pallas_call(
        kernel,
        out_shape=jax.ShapeDtypeStruct((F2, Bp), jnp.float32),
        grid_spec=pltpu.PrefetchScalarGridSpec(
            num_scalar_prefetch=0,
            grid=(Bp // bt,),
            in_specs=[
                pl.BlockSpec((C, S8, bt), lambda b: (0, 0, b)),          # x
                pl.BlockSpec(memory_space=pltpu.MemorySpace.SMEM),       # w2
                pl.BlockSpec(memory_space=pltpu.MemorySpace.SMEM),       # w1f
                pl.BlockSpec(memory_space=pltpu.MemorySpace.SMEM),       # shift
            ],
            out_specs=pl.BlockSpec((F2, bt), lambda b: (0, b)),
        ),
        compiler_params=pltpu.CompilerParams(
            dimension_semantics=("parallel",),
            vmem_limit_bytes=vmem_limit),
    )(xt, w2m, w1f, shiftf)

    return jnp.transpose(out[:, :B])                                   # (B, F2)


# ----------------------------------------------------------------------------
# Pure-JAX reference following the PyTorch op order exactly (eval mode).
# ----------------------------------------------------------------------------
def reference_forward(x, w1, w2, gamma, beta, rmean, rvar, eps=1e-5):
    F1 = w1.shape[0]
    x4 = x[:, None, :, :]                                   # (B,1,C,S)  NCHW
    o1 = jax.lax.conv_general_dilated(
        x4, w1, (1, 1), "VALID",
        dimension_numbers=("NCHW", "OIHW", "NCHW"),
        precision=jax.lax.Precision.HIGHEST)                # (B,F1,C,Tp)
    o2 = jax.lax.conv_general_dilated(
        o1, w2, (1, 1), "VALID",
        dimension_numbers=("NCHW", "OIHW", "NCHW"),
        feature_group_count=F1,
        precision=jax.lax.Precision.HIGHEST)                # (B,F2,1,Tp)
    z = (o2 - rmean[None, :, None, None]) / jnp.sqrt(rvar + eps)[None, :, None, None]
    z = z * gamma[None, :, None, None] + beta[None, :, None, None]
    z = jnp.square(z)
    p = jnp.mean(z, axis=(2, 3))                            # global avg pool
    return 10.0 * jnp.log10(jnp.clip(p, 1e-7, 1e4))         # (B, F2)


if __name__ == "__main__":
    def run_case(B, C, S, F1, F2, K1, seed, tc=None):
        key = jax.random.PRNGKey(seed)
        kx, k1, k2, kg, kb, km, kv = jax.random.split(key, 7)
        x = jax.random.normal(kx, (B, C, S), dtype=jnp.float32)
        w1 = 0.1 * jax.random.normal(k1, (F1, 1, 1, K1), dtype=jnp.float32)
        w2 = 0.2 * jax.random.normal(k2, (F2, 1, C, 1), dtype=jnp.float32)
        gamma = 1.0 + 0.1 * jax.random.normal(kg, (F2,), dtype=jnp.float32)
        beta = 0.05 * jax.random.normal(kb, (F2,), dtype=jnp.float32)
        rmean = 0.1 * jax.random.normal(km, (F2,), dtype=jnp.float32)
        rvar = 1.0 + 0.1 * jnp.abs(jax.random.normal(kv, (F2,), dtype=jnp.float32))

        out = jax.block_until_ready(
            xeegnet_encoder_forward(x, w1, w2, gamma, beta, rmean, rvar, tc=tc))
        ref = jax.block_until_ready(
            reference_forward(x, w1, w2, gamma, beta, rmean, rvar))
        assert out.shape == (B, F2), out.shape
        max_err = float(jnp.max(jnp.abs(out - ref)))
        assert max_err < 5e-3, f"mismatch vs reference (B={B},C={C},S={S}): {max_err}"

    # Small shapes consistent with the module (global_pooling=True, eval mode):
    # Chans=4, Samples=64, F1=F2=4, K1=17.
    run_case(B=2, C=4, S=64, F1=4, F2=4, K1=17, seed=0)
    # Exercise the multi-grid-step / multi-sub-tile / multi-chunk paths
    # (grid=2, two 128-lane sub-tiles, ragged last time chunk).
    run_case(B=260, C=5, S=80, F1=4, F2=4, K1=17, seed=1, tc=40)

    print("KERNEL_OK")
</pallas_src>

<mosaic_0001>
module attributes {stable_mosaic.version = 11 : i64} {
  func.func @_xeegnet_kernel(%arg0: i32, %arg1: memref<4x64x128xf32, #tpu.memory_space<vmem>>, %arg2: memref<4x4xf32, #tpu.memory_space<smem>>, %arg3: memref<4x17xf32, #tpu.memory_space<smem>>, %arg4: memref<4xf32, #tpu.memory_space<smem>>, %arg5: memref<4x128xf32, #tpu.memory_space<vmem>>) attributes {dimension_semantics = [#tpu.dimension_semantics<parallel>], iteration_bounds = array<i64: 1>, scalar_prefetch = 0 : i64, scratch_operands = 0 : i64, tpu.core_type = #tpu.core_type<tc>, window_params = [{transform_indices = @transform_0, window_bounds = array<i64: 4, 64, 128>}, {transform_indices = @transform_1, window_bounds = array<i64: 4, 4>}, {transform_indices = @transform_2, window_bounds = array<i64: 4, 17>}, {transform_indices = @transform_3, window_bounds = array<i64: 4>}, {transform_indices = @transform_4, window_bounds = array<i64: 4, 128>}]} {
    %cst = arith.constant 0.000000e+00 : f32
    %0 = vector.broadcast %cst : f32 to vector<1x128xf32>
    %c0 = arith.constant 0 : index
    %c0_0 = arith.constant 0 : index
    %1 = memref.load %arg2[%c0, %c0_0] : memref<4x4xf32, #tpu.memory_space<smem>>
    %c0_1 = arith.constant 0 : index
    %c0_2 = arith.constant 0 : index
    %c0_3 = arith.constant 0 : index
    %2 = vector.load %arg1[%c0_1, %c0_2, %c0_3] : memref<4x64x128xf32, #tpu.memory_space<vmem>>, vector<1x64x128xf32>
    %3 = vector.shape_cast %2 : vector<1x64x128xf32> to vector<64x128xf32>
    %4 = vector.broadcast %1 : f32 to vector<64x128xf32>
    %5 = arith.mulf %4, %3 : vector<64x128xf32>
    %c0_4 = arith.constant 0 : index
    %c1 = arith.constant 1 : index
    %6 = memref.load %arg2[%c0_4, %c1] : memref<4x4xf32, #tpu.memory_space<smem>>
    %c1_5 = arith.constant 1 : index
    %c0_6 = arith.constant 0 : index
    %c0_7 = arith.constant 0 : index
    %7 = vector.load %arg1[%c1_5, %c0_6, %c0_7] : memref<4x64x128xf32, #tpu.memory_space<vmem>>, vector<1x64x128xf32>
    %8 = vector.shape_cast %7 : vector<1x64x128xf32> to vector<64x128xf32>
    %9 = vector.broadcast %6 : f32 to vector<64x128xf32>
    %10 = arith.mulf %9, %8 : vector<64x128xf32>
    %11 = arith.addf %5, %10 : vector<64x128xf32>
    %c0_8 = arith.constant 0 : index
    %c2 = arith.constant 2 : index
    %12 = memref.load %arg2[%c0_8, %c2] : memref<4x4xf32, #tpu.memory_space<smem>>
    %c2_9 = arith.constant 2 : index
    %c0_10 = arith.constant 0 : index
    %c0_11 = arith.constant 0 : index
    %13 = vector.load %arg1[%c2_9, %c0_10, %c0_11] : memref<4x64x128xf32, #tpu.memory_space<vmem>>, vector<1x64x128xf32>
    %14 = vector.shape_cast %13 : vector<1x64x128xf32> to vector<64x128xf32>
    %15 = vector.broadcast %12 : f32 to vector<64x128xf32>
    %16 = arith.mulf %15, %14 : vector<64x128xf32>
    %17 = arith.addf %11, %16 : vector<64x128xf32>
    %c0_12 = arith.constant 0 : index
    %c3 = arith.constant 3 : index
    %18 = memref.load %arg2[%c0_12, %c3] : memref<4x4xf32, #tpu.memory_space<smem>>
    %c3_13 = arith.constant 3 : index
    %c0_14 = arith.constant 0 : index
    %c0_15 = arith.constant 0 : index
    %19 = vector.load %arg1[%c3_13, %c0_14, %c0_15] : memref<4x64x128xf32, #tpu.memory_space<vmem>>, vector<1x64x128xf32>
    %20 = vector.shape_cast %19 : vector<1x64x128xf32> to vector<64x128xf32>
    %21 = vector.broadcast %18 : f32 to vector<64x128xf32>
    %22 = arith.mulf %21, %20 : vector<64x128xf32>
    %23 = arith.addf %17, %22 : vector<64x128xf32>
    %c0_16 = arith.constant 0 : index
    %c0_17 = arith.constant 0 : index
    %24 = memref.load %arg3[%c0_16, %c0_17] : memref<4x17xf32, #tpu.memory_space<smem>>
    %25 = vector.extract_strided_slice %23 {offsets = [0, 0], sizes = [48, 128], strides = [1, 1]} : vector<64x128xf32> to vector<48x128xf32>
    %26 = vector.broadcast %24 : f32 to vector<48x128xf32>
    %27 = arith.mulf %26, %25 : vector<48x128xf32>
    %c0_18 = arith.constant 0 : index
    %c8 = arith.constant 8 : index
    %28 = memref.load %arg3[%c0_18, %c8] : memref<4x17xf32, #tpu.memory_space<smem>>
    %29 = vector.extract_strided_slice %23 {offsets = [8, 0], sizes = [48, 128], strides = [1, 1]} : vector<64x128xf32> to vector<48x128xf32>
    %30 = vector.broadcast %28 : f32 to vector<48x128xf32>
    %31 = arith.mulf %30, %29 : vector<48x128xf32>
    %32 = arith.addf %27, %31 : vector<48x128xf32>
    %c0_19 = arith.constant 0 : index
    %c16 = arith.constant 16 : index
    %33 = memref.load %arg3[%c0_19, %c16] : memref<4x17xf32, #tpu.memory_space<smem>>
    %34 = vector.extract_strided_slice %23 {offsets = [16, 0], sizes = [48, 128], strides = [1, 1]} : vector<64x128xf32> to vector<48x128xf32>
    %35 = vector.broadcast %33 : f32 to vector<48x128xf32>
    %36 = arith.mulf %35, %34 : vector<48x128xf32>
    %37 = arith.addf %32, %36 : vector<48x128xf32>
    %38 = vector.extract_strided_slice %23 {offsets = [1, 0], sizes = [56, 128], strides = [1, 1]} : vector<64x128xf32> to vector<56x128xf32>
    %c0_20 = arith.constant 0 : index
    %c1_21 = arith.constant 1 : index
    %39 = memref.load %arg3[%c0_20, %c1_21] : memref<4x17xf32, #tpu.memory_space<smem>>
    %40 = vector.extract_strided_slice %38 {offsets = [0, 0], sizes = [48, 128], strides = [1, 1]} : vector<56x128xf32> to vector<48x128xf32>
    %41 = vector.broadcast %39 : f32 to vector<48x128xf32>
    %42 = arith.mulf %41, %40 : vector<48x128xf32>
    %43 = arith.addf %37, %42 : vector<48x128xf32>
    %c0_22 = arith.constant 0 : index
    %c9 = arith.constant 9 : index
    %44 = memref.load %arg3[%c0_22, %c9] : memref<4x17xf32, #tpu.memory_space<smem>>
    %45 = vector.extract_strided_slice %38 {offsets = [8, 0], sizes = [48, 128], strides = [1, 1]} : vector<56x128xf32> to vector<48x128xf32>
    %46 = vector.broadcast %44 : f32 to vector<48x128xf32>
    %47 = arith.mulf %46, %45 : vector<48x128xf32>
    %48 = arith.addf %43, %47 : vector<48x128xf32>
    %49 = vector.extract_strided_slice %23 {offsets = [2, 0], sizes = [56, 128], strides = [1, 1]} : vector<64x128xf32> to vector<56x128xf32>
    %c0_23 = arith.constant 0 : index
    %c2_24 = arith.constant 2 : index
    %50 = memref.load %arg3[%c0_23, %c2_24] : memref<4x17xf32, #tpu.memory_space<smem>>
    %51 = vector.extract_strided_slice %49 {offsets = [0, 0], sizes = [48, 128], strides = [1, 1]} : vector<56x128xf32> to vector<48x128xf32>
    %52 = vector.broadcast %50 : f32 to vector<48x128xf32>
    %53 = arith.mulf %52, %51 : vector<48x128xf32>
    %54 = arith.addf %48, %53 : vector<48x128xf32>
    %c0_25 = arith.constant 0 : index
    %c10 = arith.constant 10 : index
    %55 = memref.load %arg3[%c0_25, %c10] : memref<4x17xf32, #tpu.memory_space<smem>>
    %56 = vector.extract_strided_slice %49 {offsets = [8, 0], sizes = [48, 128], strides = [1, 1]} : vector<56x128xf32> to vector<48x128xf32>
    %57 = vector.broadcast %55 : f32 to vector<48x128xf32>
    %58 = arith.mulf %57, %56 : vector<48x128xf32>
    %59 = arith.addf %54, %58 : vector<48x128xf32>
    %60 = vector.extract_strided_slice %23 {offsets = [3, 0], sizes = [56, 128], strides = [1, 1]} : vector<64x128xf32> to vector<56x128xf32>
    %c0_26 = arith.constant 0 : index
    %c3_27 = arith.constant 3 : index
    %61 = memref.load %arg3[%c0_26, %c3_27] : memref<4x17xf32, #tpu.memory_space<smem>>
    %62 = vector.extract_strided_slice %60 {offsets = [0, 0], sizes = [48, 128], strides = [1, 1]} : vector<56x128xf32> to vector<48x128xf32>
    %63 = vector.broadcast %61 : f32 to vector<48x128xf32>
    %64 = arith.mulf %63, %62 : vector<48x128xf32>
    %65 = arith.addf %59, %64 : vector<48x128xf32>
    %c0_28 = arith.constant 0 : index
    %c11 = arith.constant 11 : index
    %66 = memref.load %arg3[%c0_28, %c11] : memref<4x17xf32, #tpu.memory_space<smem>>
    %67 = vector.extract_strided_slice %60 {offsets = [8, 0], sizes = [48, 128], strides = [1, 1]} : vector<56x128xf32> to vector<48x128xf32>
    %68 = vector.broadcast %66 : f32 to vector<48x128xf32>
    %69 = arith.mulf %68, %67 : vector<48x128xf32>
    %70 = arith.addf %65, %69 : vector<48x128xf32>
    %71 = vector.extract_strided_slice %23 {offsets = [4, 0], sizes = [56, 128], strides = [1, 1]} : vector<64x128xf32> to vector<56x128xf32>
    %c0_29 = arith.constant 0 : index
    %c4 = arith.constant 4 : index
    %72 = memref.load %arg3[%c0_29, %c4] : memref<4x17xf32, #tpu.memory_space<smem>>
    %73 = vector.extract_strided_slice %71 {offsets = [0, 0], sizes = [48, 128], strides = [1, 1]} : vector<56x128xf32> to vector<48x128xf32>
    %74 = vector.broadcast %72 : f32 to vector<48x128xf32>
    %75 = arith.mulf %74, %73 : vector<48x128xf32>
    %76 = arith.addf %70, %75 : vector<48x128xf32>
    %c0_30 = arith.constant 0 : index
    %c12 = arith.constant 12 : index
    %77 = memref.load %arg3[%c0_30, %c12] : memref<4x17xf32, #tpu.memory_space<smem>>
    %78 = vector.extract_strided_slice %71 {offsets = [8, 0], sizes = [48, 128], strides = [1, 1]} : vector<56x128xf32> to vector<48x128xf32>
    %79 = vector.broadcast %77 : f32 to vector<48x128xf32>
    %80 = arith.mulf %79, %78 : vector<48x128xf32>
    %81 = arith.addf %76, %80 : vector<48x128xf32>
    %82 = vector.extract_strided_slice %23 {offsets = [5, 0], sizes = [56, 128], strides = [1, 1]} : vector<64x128xf32> to vector<56x128xf32>
    %c0_31 = arith.constant 0 : index
    %c5 = arith.constant 5 : index
    %83 = memref.load %arg3[%c0_31, %c5] : memref<4x17xf32, #tpu.memory_space<smem>>
    %84 = vector.extract_strided_slice %82 {offsets = [0, 0], sizes = [48, 128], strides = [1, 1]} : vector<56x128xf32> to vector<48x128xf32>
    %85 = vector.broadcast %83 : f32 to vector<48x128xf32>
    %86 = arith.mulf %85, %84 : vector<48x128xf32>
    %87 = arith.addf %81, %86 : vector<48x128xf32>
    %c0_32 = arith.constant 0 : index
    %c13 = arith.constant 13 : index
    %88 = memref.load %arg3[%c0_32, %c13] : memref<4x17xf32, #tpu.memory_space<smem>>
    %89 = vector.extract_strided_slice %82 {offsets = [8, 0], sizes = [48, 128], strides = [1, 1]} : vector<56x128xf32> to vector<48x128xf32>
    %90 = vector.broadcast %88 : f32 to vector<48x128xf32>
    %91 = arith.mulf %90, %89 : vector<48x128xf32>
    %92 = arith.addf %87, %91 : vector<48x128xf32>
    %93 = vector.extract_strided_slice %23 {offsets = [6, 0], sizes = [56, 128], strides = [1, 1]} : vector<64x128xf32> to vector<56x128xf32>
    %c0_33 = arith.constant 0 : index
    %c6 = arith.constant 6 : index
    %94 = memref.load %arg3[%c0_33, %c6] : memref<4x17xf32, #tpu.memory_space<smem>>
    %95 = vector.extract_strided_slice %93 {offsets = [0, 0], sizes = [48, 128], strides = [1, 1]} : vector<56x128xf32> to vector<48x128xf32>
    %96 = vector.broadcast %94 : f32 to vector<48x128xf32>
    %97 = arith.mulf %96, %95 : vector<48x128xf32>
    %98 = arith.addf %92, %97 : vector<48x128xf32>
    %c0_34 = arith.constant 0 : index
    %c14 = arith.constant 14 : index
    %99 = memref.load %arg3[%c0_34, %c14] : memref<4x17xf32, #tpu.memory_space<smem>>
    %100 = vector.extract_strided_slice %93 {offsets = [8, 0], sizes = [48, 128], strides = [1, 1]} : vector<56x128xf32> to vector<48x128xf32>
    %101 = vector.broadcast %99 : f32 to vector<48x128xf32>
    %102 = arith.mulf %101, %100 : vector<48x128xf32>
    %103 = arith.addf %98, %102 : vector<48x128xf32>
    %104 = vector.extract_strided_slice %23 {offsets = [7, 0], sizes = [56, 128], strides = [1, 1]} : vector<64x128xf32> to vector<56x128xf32>
    %c0_35 = arith.constant 0 : index
    %c7 = arith.constant 7 : index
    %105 = memref.load %arg3[%c0_35, %c7] : memref<4x17xf32, #tpu.memory_space<smem>>
    %106 = vector.extract_strided_slice %104 {offsets = [0, 0], sizes = [48, 128], strides = [1, 1]} : vector<56x128xf32> to vector<48x128xf32>
    %107 = vector.broadcast %105 : f32 to vector<48x128xf32>
    %108 = arith.mulf %107, %106 : vector<48x128xf32>
    %109 = arith.addf %103, %108 : vector<48x128xf32>
    %c0_36 = arith.constant 0 : index
    %c15 = arith.constant 15 : index
    %110 = memref.load %arg3[%c0_36, %c15] : memref<4x17xf32, #tpu.memory_space<smem>>
    %111 = vector.extract_strided_slice %104 {offsets = [8, 0], sizes = [48, 128], strides = [1, 1]} : vector<56x128xf32> to vector<48x128xf32>
    %112 = vector.broadcast %110 : f32 to vector<48x128xf32>
    %113 = arith.mulf %112, %111 : vector<48x128xf32>
    %114 = arith.addf %109, %113 : vector<48x128xf32>
    %c0_37 = arith.constant 0 : index
    %115 = memref.load %arg4[%c0_37] : memref<4xf32, #tpu.memory_space<smem>>
    %116 = vector.broadcast %115 : f32 to vector<48x128xf32>
    %117 = arith.addf %114, %116 : vector<48x128xf32>
    %118 = arith.mulf %117, %117 : vector<48x128xf32>
    %cst_38 = arith.constant dense<0.000000e+00> : vector<128xf32>
    %119 = vector.multi_reduction <add>, %118, %cst_38 [0] : vector<48x128xf32> to vector<128xf32>
    %120 = vector.shape_cast %119 : vector<128xf32> to vector<1x128xf32>
    %121 = arith.addf %0, %120 : vector<1x128xf32>
    %cst_39 = arith.constant 1.000000e-07 : f32
    %cst_40 = arith.constant 1.000000e+04 : f32
    %122 = vector.broadcast %cst_39 : f32 to vector<1x128xf32>
    %123 = arith.maximumf %122, %121 : vector<1x128xf32>
    %124 = vector.broadcast %cst_40 : f32 to vector<1x128xf32>
    %125 = arith.minimumf %124, %123 : vector<1x128xf32>
    %126 = math.log %125 : vector<1x128xf32>
    %cst_41 = arith.constant 0.434294492 : f32
    %127 = vector.broadcast %cst_41 : f32 to vector<1x128xf32>
    %128 = arith.mulf %126, %127 : vector<1x128xf32>
    %cst_42 = arith.constant 1.000000e+01 : f32
    %129 = vector.broadcast %cst_42 : f32 to vector<1x128xf32>
    %130 = arith.mulf %129, %128 : vector<1x128xf32>
    %c0_43 = arith.constant 0 : index
    %c0_44 = arith.constant 0 : index
    %131 = vector.load %arg5[%c0_43, %c0_44] : memref<4x128xf32, #tpu.memory_space<vmem>>, vector<1x128xf32>
    tpu.vector_store %arg5[%c0_43, %c0_44], %130 {strides = array<i32>} : memref<4x128xf32, #tpu.memory_space<vmem>>, vector<1x128xf32>,
    %cst_45 = arith.constant 0.000000e+00 : f32
    %132 = vector.broadcast %cst_45 : f32 to vector<1x128xf32>
    %c1_46 = arith.constant 1 : index
    %c0_47 = arith.constant 0 : index
    %133 = memref.load %arg2[%c1_46, %c0_47] : memref<4x4xf32, #tpu.memory_space<smem>>
    %c0_48 = arith.constant 0 : index
    %c0_49 = arith.constant 0 : index
    %c0_50 = arith.constant 0 : index
    %134 = vector.load %arg1[%c0_48, %c0_49, %c0_50] : memref<4x64x128xf32, #tpu.memory_space<vmem>>, vector<1x64x128xf32>
    %135 = vector.shape_cast %134 : vector<1x64x128xf32> to vector<64x128xf32>
    %136 = vector.broadcast %133 : f32 to vector<64x128xf32>
    %137 = arith.mulf %136, %135 : vector<64x128xf32>
    %c1_51 = arith.constant 1 : index
    %c1_52 = arith.constant 1 : index
    %138 = memref.load %arg2[%c1_51, %c1_52] : memref<4x4xf32, #tpu.memory_space<smem>>
    %c1_53 = arith.constant 1 : index
    %c0_54 = arith.constant 0 : index
    %c0_55 = arith.constant 0 : index
    %139 = vector.load %arg1[%c1_53, %c0_54, %c0_55] : memref<4x64x128xf32, #tpu.memory_space<vmem>>, vector<1x64x128xf32>
    %140 = vector.shape_cast %139 : vector<1x64x128xf32> to vector<64x128xf32>
    %141 = vector.broadcast %138 : f32 to vector<64x128xf32>
    %142 = arith.mulf %141, %140 : vector<64x128xf32>
    %143 = arith.addf %137, %142 : vector<64x128xf32>
    %c1_56 = arith.constant 1 : index
    %c2_57 = arith.constant 2 : index
    %144 = memref.load %arg2[%c1_56, %c2_57] : memref<4x4xf32, #tpu.memory_space<smem>>
    %c2_58 = arith.constant 2 : index
    %c0_59 = arith.constant 0 : index
    %c0_60 = arith.constant 0 : index
    %145 = vector.load %arg1[%c2_58, %c0_59, %c0_60] : memref<4x64x128xf32, #tpu.memory_space<vmem>>, vector<1x64x128xf32>
    %146 = vector.shape_cast %145 : vector<1x64x128xf32> to vector<64x128xf32>
    %147 = vector.broadcast %144 : f32 to vector<64x128xf32>
    %148 = arith.mulf %147, %146 : vector<64x128xf32>
    %149 = arith.addf %143, %148 : vector<64x128xf32>
    %c1_61 = arith.constant 1 : index
    %c3_62 = arith.constant 3 : index
    %150 = memref.load %arg2[%c1_61, %c3_62] : memref<4x4xf32, #tpu.memory_space<smem>>
    %c3_63 = arith.constant 3 : index
    %c0_64 = arith.constant 0 : index
    %c0_65 = arith.constant 0 : index
    %151 = vector.load %arg1[%c3_63, %c0_64, %c0_65] : memref<4x64x128xf32, #tpu.memory_space<vmem>>, vector<1x64x128xf32>
    %152 = vector.shape_cast %151 : vector<1x64x128xf32> to vector<64x128xf32>
    %153 = vector.broadcast %150 : f32 to vector<64x128xf32>
    %154 = arith.mulf %153, %152 : vector<64x128xf32>
    %155 = arith.addf %149, %154 : vector<64x128xf32>
    %c1_66 = arith.constant 1 : index
    %c0_67 = arith.constant 0 : index
    %156 = memref.load %arg3[%c1_66, %c0_67] : memref<4x17xf32, #tpu.memory_space<smem>>
    %157 = vector.extract_strided_slice %155 {offsets = [0, 0], sizes = [48, 128], strides = [1, 1]} : vector<64x128xf32> to vector<48x128xf32>
    %158 = vector.broadcast %156 : f32 to vector<48x128xf32>
    %159 = arith.mulf %158, %157 : vector<48x128xf32>
    %c1_68 = arith.constant 1 : index
    %c8_69 = arith.constant 8 : index
    %160 = memref.load %arg3[%c1_68, %c8_69] : memref<4x17xf32, #tpu.memory_space<smem>>
    %161 = vector.extract_strided_slice %155 {offsets = [8, 0], sizes = [48, 128], strides = [1, 1]} : vector<64x128xf32> to vector<48x128xf32>
    %162 = vector.broadcast %160 : f32 to vector<48x128xf32>
    %163 = arith.mulf %162, %161 : vector<48x128xf32>
    %164 = arith.addf %159, %163 : vector<48x128xf32>
    %c1_70 = arith.constant 1 : index
    %c16_71 = arith.constant 16 : index
    %165 = memref.load %arg3[%c1_70, %c16_71] : memref<4x17xf32, #tpu.memory_space<smem>>
    %166 = vector.extract_strided_slice %155 {offsets = [16, 0], sizes = [48, 128], strides = [1, 1]} : vector<64x128xf32> to vector<48x128xf32>
    %167 = vector.broadcast %165 : f32 to vector<48x128xf32>
    %168 = arith.mulf %167, %166 : vector<48x128xf32>
    %169 = arith.addf %164, %168 : vector<48x128xf32>
    %170 = vector.extract_strided_slice %155 {offsets = [1, 0], sizes = [56, 128], strides = [1, 1]} : vector<64x128xf32> to vector<56x128xf32>
    %c1_72 = arith.constant 1 : index
    %c1_73 = arith.constant 1 : index
    %171 = memref.load %arg3[%c1_72, %c1_73] : memref<4x17xf32, #tpu.memory_space<smem>>
    %172 = vector.extract_strided_slice %170 {offsets = [0, 0], sizes = [48, 128], strides = [1, 1]} : vector<56x128xf32> to vector<48x128xf32>
    %173 = vector.broadcast %171 : f32 to vector<48x128xf32>
    %174 = arith.mulf %173, %172 : vector<48x128xf32>
    %175 = arith.addf %169, %174 : vector<48x128xf32>
    %c1_74 = arith.constant 1 : index
    %c9_75 = arith.constant 9 : index
    %176 = memref.load %arg3[%c1_74, %c9_75] : memref<4x17xf32, #tpu.memory_space<smem>>
    %177 = vector.extract_strided_slice %170 {offsets = [8, 0], sizes = [48, 128], strides = [1, 1]} : vector<56x128xf32> to vector<48x128xf32>
    %178 = vector.broadcast %176 : f32 to vector<48x128xf32>
    %179 = arith.mulf %178, %177 : vector<48x128xf32>
    %180 = arith.addf %175, %179 : vector<48x128xf32>
    %181 = vector.extract_strided_slice %155 {offsets = [2, 0], sizes = [56, 128], strides = [1, 1]} : vector<64x128xf32> to vector<56x128xf32>
    %c1_76 = arith.constant 1 : index
    %c2_77 = arith.constant 2 : index
    %182 = memref.load %arg3[%c1_76, %c2_77] : memref<4x17xf32, #tpu.memory_space<smem>>
    %183 = vector.extract_strided_slice %181 {offsets = [0, 0], sizes = [48, 128], strides = [1, 1]} : vector<56x128xf32> to vector<48x128xf32>
    %184 = vector.broadcast %182 : f32 to vector<48x128xf32>
    %185 = arith.mulf %184, %183 : vector<48x128xf32>
    %186 = arith.addf %180, %185 : vector<48x128xf32>
    %c1_78 = arith.constant 1 : index
    %c10_79 = arith.constant 10 : index
    %187 = memref.load %arg3[%c1_78, %c10_79] : memref<4x17xf32, #tpu.memory_space<smem>>
    %188 = vector.extract_strided_slice %181 {offsets = [8, 0], sizes = [48, 128], strides = [1, 1]} : vector<56x128xf32> to vector<48x128xf32>
    %189 = vector.broadcast %187 : f32 to vector<48x128xf32>
    %190 = arith.mulf %189, %188 : vector<48x128xf32>
    %191 = arith.addf %186, %190 : vector<48x128xf32>
    %192 = vector.extract_strided_slice %155 {offsets = [3, 0], sizes = [56, 128], strides = [1, 1]} : vector<64x128xf32> to vector<56x128xf32>
    %c1_80 = arith.constant 1 : index
    %c3_81 = arith.constant 3 : index
    %193 = memref.load %arg3[%c1_80, %c3_81] : memref<4x17xf32, #tpu.memory_space<smem>>
    %194 = vector.extract_strided_slice %192 {offsets = [0, 0], sizes = [48, 128], strides = [1, 1]} : vector<56x128xf32> to vector<48x128xf32>
    %195 = vector.broadcast %193 : f32 to vector<48x128xf32>
    %196 = arith.mulf %195, %194 : vector<48x128xf32>
    %197 = arith.addf %191, %196 : vector<48x128xf32>
    %c1_82 = arith.constant 1 : index
    %c11_83 = arith.constant 11 : index
    %198 = memref.load %arg3[%c1_82, %c11_83] : memref<4x17xf32, #tpu.memory_space<smem>>
    %199 = vector.extract_strided_slice %192 {offsets = [8, 0], sizes = [48, 128], strides = [1, 1]} : vector<56x128xf32> to vector<48x128xf32>
    %200 = vector.broadcast %198 : f32 to vector<48x128xf32>
    %201 = arith.mulf %200, %199 : vector<48x128xf32>
    %202 = arith.addf %197, %201 : vector<48x128xf32>
    %203 = vector.extract_strided_slice %155 {offsets = [4, 0], sizes = [56, 128], strides = [1, 1]} : vector<64x128xf32> to vector<56x128xf32>
    %c1_84 = arith.constant 1 : index
    %c4_85 = arith.constant 4 : index
    %204 = memref.load %arg3[%c1_84, %c4_85] : memref<4x17xf32, #tpu.memory_space<smem>>
    %205 = vector.extract_strided_slice %203 {offsets = [0, 0], sizes = [48, 128], strides = [1, 1]} : vector<56x128xf32> to vector<48x128xf32>
    %206 = vector.broadcast %204 : f32 to vector<48x128xf32>
    %207 = arith.mulf %206, %205 : vector<48x128xf32>
    %208 = arith.addf %202, %207 : vector<48x128xf32>
    %c1_86 = arith.constant 1 : index
    %c12_87 = arith.constant 12 : index
    %209 = memref.load %arg3[%c1_86, %c12_87] : memref<4x17xf32, #tpu.memory_space<smem>>
    %210 = vector.extract_strided_slice %203 {offsets = [8, 0], sizes = [48, 128], strides = [1, 1]} : vector<56x128xf32> to vector<48x128xf32>
    %211 = vector.broadcast %209 : f32 to vector<48x128xf32>
    %212 = arith.mulf %211, %210 : vector<48x128xf32>
    %213 = arith.addf %208, %212 : vector<48x128xf32>
    %214 = vector.extract_strided_slice %155 {offsets = [5, 0], sizes = [56, 128], strides = [1, 1]} : vector<64x128xf32> to vector<56x128xf32>
    %c1_88 = arith.constant 1 : index
    %c5_89 = arith.constant 5 : index
    %215 = memref.load %arg3[%c1_88, %c5_89] : memref<4x17xf32, #tpu.memory_space<smem>>
    %216 = vector.extract_strided_slice %214 {offsets = [0, 0], sizes = [48, 128], strides = [1, 1]} : vector<56x128xf32> to vector<48x128xf32>
    %217 = vector.broadcast %215 : f32 to vector<48x128xf32>
    %218 = arith.mulf %217, %216 : vector<48x128xf32>
    %219 = arith.addf %213, %218 : vector<48x128xf32>
    %c1_90 = arith.constant 1 : index
    %c13_91 = arith.constant 13 : index
    %220 = memref.load %arg3[%c1_90, %c13_91] : memref<4x17xf32, #tpu.memory_space<smem>>
    %221 = vector.extract_strided_slice %214 {offsets = [8, 0], sizes = [48, 128], strides = [1, 1]} : vector<56x128xf32> to vector<48x128xf32>
    %222 = vector.broadcast %220 : f32 to vector<48x128xf32>
    %223 = arith.mulf %222, %221 : vector<48x128xf32>
    %224 = arith.addf %219, %223 : vector<48x128xf32>
    %225 = vector.extract_strided_slice %155 {offsets = [6, 0], sizes = [56, 128], strides = [1, 1]} : vector<64x128xf32> to vector<56x128xf32>
    %c1_92 = arith.constant 1 : index
    %c6_93 = arith.constant 6 : index
    %226 = memref.load %arg3[%c1_92, %c6_93] : memref<4x17xf32, #tpu.memory_space<smem>>
    %227 = vector.extract_strided_slice %225 {offsets = [0, 0], sizes = [48, 128], strides = [1, 1]} : vector<56x128xf32> to vector<48x128xf32>
    %228 = vector.broadcast %226 : f32 to vector<48x128xf32>
    %229 = arith.mulf %228, %227 : vector<48x128xf32>
    %230 = arith.addf %224, %229 : vector<48x128xf32>
    %c1_94 = arith.constant 1 : index
    %c14_95 = arith.constant 14 : index
    %231 = memref.load %arg3[%c1_94, %c14_95] : memref<4x17xf32, #tpu.memory_space<smem>>
    %232 = vector.extract_strided_slice %225 {offsets = [8, 0], sizes = [48, 128], strides = [1, 1]} : vector<56x128xf32> to vector<48x128xf32>
    %233 = vector.broadcast %231 : f32 to vector<48x128xf32>
    %234 = arith.mulf %233, %232 : vector<48x128xf32>
    %235 = arith.addf %230, %234 : vector<48x128xf32>
    %236 = vector.extract_strided_slice %155 {offsets = [7, 0], sizes = [56, 128], strides = [1, 1]} : vector<64x128xf32> to vector<56x128xf32>
    %c1_96 = arith.constant 1 : index
    %c7_97 = arith.constant 7 : index
    %237 = memref.load %arg3[%c1_96, %c7_97] : memref<4x17xf32, #tpu.memory_space<smem>>
    %238 = vector.extract_strided_slice %236 {offsets = [0, 0], sizes = [48, 128], strides = [1, 1]} : vector<56x128xf32> to vector<48x128xf32>
    %239 = vector.broadcast %237 : f32 to vector<48x128xf32>
    %240 = arith.mulf %239, %238 : vector<48x128xf32>
    %241 = arith.addf %235, %240 : vector<48x128xf32>
    %c1_98 = arith.constant 1 : index
    %c15_99 = arith.constant 15 : index
    %242 = memref.load %arg3[%c1_98, %c15_99] : memref<4x17xf32, #tpu.memory_space<smem>>
    %243 = vector.extract_strided_slice %236 {offsets = [8, 0], sizes = [48, 128], strides = [1, 1]} : vector<56x128xf32> to vector<48x128xf32>
    %244 = vector.broadcast %242 : f32 to vector<48x128xf32>
    %245 = arith.mulf %244, %243 : vector<48x128xf32>
    %246 = arith.addf %241, %245 : vector<48x128xf32>
    %c1_100 = arith.constant 1 : index
    %247 = memref.load %arg4[%c1_100] : memref<4xf32, #tpu.memory_space<smem>>
    %248 = vector.broadcast %247 : f32 to vector<48x128xf32>
    %249 = arith.addf %246, %248 : vector<48x128xf32>
    %250 = arith.mulf %249, %249 : vector<48x128xf32>
    %cst_101 = arith.constant dense<0.000000e+00> : vector<128xf32>
    %251 = vector.multi_reduction <add>, %250, %cst_101 [0] : vector<48x128xf32> to vector<128xf32>
    %252 = vector.shape_cast %251 : vector<128xf32> to vector<1x128xf32>
    %253 = arith.addf %132, %252 : vector<1x128xf32>
    %cst_102 = arith.constant 1.000000e-07 : f32
    %cst_103 = arith.constant 1.000000e+04 : f32
    %254 = vector.broadcast %cst_102 : f32 to vector<1x128xf32>
    %255 = arith.maximumf %254, %253 : vector<1x128xf32>
    %256 = vector.broadcast %cst_103 : f32 to vector<1x128xf32>
    %257 = arith.minimumf %256, %255 : vector<1x128xf32>
    %258 = math.log %257 : vector<1x128xf32>
    %cst_104 = arith.constant 0.434294492 : f32
    %259 = vector.broadcast %cst_104 : f32 to vector<1x128xf32>
    %260 = arith.mulf %258, %259 : vector<1x128xf32>
    %cst_105 = arith.constant 1.000000e+01 : f32
    %261 = vector.broadcast %cst_105 : f32 to vector<1x128xf32>
    %262 = arith.mulf %261, %260 : vector<1x128xf32>
    %c1_106 = arith.constant 1 : index
    %c0_107 = arith.constant 0 : index
    %263 = vector.load %arg5[%c1_106, %c0_107] : memref<4x128xf32, #tpu.memory_space<vmem>>, vector<1x128xf32>
    tpu.vector_store %arg5[%c1_106, %c0_107], %262 {strides = array<i32>} : memref<4x128xf32, #tpu.memory_space<vmem>>, vector<1x128xf32>,
    %cst_108 = arith.constant 0.000000e+00 : f32
    %264 = vector.broadcast %cst_108 : f32 to vector<1x128xf32>
    %c2_109 = arith.constant 2 : index
    %c0_110 = arith.constant 0 : index
    %265 = memref.load %arg2[%c2_109, %c0_110] : memref<4x4xf32, #tpu.memory_space<smem>>
    %c0_111 = arith.constant 0 : index
    %c0_112 = arith.constant 0 : index
    %c0_113 = arith.constant 0 : index
    %266 = vector.load %arg1[%c0_111, %c0_112, %c0_113] : memref<4x64x128xf32, #tpu.memory_space<vmem>>, vector<1x64x128xf32>
    %267 = vector.shape_cast %266 : vector<1x64x128xf32> to vector<64x128xf32>
    %268 = vector.broadcast %265 : f32 to vector<64x128xf32>
    %269 = arith.mulf %268, %267 : vector<64x128xf32>
    %c2_114 = arith.constant 2 : index
    %c1_115 = arith.constant 1 : index
    %270 = memref.load %arg2[%c2_114, %c1_115] : memref<4x4xf32, #tpu.memory_space<smem>>
    %c1_116 = arith.constant 1 : index
    %c0_117 = arith.constant 0 : index
    %c0_118 = arith.constant 0 : index
    %271 = vector.load %arg1[%c1_116, %c0_117, %c0_118] : memref<4x64x128xf32, #tpu.memory_space<vmem>>, vector<1x64x128xf32>
    %272 = vector.shape_cast %271 : vector<1x64x128xf32> to vector<64x128xf32>
    %273 = vector.broadcast %270 : f32 to vector<64x128xf32>
    %274 = arith.mulf %273, %272 : vector<64x128xf32>
    %275 = arith.addf %269, %274 : vector<64x128xf32>
    %c2_119 = arith.constant 2 : index
    %c2_120 = arith.constant 2 : index
    %276 = memref.load %arg2[%c2_119, %c2_120] : memref<4x4xf32, #tpu.memory_space<smem>>
    %c2_121 = arith.constant 2 : index
    %c0_122 = arith.constant 0 : index
    %c0_123 = arith.constant 0 : index
    %277 = vector.load %arg1[%c2_121, %c0_122, %c0_123] : memref<4x64x128xf32, #tpu.memory_space<vmem>>, vector<1x64x128xf32>
    %278 = vector.shape_cast %277 : vector<1x64x128xf32> to vector<64x128xf32>
    %279 = vector.broadcast %276 : f32 to vector<64x128xf32>
    %280 = arith.mulf %279, %278 : vector<64x128xf32>
    %281 = arith.addf %275, %280 : vector<64x128xf32>
    %c2_124 = arith.constant 2 : index
    %c3_125 = arith.constant 3 : index
    %282 = memref.load %arg2[%c2_124, %c3_125] : memref<4x4xf32, #tpu.memory_space<smem>>
    %c3_126 = arith.constant 3 : index
    %c0_127 = arith.constant 0 : index
    %c0_128 = arith.constant 0 : index
    %283 = vector.load %arg1[%c3_126, %c0_127, %c0_128] : memref<4x64x128xf32, #tpu.memory_space<vmem>>, vector<1x64x128xf32>
    %284 = vector.shape_cast %283 : vector<1x64x128xf32> to vector<64x128xf32>
    %285 = vector.broadcast %282 : f32 to vector<64x128xf32>
    %286 = arith.mulf %285, %284 : vector<64x128xf32>
    %287 = arith.addf %281, %286 : vector<64x128xf32>
    %c2_129 = arith.constant 2 : index
    %c0_130 = arith.constant 0 : index
    %288 = memref.load %arg3[%c2_129, %c0_130] : memref<4x17xf32, #tpu.memory_space<smem>>
    %289 = vector.extract_strided_slice %287 {offsets = [0, 0], sizes = [48, 128], strides = [1, 1]} : vector<64x128xf32> to vector<48x128xf32>
    %290 = vector.broadcast %288 : f32 to vector<48x128xf32>
    %291 = arith.mulf %290, %289 : vector<48x128xf32>
    %c2_131 = arith.constant 2 : index
    %c8_132 = arith.constant 8 : index
    %292 = memref.load %arg3[%c2_131, %c8_132] : memref<4x17xf32, #tpu.memory_space<smem>>
    %293 = vector.extract_strided_slice %287 {offsets = [8, 0], sizes = [48, 128], strides = [1, 1]} : vector<64x128xf32> to vector<48x128xf32>
    %294 = vector.broadcast %292 : f32 to vector<48x128xf32>
    %295 = arith.mulf %294, %293 : vector<48x128xf32>
    %296 = arith.addf %291, %295 : vector<48x128xf32>
    %c2_133 = arith.constant 2 : index
    %c16_134 = arith.constant 16 : index
    %297 = memref.load %arg3[%c2_133, %c16_134] : memref<4x17xf32, #tpu.memory_space<smem>>
    %298 = vector.extract_strided_slice %287 {offsets = [16, 0], sizes = [48, 128], strides = [1, 1]} : vector<64x128xf32> to vector<48x128xf32>
    %299 = vector.broadcast %297 : f32 to vector<48x128xf32>
    %300 = arith.mulf %299, %298 : vector<48x128xf32>
    %301 = arith.addf %296, %300 : vector<48x128xf32>
    %302 = vector.extract_strided_slice %287 {offsets = [1, 0], sizes = [56, 128], strides = [1, 1]} : vector<64x128xf32> to vector<56x128xf32>
    %c2_135 = arith.constant 2 : index
    %c1_136 = arith.constant 1 : index
    %303 = memref.load %arg3[%c2_135, %c1_136] : memref<4x17xf32, #tpu.memory_space<smem>>
    %304 = vector.extract_strided_slice %302 {offsets = [0, 0], sizes = [48, 128], strides = [1, 1]} : vector<56x128xf32> to vector<48x128xf32>
    %305 = vector.broadcast %303 : f32 to vector<48x128xf32>
    %306 = arith.mulf %305, %304 : vector<48x128xf32>
    %307 = arith.addf %301, %306 : vector<48x128xf32>
    %c2_137 = arith.constant 2 : index
    %c9_138 = arith.constant 9 : index
    %308 = memref.load %arg3[%c2_137, %c9_138] : memref<4x17xf32, #tpu.memory_space<smem>>
    %309 = vector.extract_strided_slice %302 {offsets = [8, 0], sizes = [48, 128], strides = [1, 1]} : vector<56x128xf32> to vector<48x128xf32>
    %310 = vector.broadcast %308 : f32 to vector<48x128xf32>
    %311 = arith.mulf %310, %309 : vector<48x128xf32>
    %312 = arith.addf %307, %311 : vector<48x128xf32>
    %313 = vector.extract_strided_slice %287 {offsets = [2, 0], sizes = [56, 128], strides = [1, 1]} : vector<64x128xf32> to vector<56x128xf32>
    %c2_139 = arith.constant 2 : index
    %c2_140 = arith.constant 2 : index
    %314 = memref.load %arg3[%c2_139, %c2_140] : memref<4x17xf32, #tpu.memory_space<smem>>
    %315 = vector.extract_strided_slice %313 {offsets = [0, 0], sizes = [48, 128], strides = [1, 1]} : vector<56x128xf32> to vector<48x128xf32>
    %316 = vector.broadcast %314 : f32 to vector<48x128xf32>
    %317 = arith.mulf %316, %315 : vector<48x128xf32>
    %318 = arith.addf %312, %317 : vector<48x128xf32>
    %c2_141 = arith.constant 2 : index
    %c10_142 = arith.constant 10 : index
    %319 = memref.load %arg3[%c2_141, %c10_142] : memref<4x17xf32, #tpu.memory_space<smem>>
    %320 = vector.extract_strided_slice %313 {offsets = [8, 0], sizes = [48, 128], strides = [1, 1]} : vector<56x128xf32> to vector<48x128xf32>
    %321 = vector.broadcast %319 : f32 to vector<48x128xf32>
    %322 = arith.mulf %321, %320 : vector<48x128xf32>
    %323 = arith.addf %318, %322 : vector<48x128xf32>
    %324 = vector.extract_strided_slice %287 {offsets = [3, 0], sizes = [56, 128], strides = [1, 1]} : vector<64x128xf32> to vector<56x128xf32>
    %c2_143 = arith.constant 2 : index
    %c3_144 = arith.constant 3 : index
    %325 = memref.load %arg3[%c2_143, %c3_144] : memref<4x17xf32, #tpu.memory_space<smem>>
    %326 = vector.extract_strided_slice %324 {offsets = [0, 0], sizes = [48, 128], strides = [1, 1]} : vector<56x128xf32> to vector<48x128xf32>
    %327 = vector.broadcast %325 : f32 to vector<48x128xf32>
    %328 = arith.mulf %327, %326 : vector<48x128xf32>
    %329 = arith.addf %323, %328 : vector<48x128xf32>
    %c2_145 = arith.constant 2 : index
    %c11_146 = arith.constant 11 : index
    %330 = memref.load %arg3[%c2_145, %c11_146] : memref<4x17xf32, #tpu.memory_space<smem>>
    %331 = vector.extract_strided_slice %324 {offsets = [8, 0], sizes = [48, 128], strides = [1, 1]} : vector<56x128xf32> to vector<48x128xf32>
    %332 = vector.broadcast %330 : f32 to vector<48x128xf32>
    %333 = arith.mulf %332, %331 : vector<48x128xf32>
    %334 = arith.addf %329, %333 : vector<48x128xf32>
    %335 = vector.extract_strided_slice %287 {offsets = [4, 0], sizes = [56, 128], strides = [1, 1]} : vector<64x128xf32> to vector<56x128xf32>
    %c2_147 = arith.constant 2 : index
    %c4_148 = arith.constant 4 : index
    %336 = memref.load %arg3[%c2_147, %c4_148] : memref<4x17xf32, #tpu.memory_space<smem>>
    %337 = vector.extract_strided_slice %335 {offsets = [0, 0], sizes = [48, 128], strides = [1, 1]} : vector<56x128xf32> to vector<48x128xf32>
    %338 = vector.broadcast %336 : f32 to vector<48x128xf32>
    %339 = arith.mulf %338, %337 : vector<48x128xf32>
    %340 = arith.addf %334, %339 : vector<48x128xf32>
    %c2_149 = arith.constant 2 : index
    %c12_150 = arith.constant 12 : index
    %341 = memref.load %arg3[%c2_149, %c12_150] : memref<4x17xf32, #tpu.memory_space<smem>>
    %342 = vector.extract_strided_slice %335 {offsets = [8, 0], sizes = [48, 128], strides = [1, 1]} : vector<56x128xf32> to vector<48x128xf32>
    %343 = vector.broadcast %341 : f32 to vector<48x128xf32>
    %344 = arith.mulf %343, %342 : vector<48x128xf32>
    %345 = arith.addf %340, %344 : vector<48x128xf32>
    %346 = vector.extract_strided_slice %287 {offsets = [5, 0], sizes = [56, 128], strides = [1, 1]} : vector<64x128xf32> to vector<56x128xf32>
    %c2_151 = arith.constant 2 : index
    %c5_152 = arith.constant 5 : index
    %347 = memref.load %arg3[%c2_151, %c5_152] : memref<4x17xf32, #tpu.memory_space<smem>>
    %348 = vector.extract_strided_slice %346 {offsets = [0, 0], sizes = [48, 128], strides = [1, 1]} : vector<56x128xf32> to vector<48x128xf32>
    %349 = vector.broadcast %347 : f32 to vector<48x128xf32>
    %350 = arith.mulf %349, %348 : vector<48x128xf32>
    %351 = arith.addf %345, %350 : vector<48x128xf32>
    %c2_153 = arith.constant 2 : index
    %c13_154 = arith.constant 13 : index
    %352 = memref.load %arg3[%c2_153, %c13_154] : memref<4x17xf32, #tpu.memory_space<smem>>
    %353 = vector.extract_strided_slice %346 {offsets = [8, 0], sizes = [48, 128], strides = [1, 1]} : vector<56x128xf32> to vector<48x128xf32>
    %354 = vector.broadcast %352 : f32 to vector<48x128xf32>
    %355 = arith.mulf %354, %353 : vector<48x128xf32>
    %356 = arith.addf %351, %355 : vector<48x128xf32>
    %357 = vector.extract_strided_slice %287 {offsets = [6, 0], sizes = [56, 128], strides = [1, 1]} : vector<64x128xf32> to vector<56x128xf32>
    %c2_155 = arith.constant 2 : index
    %c6_156 = arith.constant 6 : index
    %358 = memref.load %arg3[%c2_155, %c6_156] : memref<4x17xf32, #tpu.memory_space<smem>>
    %359 = vector.extract_strided_slice %357 {offsets = [0, 0], sizes = [48, 128], strides = [1, 1]} : vector<56x128xf32> to vector<48x128xf32>
    %360 = vector.broadcast %358 : f32 to vector<48x128xf32>
    %361 = arith.mulf %360, %359 : vector<48x128xf32>
    %362 = arith.addf %356, %361 : vector<48x128xf32>
    %c2_157 = arith.constant 2 : index
    %c14_158 = arith.constant 14 : index
    %363 = memref.load %arg3[%c2_157, %c14_158] : memref<4x17xf32, #tpu.memory_space<smem>>
    %364 = vector.extract_strided_slice %357 {offsets = [8, 0], sizes = [48, 128], strides = [1, 1]} : vector<56x128xf32> to vector<48x128xf32>
    %365 = vector.broadcast %363 : f32 to vector<48x128xf32>
    %366 = arith.mulf %365, %364 : vector<48x128xf32>
    %367 = arith.addf %362, %366 : vector<48x128xf32>
    %368 = vector.extract_strided_slice %287 {offsets = [7, 0], sizes = [56, 128], strides = [1, 1]} : vector<64x128xf32> to vector<56x128xf32>
    %c2_159 = arith.constant 2 : index
    %c7_160 = arith.constant 7 : index
    %369 = memref.load %arg3[%c2_159, %c7_160] : memref<4x17xf32, #tpu.memory_space<smem>>
    %370 = vector.extract_strided_slice %368 {offsets = [0, 0], sizes = [48, 128], strides = [1, 1]} : vector<56x128xf32> to vector<48x128xf32>
    %371 = vector.broadcast %369 : f32 to vector<48x128xf32>
    %372 = arith.mulf %371, %370 : vector<48x128xf32>
    %373 = arith.addf %367, %372 : vector<48x128xf32>
    %c2_161 = arith.constant 2 : index
    %c15_162 = arith.constant 15 : index
    %374 = memref.load %arg3[%c2_161, %c15_162] : memref<4x17xf32, #tpu.memory_space<smem>>
    %375 = vector.extract_strided_slice %368 {offsets = [8, 0], sizes = [48, 128], strides = [1, 1]} : vector<56x128xf32> to vector<48x128xf32>
    %376 = vector.broadcast %374 : f32 to vector<48x128xf32>
    %377 = arith.mulf %376, %375 : vector<48x128xf32>
    %378 = arith.addf %373, %377 : vector<48x128xf32>
    %c2_163 = arith.constant 2 : index
    %379 = memref.load %arg4[%c2_163] : memref<4xf32, #tpu.memory_space<smem>>
    %380 = vector.broadcast %379 : f32 to vector<48x128xf32>
    %381 = arith.addf %378, %380 : vector<48x128xf32>
    %382 = arith.mulf %381, %381 : vector<48x128xf32>
    %cst_164 = arith.constant dense<0.000000e+00> : vector<128xf32>
    %383 = vector.multi_reduction <add>, %382, %cst_164 [0] : vector<48x128xf32> to vector<128xf32>
    %384 = vector.shape_cast %383 : vector<128xf32> to vector<1x128xf32>
    %385 = arith.addf %264, %384 : vector<1x128xf32>
    %cst_165 = arith.constant 1.000000e-07 : f32
    %cst_166 = arith.constant 1.000000e+04 : f32
    %386 = vector.broadcast %cst_165 : f32 to vector<1x128xf32>
    %387 = arith.maximumf %386, %385 : vector<1x128xf32>
    %388 = vector.broadcast %cst_166 : f32 to vector<1x128xf32>
    %389 = arith.minimumf %388, %387 : vector<1x128xf32>
    %390 = math.log %389 : vector<1x128xf32>
    %cst_167 = arith.constant 0.434294492 : f32
    %391 = vector.broadcast %cst_167 : f32 to vector<1x128xf32>
    %392 = arith.mulf %390, %391 : vector<1x128xf32>
    %cst_168 = arith.constant 1.000000e+01 : f32
    %393 = vector.broadcast %cst_168 : f32 to vector<1x128xf32>
    %394 = arith.mulf %393, %392 : vector<1x128xf32>
    %c2_169 = arith.constant 2 : index
    %c0_170 = arith.constant 0 : index
    %395 = vector.load %arg5[%c2_169, %c0_170] : memref<4x128xf32, #tpu.memory_space<vmem>>, vector<1x128xf32>
    tpu.vector_store %arg5[%c2_169, %c0_170], %394 {strides = array<i32>} : memref<4x128xf32, #tpu.memory_space<vmem>>, vector<1x128xf32>,
    %cst_171 = arith.constant 0.000000e+00 : f32
    %396 = vector.broadcast %cst_171 : f32 to vector<1x128xf32>
    %c3_172 = arith.constant 3 : index
    %c0_173 = arith.constant 0 : index
    %397 = memref.load %arg2[%c3_172, %c0_173] : memref<4x4xf32, #tpu.memory_space<smem>>
    %c0_174 = arith.constant 0 : index
    %c0_175 = arith.constant 0 : index
    %c0_176 = arith.constant 0 : index
    %398 = vector.load %arg1[%c0_174, %c0_175, %c0_176] : memref<4x64x128xf32, #tpu.memory_space<vmem>>, vector<1x64x128xf32>
    %399 = vector.shape_cast %398 : vector<1x64x128xf32> to vector<64x128xf32>
    %400 = vector.broadcast %397 : f32 to vector<64x128xf32>
    %401 = arith.mulf %400, %399 : vector<64x128xf32>
    %c3_177 = arith.constant 3 : index
    %c1_178 = arith.constant 1 : index
    %402 = memref.load %arg2[%c3_177, %c1_178] : memref<4x4xf32, #tpu.memory_space<smem>>
    %c1_179 = arith.constant 1 : index
    %c0_180 = arith.constant 0 : index
    %c0_181 = arith.constant 0 : index
    %403 = vector.load %arg1[%c1_179, %c0_180, %c0_181] : memref<4x64x128xf32, #tpu.memory_space<vmem>>, vector<1x64x128xf32>
    %404 = vector.shape_cast %403 : vector<1x64x128xf32> to vector<64x128xf32>
    %405 = vector.broadcast %402 : f32 to vector<64x128xf32>
    %406 = arith.mulf %405, %404 : vector<64x128xf32>
    %407 = arith.addf %401, %406 : vector<64x128xf32>
    %c3_182 = arith.constant 3 : index
    %c2_183 = arith.constant 2 : index
    %408 = memref.load %arg2[%c3_182, %c2_183] : memref<4x4xf32, #tpu.memory_space<smem>>
    %c2_184 = arith.constant 2 : index
    %c0_185 = arith.constant 0 : index
    %c0_186 = arith.constant 0 : index
    %409 = vector.load %arg1[%c2_184, %c0_185, %c0_186] : memref<4x64x128xf32, #tpu.memory_space<vmem>>, vector<1x64x128xf32>
    %410 = vector.shape_cast %409 : vector<1x64x128xf32> to vector<64x128xf32>
    %411 = vector.broadcast %408 : f32 to vector<64x128xf32>
    %412 = arith.mulf %411, %410 : vector<64x128xf32>
    %413 = arith.addf %407, %412 : vector<64x128xf32>
    %c3_187 = arith.constant 3 : index
    %c3_188 = arith.constant 3 : index
    %414 = memref.load %arg2[%c3_187, %c3_188] : memref<4x4xf32, #tpu.memory_space<smem>>
    %c3_189 = arith.constant 3 : index
    %c0_190 = arith.constant 0 : index
    %c0_191 = arith.constant 0 : index
    %415 = vector.load %arg1[%c3_189, %c0_190, %c0_191] : memref<4x64x128xf32, #tpu.memory_space<vmem>>, vector<1x64x128xf32>
    %416 = vector.shape_cast %415 : vector<1x64x128xf32> to vector<64x128xf32>
    %417 = vector.broadcast %414 : f32 to vector<64x128xf32>
    %418 = arith.mulf %417, %416 : vector<64x128xf32>
    %419 = arith.addf %413, %418 : vector<64x128xf32>
    %c3_192 = arith.constant 3 : index
    %c0_193 = arith.constant 0 : index
    %420 = memref.load %arg3[%c3_192, %c0_193] : memref<4x17xf32, #tpu.memory_space<smem>>
    %421 = vector.extract_strided_slice %419 {offsets = [0, 0], sizes = [48, 128], strides = [1, 1]} : vector<64x128xf32> to vector<48x128xf32>
    %422 = vector.broadcast %420 : f32 to vector<48x128xf32>
    %423 = arith.mulf %422, %421 : vector<48x128xf32>
    %c3_194 = arith.constant 3 : index
    %c8_195 = arith.constant 8 : index
    %424 = memref.load %arg3[%c3_194, %c8_195] : memref<4x17xf32, #tpu.memory_space<smem>>
    %425 = vector.extract_strided_slice %419 {offsets = [8, 0], sizes = [48, 128], strides = [1, 1]} : vector<64x128xf32> to vector<48x128xf32>
    %426 = vector.broadcast %424 : f32 to vector<48x128xf32>
    %427 = arith.mulf %426, %425 : vector<48x128xf32>
    %428 = arith.addf %423, %427 : vector<48x128xf32>
    %c3_196 = arith.constant 3 : index
    %c16_197 = arith.constant 16 : index
    %429 = memref.load %arg3[%c3_196, %c16_197] : memref<4x17xf32, #tpu.memory_space<smem>>
    %430 = vector.extract_strided_slice %419 {offsets = [16, 0], sizes = [48, 128], strides = [1, 1]} : vector<64x128xf32> to vector<48x128xf32>
    %431 = vector.broadcast %429 : f32 to vector<48x128xf32>
    %432 = arith.mulf %431, %430 : vector<48x128xf32>
    %433 = arith.addf %428, %432 : vector<48x128xf32>
    %434 = vector.extract_strided_slice %419 {offsets = [1, 0], sizes = [56, 128], strides = [1, 1]} : vector<64x128xf32> to vector<56x128xf32>
    %c3_198 = arith.constant 3 : index
    %c1_199 = arith.constant 1 : index
    %435 = memref.load %arg3[%c3_198, %c1_199] : memref<4x17xf32, #tpu.memory_space<smem>>
    %436 = vector.extract_strided_slice %434 {offsets = [0, 0], sizes = [48, 128], strides = [1, 1]} : vector<56x128xf32> to vector<48x128xf32>
    %437 = vector.broadcast %435 : f32 to vector<48x128xf32>
    %438 = arith.mulf %437, %436 : vector<48x128xf32>
    %439 = arith.addf %433, %438 : vector<48x128xf32>
    %c3_200 = arith.constant 3 : index
    %c9_201 = arith.constant 9 : index
    %440 = memref.load %arg3[%c3_200, %c9_201] : memref<4x17xf32, #tpu.memory_space<smem>>
    %441 = vector.extract_strided_slice %434 {offsets = [8, 0], sizes = [48, 128], strides = [1, 1]} : vector<56x128xf32> to vector<48x128xf32>
    %442 = vector.broadcast %440 : f32 to vector<48x128xf32>
    %443 = arith.mulf %442, %441 : vector<48x128xf32>
    %444 = arith.addf %439, %443 : vector<48x128xf32>
    %445 = vector.extract_strided_slice %419 {offsets = [2, 0], sizes = [56, 128], strides = [1, 1]} : vector<64x128xf32> to vector<56x128xf32>
    %c3_202 = arith.constant 3 : index
    %c2_203 = arith.constant 2 : index
    %446 = memref.load %arg3[%c3_202, %c2_203] : memref<4x17xf32, #tpu.memory_space<smem>>
    %447 = vector.extract_strided_slice %445 {offsets = [0, 0], sizes = [48, 128], strides = [1, 1]} : vector<56x128xf32> to vector<48x128xf32>
    %448 = vector.broadcast %446 : f32 to vector<48x128xf32>
    %449 = arith.mulf %448, %447 : vector<48x128xf32>
    %450 = arith.addf %444, %449 : vector<48x128xf32>
    %c3_204 = arith.constant 3 : index
    %c10_205 = arith.constant 10 : index
    %451 = memref.load %arg3[%c3_204, %c10_205] : memref<4x17xf32, #tpu.memory_space<smem>>
    %452 = vector.extract_strided_slice %445 {offsets = [8, 0], sizes = [48, 128], strides = [1, 1]} : vector<56x128xf32> to vector<48x128xf32>
    %453 = vector.broadcast %451 : f32 to vector<48x128xf32>
    %454 = arith.mulf %453, %452 : vector<48x128xf32>
    %455 = arith.addf %450, %454 : vector<48x128xf32>
    %456 = vector.extract_strided_slice %419 {offsets = [3, 0], sizes = [56, 128], strides = [1, 1]} : vector<64x128xf32> to vector<56x128xf32>
    %c3_206 = arith.constant 3 : index
    %c3_207 = arith.constant 3 : index
    %457 = memref.load %arg3[%c3_206, %c3_207] : memref<4x17xf32, #tpu.memory_space<smem>>
    %458 = vector.extract_strided_slice %456 {offsets = [0, 0], sizes = [48, 128], strides = [1, 1]} : vector<56x128xf32> to vector<48x128xf32>
    %459 = vector.broadcast %457 : f32 to vector<48x128xf32>
    %460 = arith.mulf %459, %458 : vector<48x128xf32>
    %461 = arith.addf %455, %460 : vector<48x128xf32>
    %c3_208 = arith.constant 3 : index
    %c11_209 = arith.constant 11 : index
    %462 = memref.load %arg3[%c3_208, %c11_209] : memref<4x17xf32, #tpu.memory_space<smem>>
    %463 = vector.extract_strided_slice %456 {offsets = [8, 0], sizes = [48, 128], strides = [1, 1]} : vector<56x128xf32> to vector<48x128xf32>
    %464 = vector.broadcast %462 : f32 to vector<48x128xf32>
    %465 = arith.mulf %464, %463 : vector<48x128xf32>
    %466 = arith.addf %461, %465 : vector<48x128xf32>
    %467 = vector.extract_strided_slice %419 {offsets = [4, 0], sizes = [56, 128], strides = [1, 1]} : vector<64x128xf32> to vector<56x128xf32>
    %c3_210 = arith.constant 3 : index
    %c4_211 = arith.constant 4 : index
    %468 = memref.load %arg3[%c3_210, %c4_211] : memref<4x17xf32, #tpu.memory_space<smem>>
    %469 = vector.extract_strided_slice %467 {offsets = [0, 0], sizes = [48, 128], strides = [1, 1]} : vector<56x128xf32> to vector<48x128xf32>
    %470 = vector.broadcast %468 : f32 to vector<48x128xf32>
    %471 = arith.mulf %470, %469 : vector<48x128xf32>
    %472 = arith.addf %466, %471 : vector<48x128xf32>
    %c3_212 = arith.constant 3 : index
    %c12_213 = arith.constant 12 : index
    %473 = memref.load %arg3[%c3_212, %c12_213] : memref<4x17xf32, #tpu.memory_space<smem>>
    %474 = vector.extract_strided_slice %467 {offsets = [8, 0], sizes = [48, 128], strides = [1, 1]} : vector<56x128xf32> to vector<48x128xf32>
    %475 = vector.broadcast %473 : f32 to vector<48x128xf32>
    %476 = arith.mulf %475, %474 : vector<48x128xf32>
    %477 = arith.addf %472, %476 : vector<48x128xf32>
    %478 = vector.extract_strided_slice %419 {offsets = [5, 0], sizes = [56, 128], strides = [1, 1]} : vector<64x128xf32> to vector<56x128xf32>
    %c3_214 = arith.constant 3 : index
    %c5_215 = arith.constant 5 : index
    %479 = memref.load %arg3[%c3_214, %c5_215] : memref<4x17xf32, #tpu.memory_space<smem>>
    %480 = vector.extract_strided_slice %478 {offsets = [0, 0], sizes = [48, 128], strides = [1, 1]} : vector<56x128xf32> to vector<48x128xf32>
    %481 = vector.broadcast %479 : f32 to vector<48x128xf32>
    %482 = arith.mulf %481, %480 : vector<48x128xf32>
    %483 = arith.addf %477, %482 : vector<48x128xf32>
    %c3_216 = arith.constant 3 : index
    %c13_217 = arith.constant 13 : index
    %484 = memref.load %arg3[%c3_216, %c13_217] : memref<4x17xf32, #tpu.memory_space<smem>>
    %485 = vector.extract_strided_slice %478 {offsets = [8, 0], sizes = [48, 128], strides = [1, 1]} : vector<56x128xf32> to vector<48x128xf32>
    %486 = vector.broadcast %484 : f32 to vector<48x128xf32>
    %487 = arith.mulf %486, %485 : vector<48x128xf32>
    %488 = arith.addf %483, %487 : vector<48x128xf32>
    %489 = vector.extract_strided_slice %419 {offsets = [6, 0], sizes = [56, 128], strides = [1, 1]} : vector<64x128xf32> to vector<56x128xf32>
    %c3_218 = arith.constant 3 : index
    %c6_219 = arith.constant 6 : index
    %490 = memref.load %arg3[%c3_218, %c6_219] : memref<4x17xf32, #tpu.memory_space<smem>>
    %491 = vector.extract_strided_slice %489 {offsets = [0, 0], sizes = [48, 128], strides = [1, 1]} : vector<56x128xf32> to vector<48x128xf32>
    %492 = vector.broadcast %490 : f32 to vector<48x128xf32>
    %493 = arith.mulf %492, %491 : vector<48x128xf32>
    %494 = arith.addf %488, %493 : vector<48x128xf32>
    %c3_220 = arith.constant 3 : index
    %c14_221 = arith.constant 14 : index
    %495 = memref.load %arg3[%c3_220, %c14_221] : memref<4x17xf32, #tpu.memory_space<smem>>
    %496 = vector.extract_strided_slice %489 {offsets = [8, 0], sizes = [48, 128], strides = [1, 1]} : vector<56x128xf32> to vector<48x128xf32>
    %497 = vector.broadcast %495 : f32 to vector<48x128xf32>
    %498 = arith.mulf %497, %496 : vector<48x128xf32>
    %499 = arith.addf %494, %498 : vector<48x128xf32>
    %500 = vector.extract_strided_slice %419 {offsets = [7, 0], sizes = [56, 128], strides = [1, 1]} : vector<64x128xf32> to vector<56x128xf32>
    %c3_222 = arith.constant 3 : index
    %c7_223 = arith.constant 7 : index
    %501 = memref.load %arg3[%c3_222, %c7_223] : memref<4x17xf32, #tpu.memory_space<smem>>
    %502 = vector.extract_strided_slice %500 {offsets = [0, 0], sizes = [48, 128], strides = [1, 1]} : vector<56x128xf32> to vector<48x128xf32>
    %503 = vector.broadcast %501 : f32 to vector<48x128xf32>
    %504 = arith.mulf %503, %502 : vector<48x128xf32>
    %505 = arith.addf %499, %504 : vector<48x128xf32>
    %c3_224 = arith.constant 3 : index
    %c15_225 = arith.constant 15 : index
    %506 = memref.load %arg3[%c3_224, %c15_225] : memref<4x17xf32, #tpu.memory_space<smem>>
    %507 = vector.extract_strided_slice %500 {offsets = [8, 0], sizes = [48, 128], strides = [1, 1]} : vector<56x128xf32> to vector<48x128xf32>
    %508 = vector.broadcast %506 : f32 to vector<48x128xf32>
    %509 = arith.mulf %508, %507 : vector<48x128xf32>
    %510 = arith.addf %505, %509 : vector<48x128xf32>
    %c3_226 = arith.constant 3 : index
    %511 = memref.load %arg4[%c3_226] : memref<4xf32, #tpu.memory_space<smem>>
    %512 = vector.broadcast %511 : f32 to vector<48x128xf32>
    %513 = arith.addf %510, %512 : vector<48x128xf32>
    %514 = arith.mulf %513, %513 : vector<48x128xf32>
    %cst_227 = arith.constant dense<0.000000e+00> : vector<128xf32>
    %515 = vector.multi_reduction <add>, %514, %cst_227 [0] : vector<48x128xf32> to vector<128xf32>
    %516 = vector.shape_cast %515 : vector<128xf32> to vector<1x128xf32>
    %517 = arith.addf %396, %516 : vector<1x128xf32>
    %cst_228 = arith.constant 1.000000e-07 : f32
    %cst_229 = arith.constant 1.000000e+04 : f32
    %518 = vector.broadcast %cst_228 : f32 to vector<1x128xf32>
    %519 = arith.maximumf %518, %517 : vector<1x128xf32>
    %520 = vector.broadcast %cst_229 : f32 to vector<1x128xf32>
    %521 = arith.minimumf %520, %519 : vector<1x128xf32>
    %522 = math.log %521 : vector<1x128xf32>
    %cst_230 = arith.constant 0.434294492 : f32
    %523 = vector.broadcast %cst_230 : f32 to vector<1x128xf32>
    %524 = arith.mulf %522, %523 : vector<1x128xf32>
    %cst_231 = arith.constant 1.000000e+01 : f32
    %525 = vector.broadcast %cst_231 : f32 to vector<1x128xf32>
    %526 = arith.mulf %525, %524 : vector<1x128xf32>
    %c3_232 = arith.constant 3 : index
    %c0_233 = arith.constant 0 : index
    %527 = vector.load %arg5[%c3_232, %c0_233] : memref<4x128xf32, #tpu.memory_space<vmem>>, vector<1x128xf32>
    tpu.vector_store %arg5[%c3_232, %c0_233], %526 {strides = array<i32>} : memref<4x128xf32, #tpu.memory_space<vmem>>, vector<1x128xf32>,
    return
  }
  func.func @transform_0(%arg0: i32) -> (i32, i32, i32) {
    %c0_i32 = arith.constant 0 : i32
    %c0_i32_0 = arith.constant 0 : i32
    %c0_i32_1 = arith.constant 0 : i32
    return %c0_i32, %c0_i32_0, %arg0 : i32, i32, i32
  }
  func.func @transform_1(%arg0: i32) -> (i32, i32) {
    %c0_i32 = arith.constant 0 : i32
    %c0_i32_0 = arith.constant 0 : i32
    %c0_i32_1 = arith.constant 0 : i32
    return %c0_i32, %c0_i32_0 : i32, i32
  }
  func.func @transform_2(%arg0: i32) -> (i32, i32) {
    %c0_i32 = arith.constant 0 : i32
    %c0_i32_0 = arith.constant 0 : i32
    %c0_i32_1 = arith.constant 0 : i32
    return %c0_i32, %c0_i32_0 : i32, i32
  }
  func.func @transform_3(%arg0: i32) -> i32 {
    %c0_i32 = arith.constant 0 : i32
    %c0_i32_0 = arith.constant 0 : i32
    return %c0_i32 : i32
  }
  func.func @transform_4(%arg0: i32) -> (i32, i32) {
    %c0_i32 = arith.constant 0 : i32
    %c0_i32_0 = arith.constant 0 : i32
    return %c0_i32, %arg0 : i32, i32
  }
}

</mosaic_0001>

<bundles_post_ra>
// kernel: tpu_custom_call.1
= control target key start
LH: loop header
LB: loop body
LE: loop exit
PB: predicated region body
PF: predicated region fallthrough
CT: control target
= control target key end

     0   :  { %9 = vsyncpa [#allocation3], 0  ;;  %s4456_s0 = inlined_call_operand.hbm [shape: f32[4,64,128], index: 0, kind: input, shape index: {}]   ;;  %s4457_s1 = inlined_call_operand.hbm [shape: f32[4,4], index: 1, kind: input, shape index: {}]   ;;  %s4458_s2 = inlined_call_operand.vmem [shape: f32[4,17], index: 2, kind: input, shape index: {}]   ;;  %s4459_s3 = inlined_call_operand.vmem [shape: f32[4], index: 3, kind: input, shape index: {}]   ;;  %s4460_s4 = inlined_call_operand.hbm [shape: f32[4,128], index: 4, kind: output, shape index: {}]  }
   0x1   :  { %10 = vsyncpa [#allocation5], 0 }
   0x2   :  { %11 = vsyncpa [#allocation6], 0 }
   0x3   :  { %12 = vsyncpa [#allocation10], 0 }
   0x4   :  { %13 = vsyncpa [#allocation4], 0  ;;  %s3239_s15 = smov [#allocation2]   ;;  %s3151_s19 = scalar_lea.hbm %s4456_s0, 4096 }
   0x5   :  { %s19_s16 = sshll.u32 %s3239_s15, 4  ;;  %p3152_p0 = scmp.ne.s32.totalorder %s4456_s0, %s3151_s19  ;;  %s20_s16 = int_to_ptr.vmem [resolvable:$true] %s19_s16 }
   0x6   :  { %p3155_p1 = scmp.lt.u32.totalorder %s3151_s19, %s4456_s0 }
   0x8   :  { %p3157_p2 = pnand %p3155_p1, %p3152_p0 }
   0xa   :  { %3160 = shalt.err (!%p3157_p2)
}
   0xb   :  { %s3161_s24 = scalar_lea.vmem %s20_s16, 4096  ;;  %p3166_p4 = scmp.lt.s32.totalorder %s20_s16, %s20_s16 }
   0xc   :  { %p3162_p3 = scmp.ne.s32.totalorder %s20_s16, %s3161_s24  ;;  %p3167_p5 = scmp.lt.s32.totalorder %s3161_s24, %s3161_s24 }
   0xe   :  { %p3168_p6 = por %p3167_p5, %p3166_p4 }
  0x10   :  { %p3169_p7 = pnand %p3168_p6, %p3162_p3 }
  0x12   :  { %3172 = shalt.err (!%p3169_p7)
}
  0x13   :  { %s3240_s25 = smov 128   ;;  %s3241_s26 = smov 8  }
  0x14   :  { %25 = dma.hbm_to_vmem [thread:$0]  %s4456_s0, 4096, %s20_s16, [#allocation3], %s3240_s25, %s3240_s25, %s3241_s26  }
  0x15   :  { %s3173_s5 = scalar_lea.hbm %s4457_s1, 64 }
  0x16   :  { %p3174_p8 = scmp.ne.s32.totalorder %s4457_s1, %s3173_s5  ;;  %p3177_p9 = scmp.lt.u32.totalorder %s3173_s5, %s4457_s1 }
  0x18   :  { %p3179_p10 = pnand %p3177_p9, %p3174_p8 }
  0x1a   :  { %3182 = shalt.err (!%p3179_p10)
}
  0x1b   :  { %s3242_s10 = smov [#allocation7]   ;;  %s40_s14 = sshll.u32 %s4458_s2, 4  ;;  %s41_s14 = int_to_ptr.vmem [resolvable:$true] %s40_s14 }
  0x1c   :  { %33 = dma.hbm_to_smem %s4457_s1, 64, %s3242_s10, [#allocation5]  }
  0x1d   :  { %s50_s17 = sshll.u32 %s4459_s3, 4  ;;  %s3183_s18 = scalar_lea.vmem %s41_s14, 64  ;;  %s51_s17 = int_to_ptr.vmem [resolvable:$true] %s50_s17 }
  0x1e   :  { %p3184_p11 = scmp.ne.s32.totalorder %s41_s14, %s3183_s18  ;;  %p3188_p12 = scmp.lt.s32.totalorder %s41_s14, %s41_s14 }
  0x1f   :  { %p3189_p13 = scmp.lt.s32.totalorder %s3183_s18, %s3183_s18 }
  0x21   :  { %p3190_p0 = por %p3189_p13, %p3188_p12 }
  0x23   :  { %p3191_p1 = pnand %p3190_p0, %p3184_p11 }
  0x25   :  { %3194 = shalt.err (!%p3191_p1)
}
  0x26   :  { %s3243_s19 = smov [#allocation8]   ;;  %s3195_s1 = scalar_lea.vmem %s51_s17, 16 }
  0x27   :  { %43 = dma.vmem_to_smem %s41_s14, 64, %s3243_s19, [#allocation6]  }
  0x28   :  { %p3196_p2 = scmp.ne.s32.totalorder %s51_s17, %s3195_s1  ;;  %p3200_p3 = scmp.lt.s32.totalorder %s51_s17, %s51_s17 }
  0x29   :  { %p3201_p4 = scmp.lt.s32.totalorder %s3195_s1, %s3195_s1 }
  0x2b   :  { %p3202_p5 = por %p3201_p4, %p3200_p3 }
  0x2d   :  { %p3203_p6 = pnand %p3202_p5, %p3196_p2 }
  0x2f   :  { %3206 = shalt.err (!%p3203_p6)
}
  0x30   :  { %s3244_s2 = smov [#allocation9]  }
  0x31   :  { %53 = dma.vmem_to_smem %s51_s17, 16, %s3244_s2, [#allocation10]  }
  0x32   :  { %3229 = dma.done.wait [#allocation3], 4096  }
  0x33   :  { %3230 = vsyncadd [#allocation3], 4294963200 }
  0x34   :  { %3231 = dma.done.wait [#allocation5], 64  }
  0x35   :  { %3232 = vsyncadd [#allocation5], 4294967232 }
  0x36   :  { %3233 = dma.done.wait [#allocation6], 64  }
  0x37   :  { %3234 = vsyncadd [#allocation6], 4294967232 }
  0x38   :  { %3235 = dma.done.wait [#allocation10], 16  }
  0x39   :  { %3236 = vsyncadd [#allocation10], 4294967280 }
  0x3a   :  { %66 = sfence }
  0x3b   :  { %s67_s3 = sld [smem:[#allocation7]]  ;;  %s3051_s20 = sld [smem:[#allocation7 + $0x1]]  ;;  %v68_v0 = vld [vmem:[#allocation2] sm:$0xff]  ;;  %v69_v1 = vld [vmem:[#allocation2 + $0x8] sm:$0xff]  ;;  %v70_v2 = vld [vmem:[#allocation2 + $0x10] sm:$0xff]  ;;  %vm218_vm0 = vcmask 1046528  }
  0x3c   :  { %s3052_s21 = sld [smem:[#allocation7 + $0x2]]  ;;  %s3053_s22 = sld [smem:[#allocation7 + $0x3]]  ;;  %v71_v3 = vld [vmem:[#allocation2 + $0x18] sm:$0xff]  ;;  %v72_v4 = vld [vmem:[#allocation2 + $0x20] sm:$0xff]  ;;  %v73_v5 = vld [vmem:[#allocation2 + $0x28] sm:$0xff]  ;;  %vm301_vm1 = vcmask 1045504  }
  0x3d   :  { %v74_v6 = vld [vmem:[#allocation2 + $0x30] sm:$0xff]  ;;  %v75_v7 = vld [vmem:[#allocation2 + $0x38] sm:$0xff]  ;;  %v87_v9 = vld [vmem:[#allocation2 + $0x40] sm:$0xff]  ;;  %s3301_s23 = sld [smem:[#allocation8]]  ;;  %s3307_s26 = sld [smem:[#allocation8 + $0x1]]  ;;  %vm384_vm2 = vcmask 1044480  }
  0x3e   :  { %v88_v10 = vld [vmem:[#allocation2 + $0x48] sm:$0xff]  ;;  %v89_v14 = vld [vmem:[#allocation2 + $0x50] sm:$0xff]  ;;  %v90_v15 = vld [vmem:[#allocation2 + $0x58] sm:$0xff]  ;;  %s3303_s24 = sld [smem:[#allocation8 + $0x8]]  ;;  %s3337_s27 = sld [smem:[#allocation8 + $0x9]]  ;;  %vm467_vm3 = vcmask 1043456  }
  0x3f   :  { %v91_v16 = vld [vmem:[#allocation2 + $0x60] sm:$0xff]  ;;  %v92_v21 = vld [vmem:[#allocation2 + $0x68] sm:$0xff]  ;;  %v93_v22 = vld [vmem:[#allocation2 + $0x70] sm:$0xff]  ;;  %s3305_s25 = sld [smem:[#allocation8 + $0x10]]  ;;  %s3355_s28 = sld [smem:[#allocation8 + $0x2]]  ;;  %vm550_vm4 = vcmask 1042432  }
  0x40   :  { %v94_v23 = vld [vmem:[#allocation2 + $0x78] sm:$0xff]  ;;  %v114_v32 = vld [vmem:[#allocation2 + $0x80] sm:$0xff]  ;;  %v115_v33 = vld [vmem:[#allocation2 + $0x88] sm:$0xff]  ;;  %s3372_s29 = sld [smem:[#allocation8 + $0xa]]  ;;  %s3388_s30 = sld [smem:[#allocation8 + $0x3]]  ;;  %vm633_vm5 = vcmask 1041408  }
  0x41   :  { %v76_v8 = vstv %s67_s3  ;;  %v95_v25 = vstv %s3051_s20  ;;  %v116_v38 = vld [vmem:[#allocation2 + $0x90] sm:$0xff]  ;;  %v117_v39 = vld [vmem:[#allocation2 + $0x98] sm:$0xff]  ;;  %v118_v40 = vld [vmem:[#allocation2 + $0xa0] sm:$0xff]  ;;  %s3402_s5 = sld [smem:[#allocation8 + $0xb]]  ;;  %s3419_s6 = sld [smem:[#allocation8 + $0x4]]  ;;  %vm716_vm6 = vcmask 1040384  }
  0x42   :  { %v77_v11 = vmul.f32 %v76_v8, %v68_v0  ;;  %v78_v12 = vmul.f32 %v76_v8, %v69_v1  ;;  %v79_v13 = vmul.f32 %v76_v8, %v70_v2  ;;  %v80_v17 = vmul.f32 %v76_v8, %v71_v3  ;;  %v119_v45 = vld [vmem:[#allocation2 + $0xa8] sm:$0xff]  ;;  %v120_v46 = vld [vmem:[#allocation2 + $0xb0] sm:$0xff]  ;;  %v121_v47 = vld [vmem:[#allocation2 + $0xb8] sm:$0xff]  ;;  %s3436_s7 = sld [smem:[#allocation8 + $0xc]]  ;;  %s3452_s8 = sld [smem:[#allocation8 + $0x5]] }
  0x43   :  { %v81_v18 = vmul.f32 %v76_v8, %v72_v4  ;;  %v82_v19 = vmul.f32 %v76_v8, %v73_v5  ;;  %v83_v20 = vmul.f32 %v76_v8, %v74_v6  ;;  %v84_v24 = vmul.f32 %v76_v8, %v75_v7  ;;  %v141_v56 = vld [vmem:[#allocation2 + $0xc0] sm:$0xff]  ;;  %v142_v57 = vld [vmem:[#allocation2 + $0xc8] sm:$0xff]  ;;  %v143_v62 = vld [vmem:[#allocation2 + $0xd0] sm:$0xff]  ;;  %s3466_s9 = sld [smem:[#allocation8 + $0xd]]  ;;  %s3483_s10 = sld [smem:[#allocation8 + $0x6]] }
  0x44   :  { %v122_v26 = vstv %s3052_s21  ;;  %v149_v27 = vstv %s3053_s22  ;;  %v96_v28 = vmul.f32 %v95_v25, %v87_v9  ;;  %v97_v29 = vmul.f32 %v95_v25, %v88_v10  ;;  %v144_v63 = vld [vmem:[#allocation2 + $0xd8] sm:$0xff]  ;;  %v145_v0 = vld [vmem:[#allocation2 + $0xe0] sm:$0xff]  ;;  %v146_v5 = vld [vmem:[#allocation2 + $0xe8] sm:$0xff]  ;;  %s3500_s11 = sld [smem:[#allocation8 + $0xe]]  ;;  %s3516_s12 = sld [smem:[#allocation8 + $0x7]] }
  0x45   :  { %v98_v30 = vmul.f32 %v95_v25, %v89_v14  ;;  %v99_v31 = vmul.f32 %v95_v25, %v90_v15  ;;  %v100_v34 = vmul.f32 %v95_v25, %v91_v16  ;;  %v101_v35 = vmul.f32 %v95_v25, %v92_v21  ;;  %v147_v6 = vld [vmem:[#allocation2 + $0xf0] sm:$0xff]  ;;  %v148_v7 = vld [vmem:[#allocation2 + $0xf8] sm:$0xff]  ;;  %s3530_s0 = sld [smem:[#allocation8 + $0xf]]  ;;  %s3547_s13 = sld [smem:[#allocation9]] }
  0x46   :  { %v102_v36 = vmul.f32 %v95_v25, %v93_v22  ;;  %v103_v37 = vmul.f32 %v95_v25, %v94_v23  ;;  %v104_v41 = vadd.f32 %v96_v28, %v77_v11  ;;  %v105_v42 = vadd.f32 %v97_v29, %v78_v12  ;;  %s3551_s14 = sld [smem:[#allocation7 + $0x80]]  ;;  %s3553_s15 = sld [smem:[#allocation7 + $0x81]] }
  0x47   :  { %v106_v43 = vadd.f32 %v98_v30, %v79_v13  ;;  %v107_v44 = vadd.f32 %v99_v31, %v80_v17  ;;  %v108_v48 = vadd.f32 %v100_v34, %v81_v18  ;;  %v109_v49 = vadd.f32 %v101_v35, %v82_v19  ;;  %s3577_s16 = sld [smem:[#allocation7 + $0x82]]  ;;  %s3579_s17 = sld [smem:[#allocation7 + $0x83]] }
  0x48   :  { %v110_v50 = vadd.f32 %v102_v36, %v83_v20  ;;  %v111_v51 = vadd.f32 %v103_v37, %v84_v24  ;;  %v123_v52 = vmul.f32 %v122_v26, %v114_v32  ;;  %v124_v53 = vmul.f32 %v122_v26, %v115_v33  ;;  %s3581_s18 = sld [smem:[#allocation8 + $0x80]]  ;;  %s3590_s2 = sld [smem:[#allocation8 + $0x81]] }
  0x49   :  { %v125_v54 = vmul.f32 %v122_v26, %v116_v38  ;;  %v126_v55 = vmul.f32 %v122_v26, %v117_v39  ;;  %v127_v58 = vmul.f32 %v122_v26, %v118_v40  ;;  %v128_v59 = vmul.f32 %v122_v26, %v119_v45  ;;  %s3586_s19 = sld [smem:[#allocation8 + $0x88]]  ;;  %s3592_s3 = sld [smem:[#allocation8 + $0x89]] }
  0x4a   :  { %v129_v60 = vmul.f32 %v122_v26, %v120_v46  ;;  %v130_v61 = vmul.f32 %v122_v26, %v121_v47  ;;  %v131_v1 = vadd.f32 %v123_v52, %v104_v41  ;;  %v132_v2 = vadd.f32 %v124_v53, %v105_v42  ;;  %s3588_s1 = sld [smem:[#allocation8 + $0x90]]  ;;  %s3641_s20 = sld [smem:[#allocation8 + $0x82]] }
  0x4b   :  { %v133_v3 = vadd.f32 %v125_v54, %v106_v43  ;;  %v134_v4 = vadd.f32 %v126_v55, %v107_v44  ;;  %v135_v8 = vadd.f32 %v127_v58, %v108_v48  ;;  %v136_v9 = vadd.f32 %v128_v59, %v109_v49  ;;  %s3664_s21 = sld [smem:[#allocation8 + $0x8a]]  ;;  %s3679_s22 = sld [smem:[#allocation8 + $0x83]] }
  0x4c   :  { %v137_v10 = vadd.f32 %v129_v60, %v110_v50  ;;  %v138_v11 = vadd.f32 %v130_v61, %v111_v51  ;;  %v150_v12 = vmul.f32 %v149_v27, %v141_v56  ;;  %v151_v13 = vmul.f32 %v149_v27, %v142_v57 }
  0x4d   :  { %v152_v14 = vmul.f32 %v149_v27, %v143_v62  ;;  %v153_v15 = vmul.f32 %v149_v27, %v144_v63  ;;  %v154_v16 = vmul.f32 %v149_v27, %v145_v0  ;;  %v155_v17 = vmul.f32 %v149_v27, %v146_v5 }
  0x4e   :  { %v156_v18 = vmul.f32 %v149_v27, %v147_v6  ;;  %v157_v19 = vmul.f32 %v149_v27, %v148_v7  ;;  %v3309_v20 = vadd.f32 %v150_v12, %v131_v1  ;;  %v3311_v21 = vadd.f32 %v151_v13, %v132_v2 }
  0x4f   :  { %v3313_v22 = vadd.f32 %v152_v14, %v133_v3  ;;  %v3315_v23 = vadd.f32 %v153_v15, %v134_v4  ;;  %v3317_v24 = vadd.f32 %v154_v16, %v135_v8  ;;  %v3319_v25 = vadd.f32 %v155_v17, %v136_v9 }
  0x50   :  { %v3321_v26 = vadd.f32 %v156_v18, %v137_v10  ;;  %v3323_v28 = vadd.f32 %v157_v19, %v138_v11  ;;  %v167_v29 = vstv %s3301_s23  ;;  %v175_v30 = vstv %s3303_s24  ;;  %s3695_s23 = sld [smem:[#allocation8 + $0x8b]]  ;;  %s3709_s24 = sld [smem:[#allocation8 + $0x84]] }
  0x51   :  { %v189_v31 = vstv %s3305_s25  ;;  %v203_v27 = vstv %s3307_s26  ;;  %v168_v32 = vmul.f32 %v167_v29, %v3309_v20  ;;  %v169_v33 = vmul.f32 %v167_v29, %v3311_v21  ;;  %s3726_s25 = sld [smem:[#allocation8 + $0x8c]]  ;;  %s3743_s26 = sld [smem:[#allocation8 + $0x85]] }
  0x52   :  { %v170_v34 = vmul.f32 %v167_v29, %v3313_v22  ;;  %v171_v35 = vmul.f32 %v167_v29, %v3315_v23  ;;  %v172_v36 = vmul.f32 %v167_v29, %v3317_v24  ;;  %v173_v37 = vmul.f32 %v167_v29, %v3319_v25 }
  0x53   :  { %v176_v38 = vmul.f32 %v175_v30, %v3311_v21  ;;  %v177_v39 = vmul.f32 %v175_v30, %v3313_v22  ;;  %v178_v40 = vmul.f32 %v175_v30, %v3315_v23  ;;  %v179_v41 = vmul.f32 %v175_v30, %v3317_v24 }
  0x54   :  { %v180_v42 = vmul.f32 %v175_v30, %v3319_v25  ;;  %v181_v43 = vmul.f32 %v175_v30, %v3321_v26  ;;  %v190_v46 = vmul.f32 %v189_v31, %v3313_v22  ;;  %v191_v47 = vmul.f32 %v189_v31, %v3315_v23 }
  0x55   :  { %v182_v44 = vadd.f32 %v176_v38, %v168_v32  ;;  %v183_v45 = vadd.f32 %v177_v39, %v169_v33  ;;  %v184_v48 = vadd.f32 %v178_v40, %v170_v34  ;;  %v185_v49 = vadd.f32 %v179_v41, %v171_v35 }
  0x56   :  { %v186_v50 = vadd.f32 %v180_v42, %v172_v36  ;;  %v187_v51 = vadd.f32 %v181_v43, %v173_v37  ;;  %v192_v52 = vmul.f32 %v189_v31, %v3317_v24  ;;  %v193_v53 = vmul.f32 %v189_v31, %v3319_v25 }
  0x57   :  { %v194_v54 = vmul.f32 %v189_v31, %v3321_v26  ;;  %v195_v55 = vmul.f32 %v189_v31, %v3323_v28  ;;  %v196_v56 = vadd.f32 %v190_v46, %v182_v44  ;;  %v197_v57 = vadd.f32 %v191_v47, %v183_v45 }
  0x58   :  { %v204_v58 = vmul.f32 %v203_v27, %v3309_v20  ;;  %v205_v59 = vmul.f32 %v203_v27, %v3311_v21  ;;  %v198_v60 = vadd.f32 %v192_v52, %v184_v48  ;;  %v199_v61 = vadd.f32 %v193_v53, %v185_v49 }
  0x59   :  { %v200_v62 = vadd.f32 %v194_v54, %v186_v50  ;;  %v201_v63 = vadd.f32 %v195_v55, %v187_v51  ;;  %v206_v0 = vmul.f32 %v203_v27, %v3313_v22  ;;  %v207_v1 = vmul.f32 %v203_v27, %v3315_v23 }
  0x5a   :  { %v208_v2 = vmul.f32 %v203_v27, %v3317_v24  ;;  %v209_v3 = vmul.f32 %v203_v27, %v3319_v25  ;;  %v210_v4 = vmul.f32 %v203_v27, %v3321_v26  ;;  %v219_v5 = vrot.slane %v204_v58, 1 }
  0x5b   :  { %v220_v6 = vrot.slane %v205_v59, 1  ;;  %v245_v7 = vstv %s3337_s27  ;;  %v222_v8 = vrot.slane %v206_v0, 1  ;;  %v224_v9 = vrot.slane %v207_v1, 1  ;;  %s3759_s27 = sld [smem:[#allocation8 + $0x8d]] }
  0x5c   :  { %v226_v10 = vrot.slane %v208_v2, 1  ;;  %v228_v11 = vrot.slane %v209_v3, 1  ;;  %v230_v13 = vrot.slane %v210_v4, 1  ;;  %v246_v14 = vmul.f32 %v245_v7, %v3311_v21 }
  0x5d   :  { %v221_v12 = vsel %vm218_vm0, %v219_v5, %v220_v6  ;;  %v247_v15 = vmul.f32 %v245_v7, %v3313_v22  ;;  %v223_v16 = vsel %vm218_vm0, %v220_v6, %v222_v8  ;;  %v225_v17 = vsel %vm218_vm0, %v222_v8, %v224_v9 }
  0x5e   :  { %v227_v18 = vsel %vm218_vm0, %v224_v9, %v226_v10  ;;  %v229_v19 = vsel %vm218_vm0, %v226_v10, %v228_v11  ;;  %v231_v29 = vsel %vm218_vm0, %v228_v11, %v230_v13  ;;  %v238_v30 = vadd.f32 %v221_v12, %v196_v56 }
  0x5f   :  { %v239_v31 = vadd.f32 %v223_v16, %v197_v57  ;;  %v240_v27 = vadd.f32 %v225_v17, %v198_v60  ;;  %v241_v32 = vadd.f32 %v227_v18, %v199_v61  ;;  %v242_v33 = vadd.f32 %v229_v19, %v200_v62 }
  0x60   :  { %v243_v34 = vadd.f32 %v231_v29, %v201_v63  ;;  %v248_v35 = vmul.f32 %v245_v7, %v3315_v23  ;;  %v249_v36 = vmul.f32 %v245_v7, %v3317_v24  ;;  %v250_v37 = vmul.f32 %v245_v7, %v3319_v25 }
  0x61   :  { %v251_v38 = vmul.f32 %v245_v7, %v3321_v26  ;;  %v252_v39 = vmul.f32 %v245_v7, %v3323_v28  ;;  %v260_v40 = vrot.slane %v246_v14, 1  ;;  %v261_v41 = vrot.slane %v247_v15, 1 }
  0x62   :  { %v263_v42 = vrot.slane %v248_v35, 1  ;;  %v286_v43 = vstv %s3355_s28  ;;  %v265_v44 = vrot.slane %v249_v36, 1  ;;  %v267_v45 = vrot.slane %v250_v37, 1  ;;  %s3773_s28 = sld [smem:[#allocation8 + $0x86]] }
  0x63   :  { %v269_v46 = vrot.slane %v251_v38, 1  ;;  %v271_v47 = vrot.slane %v252_v39, 1  ;;  %v262_v48 = vsel %vm218_vm0, %v260_v40, %v261_v41  ;;  %v287_v50 = vmul.f32 %v286_v43, %v3309_v20 }
  0x64   :  { %v264_v49 = vsel %vm218_vm0, %v261_v41, %v263_v42  ;;  %v288_v51 = vmul.f32 %v286_v43, %v3311_v21  ;;  %v266_v52 = vsel %vm218_vm0, %v263_v42, %v265_v44  ;;  %v268_v53 = vsel %vm218_vm0, %v265_v44, %v267_v45 }
  0x65   :  { %v270_v54 = vsel %vm218_vm0, %v267_v45, %v269_v46  ;;  %v272_v55 = vsel %vm218_vm0, %v269_v46, %v271_v47  ;;  %v279_v56 = vadd.f32 %v262_v48, %v238_v30  ;;  %v280_v57 = vadd.f32 %v264_v49, %v239_v31 }
  0x66   :  { %v281_v58 = vadd.f32 %v266_v52, %v240_v27  ;;  %v282_v59 = vadd.f32 %v268_v53, %v241_v32  ;;  %v283_v60 = vadd.f32 %v270_v54, %v242_v33  ;;  %v284_v61 = vadd.f32 %v272_v55, %v243_v34 }
  0x67   :  { %v289_v62 = vmul.f32 %v286_v43, %v3313_v22  ;;  %v290_v63 = vmul.f32 %v286_v43, %v3315_v23  ;;  %v291_v0 = vmul.f32 %v286_v43, %v3317_v24  ;;  %v292_v1 = vmul.f32 %v286_v43, %v3319_v25 }
  0x68   :  { %v293_v2 = vmul.f32 %v286_v43, %v3321_v26  ;;  %v302_v3 = vrot.slane %v287_v50, 2  ;;  %v303_v4 = vrot.slane %v288_v51, 2  ;;  %v328_v7 = vstv %s3372_s29  ;;  %s3790_s29 = sld [smem:[#allocation8 + $0x8e]] }
  0x69   :  { %v305_v5 = vrot.slane %v289_v62, 2  ;;  %v307_v6 = vrot.slane %v290_v63, 2  ;;  %v309_v8 = vrot.slane %v291_v0, 2  ;;  %v311_v9 = vrot.slane %v292_v1, 2 }
  0x6a   :  { %v313_v10 = vrot.slane %v293_v2, 2  ;;  %v329_v11 = vmul.f32 %v328_v7, %v3311_v21  ;;  %v304_v12 = vsel %vm301_vm1, %v302_v3, %v303_v4  ;;  %v330_v15 = vmul.f32 %v328_v7, %v3313_v22 }
  0x6b   :  { %v306_v13 = vsel %vm301_vm1, %v303_v4, %v305_v5  ;;  %v308_v14 = vsel %vm301_vm1, %v305_v5, %v307_v6  ;;  %v310_v16 = vsel %vm301_vm1, %v307_v6, %v309_v8  ;;  %v312_v17 = vsel %vm301_vm1, %v309_v8, %v311_v9 }
  0x6c   :  { %v314_v18 = vsel %vm301_vm1, %v311_v9, %v313_v10  ;;  %v321_v19 = vadd.f32 %v304_v12, %v279_v56  ;;  %v322_v29 = vadd.f32 %v306_v13, %v280_v57  ;;  %v323_v30 = vadd.f32 %v308_v14, %v281_v58 }
  0x6d   :  { %v324_v31 = vadd.f32 %v310_v16, %v282_v59  ;;  %v325_v27 = vadd.f32 %v312_v17, %v283_v60  ;;  %v326_v32 = vadd.f32 %v314_v18, %v284_v61  ;;  %v331_v33 = vmul.f32 %v328_v7, %v3315_v23 }
  0x6e   :  { %v332_v34 = vmul.f32 %v328_v7, %v3317_v24  ;;  %v333_v35 = vmul.f32 %v328_v7, %v3319_v25  ;;  %v334_v36 = vmul.f32 %v328_v7, %v3321_v26  ;;  %v335_v37 = vmul.f32 %v328_v7, %v3323_v28 }
  0x6f   :  { %v343_v38 = vrot.slane %v329_v11, 2  ;;  %v344_v39 = vrot.slane %v330_v15, 2  ;;  %v346_v40 = vrot.slane %v331_v33, 2  ;;  %v369_v43 = vstv %s3388_s30  ;;  %s3807_s30 = sld [smem:[#allocation8 + $0x87]] }
  0x70   :  { %v348_v41 = vrot.slane %v332_v34, 2  ;;  %v350_v42 = vrot.slane %v333_v35, 2  ;;  %v352_v45 = vrot.slane %v334_v36, 2  ;;  %v354_v46 = vrot.slane %v335_v37, 2 }
  0x71   :  { %v345_v44 = vsel %vm301_vm1, %v343_v38, %v344_v39  ;;  %v370_v47 = vmul.f32 %v369_v43, %v3309_v20  ;;  %v347_v48 = vsel %vm301_vm1, %v344_v39, %v346_v40  ;;  %v371_v59 = vmul.f32 %v369_v43, %v3311_v21 }
  0x72   :  { %v349_v49 = vsel %vm301_vm1, %v346_v40, %v348_v41  ;;  %v351_v50 = vsel %vm301_vm1, %v348_v41, %v350_v42  ;;  %v362_v51 = vadd.f32 %v345_v44, %v321_v19  ;;  %v353_v52 = vsel %vm301_vm1, %v350_v42, %v352_v45 }
  0x73   :  { %v355_v53 = vsel %vm301_vm1, %v352_v45, %v354_v46  ;;  %v363_v54 = vadd.f32 %v347_v48, %v322_v29  ;;  %v364_v55 = vadd.f32 %v349_v49, %v323_v30  ;;  %v365_v56 = vadd.f32 %v351_v50, %v324_v31 }
  0x74   :  { %v366_v57 = vadd.f32 %v353_v52, %v325_v27  ;;  %v367_v58 = vadd.f32 %v355_v53, %v326_v32  ;;  %v372_v60 = vmul.f32 %v369_v43, %v3313_v22  ;;  %v373_v61 = vmul.f32 %v369_v43, %v3315_v23 }
  0x75   :  { %v374_v62 = vmul.f32 %v369_v43, %v3317_v24  ;;  %v375_v63 = vmul.f32 %v369_v43, %v3319_v25  ;;  %v376_v0 = vmul.f32 %v369_v43, %v3321_v26  ;;  %v385_v1 = vrot.slane %v370_v47, 3 }
  0x76   :  { %v386_v2 = vrot.slane %v371_v59, 3  ;;  %v411_v3 = vstv %s3402_s5  ;;  %v388_v4 = vrot.slane %v372_v60, 3  ;;  %v390_v5 = vrot.slane %v373_v61, 3  ;;  %s3823_s5 = sld [smem:[#allocation8 + $0x8f]] }
  0x77   :  { %v392_v6 = vrot.slane %v374_v62, 3  ;;  %v394_v7 = vrot.slane %v375_v63, 3  ;;  %v396_v9 = vrot.slane %v376_v0, 3  ;;  %v412_v10 = vmul.f32 %v411_v3, %v3311_v21 }
  0x78   :  { %v387_v8 = vsel %vm384_vm2, %v385_v1, %v386_v2  ;;  %v413_v11 = vmul.f32 %v411_v3, %v3313_v22  ;;  %v389_v12 = vsel %vm384_vm2, %v386_v2, %v388_v4  ;;  %v391_v13 = vsel %vm384_vm2, %v388_v4, %v390_v5 }
  0x79   :  { %v393_v14 = vsel %vm384_vm2, %v390_v5, %v392_v6  ;;  %v395_v15 = vsel %vm384_vm2, %v392_v6, %v394_v7  ;;  %v397_v16 = vsel %vm384_vm2, %v394_v7, %v396_v9  ;;  %v404_v17 = vadd.f32 %v387_v8, %v362_v51 }
  0x7a   :  { %v405_v18 = vadd.f32 %v389_v12, %v363_v54  ;;  %v406_v19 = vadd.f32 %v391_v13, %v364_v55  ;;  %v407_v29 = vadd.f32 %v393_v14, %v365_v56  ;;  %v408_v30 = vadd.f32 %v395_v15, %v366_v57 }
  0x7b   :  { %v409_v31 = vadd.f32 %v397_v16, %v367_v58  ;;  %v414_v27 = vmul.f32 %v411_v3, %v3315_v23  ;;  %v415_v32 = vmul.f32 %v411_v3, %v3317_v24  ;;  %v416_v33 = vmul.f32 %v411_v3, %v3319_v25 }
  0x7c   :  { %v417_v34 = vmul.f32 %v411_v3, %v3321_v26  ;;  %v418_v35 = vmul.f32 %v411_v3, %v3323_v28  ;;  %v426_v36 = vrot.slane %v412_v10, 3  ;;  %v427_v37 = vrot.slane %v413_v11, 3 }
  0x7d   :  { %v429_v38 = vrot.slane %v414_v27, 3  ;;  %v452_v39 = vstv %s3419_s6  ;;  %v431_v40 = vrot.slane %v415_v32, 3  ;;  %v433_v41 = vrot.slane %v416_v33, 3  ;;  %s3837_s6 = sld [smem:[#allocation9 + $0x1]] }
  0x7e   :  { %v435_v42 = vrot.slane %v417_v34, 3  ;;  %v437_v43 = vrot.slane %v418_v35, 3  ;;  %v428_v44 = vsel %vm384_vm2, %v426_v36, %v427_v37  ;;  %v453_v46 = vmul.f32 %v452_v39, %v3309_v20 }
  0x7f   :  { %v430_v45 = vsel %vm384_vm2, %v427_v37, %v429_v38  ;;  %v454_v47 = vmul.f32 %v452_v39, %v3311_v21  ;;  %v432_v48 = vsel %vm384_vm2, %v429_v38, %v431_v40  ;;  %v434_v49 = vsel %vm384_vm2, %v431_v40, %v433_v41 }
  0x80   :  { %v436_v50 = vsel %vm384_vm2, %v433_v41, %v435_v42  ;;  %v438_v51 = vsel %vm384_vm2, %v435_v42, %v437_v43  ;;  %v445_v52 = vadd.f32 %v428_v44, %v404_v17  ;;  %v446_v53 = vadd.f32 %v430_v45, %v405_v18 }
  0x81   :  { %v447_v54 = vadd.f32 %v432_v48, %v406_v19  ;;  %v448_v55 = vadd.f32 %v434_v49, %v407_v29  ;;  %v449_v56 = vadd.f32 %v436_v50, %v408_v30  ;;  %v450_v57 = vadd.f32 %v438_v51, %v409_v31 }
  0x82   :  { %v455_v58 = vmul.f32 %v452_v39, %v3313_v22  ;;  %v456_v59 = vmul.f32 %v452_v39, %v3315_v23  ;;  %v457_v60 = vmul.f32 %v452_v39, %v3317_v24  ;;  %v458_v61 = vmul.f32 %v452_v39, %v3319_v25 }
  0x83   :  { %v459_v62 = vmul.f32 %v452_v39, %v3321_v26  ;;  %v468_v63 = vrot.slane %v453_v46, 4  ;;  %v469_v0 = vrot.slane %v454_v47, 4  ;;  %v494_v3 = vstv %s3436_s7  ;;  %s3841_s7 = sld [smem:[#allocation7 + $0x100]] }
  0x84   :  { %v471_v1 = vrot.slane %v455_v58, 4  ;;  %v473_v2 = vrot.slane %v456_v59, 4  ;;  %v475_v4 = vrot.slane %v457_v60, 4  ;;  %v477_v5 = vrot.slane %v458_v61, 4 }
  0x85   :  { %v479_v6 = vrot.slane %v459_v62, 4  ;;  %v495_v7 = vmul.f32 %v494_v3, %v3311_v21  ;;  %v470_v8 = vsel %vm467_vm3, %v468_v63, %v469_v0  ;;  %v496_v11 = vmul.f32 %v494_v3, %v3313_v22 }
  0x86   :  { %v472_v9 = vsel %vm467_vm3, %v469_v0, %v471_v1  ;;  %v474_v10 = vsel %vm467_vm3, %v471_v1, %v473_v2  ;;  %v476_v12 = vsel %vm467_vm3, %v473_v2, %v475_v4  ;;  %v478_v13 = vsel %vm467_vm3, %v475_v4, %v477_v5 }
  0x87   :  { %v480_v14 = vsel %vm467_vm3, %v477_v5, %v479_v6  ;;  %v487_v15 = vadd.f32 %v470_v8, %v445_v52  ;;  %v488_v16 = vadd.f32 %v472_v9, %v446_v53  ;;  %v489_v17 = vadd.f32 %v474_v10, %v447_v54 }
  0x88   :  { %v490_v18 = vadd.f32 %v476_v12, %v448_v55  ;;  %v491_v19 = vadd.f32 %v478_v13, %v449_v56  ;;  %v492_v29 = vadd.f32 %v480_v14, %v450_v57  ;;  %v497_v30 = vmul.f32 %v494_v3, %v3315_v23 }
  0x89   :  { %v498_v31 = vmul.f32 %v494_v3, %v3317_v24  ;;  %v499_v27 = vmul.f32 %v494_v3, %v3319_v25  ;;  %v500_v32 = vmul.f32 %v494_v3, %v3321_v26  ;;  %v501_v33 = vmul.f32 %v494_v3, %v3323_v28 }
  0x8a   :  { %v509_v34 = vrot.slane %v495_v7, 4  ;;  %v510_v35 = vrot.slane %v496_v11, 4  ;;  %v512_v36 = vrot.slane %v497_v30, 4  ;;  %v535_v39 = vstv %s3452_s8  ;;  %s3844_s8 = sld [smem:[#allocation7 + $0x101]] }
  0x8b   :  { %v514_v37 = vrot.slane %v498_v31, 4  ;;  %v516_v38 = vrot.slane %v499_v27, 4  ;;  %v518_v41 = vrot.slane %v500_v32, 4  ;;  %v520_v42 = vrot.slane %v501_v33, 4 }
  0x8c   :  { %v511_v40 = vsel %vm467_vm3, %v509_v34, %v510_v35  ;;  %v536_v43 = vmul.f32 %v535_v39, %v3309_v20  ;;  %v513_v44 = vsel %vm467_vm3, %v510_v35, %v512_v36  ;;  %v537_v55 = vmul.f32 %v535_v39, %v3311_v21 }
  0x8d   :  { %v515_v45 = vsel %vm467_vm3, %v512_v36, %v514_v37  ;;  %v517_v46 = vsel %vm467_vm3, %v514_v37, %v516_v38  ;;  %v528_v47 = vadd.f32 %v511_v40, %v487_v15  ;;  %v519_v48 = vsel %vm467_vm3, %v516_v38, %v518_v41 }
  0x8e   :  { %v521_v49 = vsel %vm467_vm3, %v518_v41, %v520_v42  ;;  %v529_v50 = vadd.f32 %v513_v44, %v488_v16  ;;  %v530_v51 = vadd.f32 %v515_v45, %v489_v17  ;;  %v531_v52 = vadd.f32 %v517_v46, %v490_v18 }
  0x8f   :  { %v532_v53 = vadd.f32 %v519_v48, %v491_v19  ;;  %v533_v54 = vadd.f32 %v521_v49, %v492_v29  ;;  %v538_v56 = vmul.f32 %v535_v39, %v3313_v22  ;;  %v539_v57 = vmul.f32 %v535_v39, %v3315_v23 }
  0x90   :  { %v540_v58 = vmul.f32 %v535_v39, %v3317_v24  ;;  %v541_v59 = vmul.f32 %v535_v39, %v3319_v25  ;;  %v542_v60 = vmul.f32 %v535_v39, %v3321_v26  ;;  %v551_v61 = vrot.slane %v536_v43, 5 }
  0x91   :  { %v552_v62 = vrot.slane %v537_v55, 5  ;;  %v577_v63 = vstv %s3466_s9  ;;  %v554_v0 = vrot.slane %v538_v56, 5  ;;  %v556_v1 = vrot.slane %v539_v57, 5  ;;  %s3868_s9 = sld [smem:[#allocation7 + $0x102]] }
  0x92   :  { %v558_v2 = vrot.slane %v540_v58, 5  ;;  %v560_v3 = vrot.slane %v541_v59, 5  ;;  %v562_v5 = vrot.slane %v542_v60, 5  ;;  %v578_v6 = vmul.f32 %v577_v63, %v3311_v21 }
  0x93   :  { %v553_v4 = vsel %vm550_vm4, %v551_v61, %v552_v62  ;;  %v579_v7 = vmul.f32 %v577_v63, %v3313_v22  ;;  %v555_v8 = vsel %vm550_vm4, %v552_v62, %v554_v0  ;;  %v557_v9 = vsel %vm550_vm4, %v554_v0, %v556_v1 }
  0x94   :  { %v559_v10 = vsel %vm550_vm4, %v556_v1, %v558_v2  ;;  %v561_v11 = vsel %vm550_vm4, %v558_v2, %v560_v3  ;;  %v563_v12 = vsel %vm550_vm4, %v560_v3, %v562_v5  ;;  %v570_v13 = vadd.f32 %v553_v4, %v528_v47 }
  0x95   :  { %v571_v14 = vadd.f32 %v555_v8, %v529_v50  ;;  %v572_v15 = vadd.f32 %v557_v9, %v530_v51  ;;  %v573_v16 = vadd.f32 %v559_v10, %v531_v52  ;;  %v574_v17 = vadd.f32 %v561_v11, %v532_v53 }
  0x96   :  { %v575_v18 = vadd.f32 %v563_v12, %v533_v54  ;;  %v580_v19 = vmul.f32 %v577_v63, %v3315_v23  ;;  %v581_v29 = vmul.f32 %v577_v63, %v3317_v24  ;;  %v582_v30 = vmul.f32 %v577_v63, %v3319_v25 }
  0x97   :  { %v583_v31 = vmul.f32 %v577_v63, %v3321_v26  ;;  %v584_v27 = vmul.f32 %v577_v63, %v3323_v28  ;;  %v592_v32 = vrot.slane %v578_v6, 5  ;;  %v593_v33 = vrot.slane %v579_v7, 5 }
  0x98   :  { %v595_v34 = vrot.slane %v580_v19, 5  ;;  %v618_v35 = vstv %s3483_s10  ;;  %v597_v36 = vrot.slane %v581_v29, 5  ;;  %v599_v37 = vrot.slane %v582_v30, 5  ;;  %s3870_s10 = sld [smem:[#allocation7 + $0x103]] }
  0x99   :  { %v601_v38 = vrot.slane %v583_v31, 5  ;;  %v603_v39 = vrot.slane %v584_v27, 5  ;;  %v594_v40 = vsel %vm550_vm4, %v592_v32, %v593_v33  ;;  %v619_v42 = vmul.f32 %v618_v35, %v3309_v20 }
  0x9a   :  { %v596_v41 = vsel %vm550_vm4, %v593_v33, %v595_v34  ;;  %v620_v43 = vmul.f32 %v618_v35, %v3311_v21  ;;  %v598_v44 = vsel %vm550_vm4, %v595_v34, %v597_v36  ;;  %v600_v45 = vsel %vm550_vm4, %v597_v36, %v599_v37 }
  0x9b   :  { %v602_v46 = vsel %vm550_vm4, %v599_v37, %v601_v38  ;;  %v604_v47 = vsel %vm550_vm4, %v601_v38, %v603_v39  ;;  %v611_v48 = vadd.f32 %v594_v40, %v570_v13  ;;  %v612_v49 = vadd.f32 %v596_v41, %v571_v14 }
  0x9c   :  { %v613_v50 = vadd.f32 %v598_v44, %v572_v15  ;;  %v614_v51 = vadd.f32 %v600_v45, %v573_v16  ;;  %v615_v52 = vadd.f32 %v602_v46, %v574_v17  ;;  %v616_v53 = vadd.f32 %v604_v47, %v575_v18 }
  0x9d   :  { %v621_v54 = vmul.f32 %v618_v35, %v3313_v22  ;;  %v622_v55 = vmul.f32 %v618_v35, %v3315_v23  ;;  %v623_v56 = vmul.f32 %v618_v35, %v3317_v24  ;;  %v624_v57 = vmul.f32 %v618_v35, %v3319_v25 }
  0x9e   :  { %v625_v58 = vmul.f32 %v618_v35, %v3321_v26  ;;  %v634_v59 = vrot.slane %v619_v42, 6  ;;  %v635_v60 = vrot.slane %v620_v43, 6  ;;  %v660_v63 = vstv %s3500_s11  ;;  %s3874_s11 = sld [smem:[#allocation8 + $0x100]] }
  0x9f   :  { %v637_v61 = vrot.slane %v621_v54, 6  ;;  %v639_v62 = vrot.slane %v622_v55, 6  ;;  %v641_v0 = vrot.slane %v623_v56, 6  ;;  %v643_v1 = vrot.slane %v624_v57, 6 }
  0xa0   :  { %v645_v2 = vrot.slane %v625_v58, 6  ;;  %v661_v3 = vmul.f32 %v660_v63, %v3311_v21  ;;  %v636_v4 = vsel %vm633_vm5, %v634_v59, %v635_v60  ;;  %v662_v7 = vmul.f32 %v660_v63, %v3313_v22 }
  0xa1   :  { %v638_v5 = vsel %vm633_vm5, %v635_v60, %v637_v61  ;;  %v640_v6 = vsel %vm633_vm5, %v637_v61, %v639_v62  ;;  %v642_v8 = vsel %vm633_vm5, %v639_v62, %v641_v0  ;;  %v644_v9 = vsel %vm633_vm5, %v641_v0, %v643_v1 }
  0xa2   :  { %v646_v10 = vsel %vm633_vm5, %v643_v1, %v645_v2  ;;  %v653_v11 = vadd.f32 %v636_v4, %v611_v48  ;;  %v654_v12 = vadd.f32 %v638_v5, %v612_v49  ;;  %v655_v13 = vadd.f32 %v640_v6, %v613_v50 }
  0xa3   :  { %v656_v14 = vadd.f32 %v642_v8, %v614_v51  ;;  %v657_v15 = vadd.f32 %v644_v9, %v615_v52  ;;  %v658_v16 = vadd.f32 %v646_v10, %v616_v53  ;;  %v663_v17 = vmul.f32 %v660_v63, %v3315_v23 }
  0xa4   :  { %v664_v18 = vmul.f32 %v660_v63, %v3317_v24  ;;  %v665_v19 = vmul.f32 %v660_v63, %v3319_v25  ;;  %v666_v29 = vmul.f32 %v660_v63, %v3321_v26  ;;  %v667_v30 = vmul.f32 %v660_v63, %v3323_v28 }
  0xa5   :  { %v675_v31 = vrot.slane %v661_v3, 6  ;;  %v676_v27 = vrot.slane %v662_v7, 6  ;;  %v678_v32 = vrot.slane %v663_v17, 6  ;;  %v701_v35 = vstv %s3516_s12  ;;  %s3876_s12 = sld [smem:[#allocation8 + $0x108]] }
  0xa6   :  { %v680_v33 = vrot.slane %v664_v18, 6  ;;  %v682_v34 = vrot.slane %v665_v19, 6  ;;  %v684_v37 = vrot.slane %v666_v29, 6  ;;  %v686_v38 = vrot.slane %v667_v30, 6 }
  0xa7   :  { %v677_v36 = vsel %vm633_vm5, %v675_v31, %v676_v27  ;;  %v702_v39 = vmul.f32 %v701_v35, %v3309_v20  ;;  %v679_v40 = vsel %vm633_vm5, %v676_v27, %v678_v32  ;;  %v703_v51 = vmul.f32 %v701_v35, %v3311_v21 }
  0xa8   :  { %v681_v41 = vsel %vm633_vm5, %v678_v32, %v680_v33  ;;  %v683_v42 = vsel %vm633_vm5, %v680_v33, %v682_v34  ;;  %v694_v43 = vadd.f32 %v677_v36, %v653_v11  ;;  %v685_v44 = vsel %vm633_vm5, %v682_v34, %v684_v37  ;;  %v817_v33 = vld [vmem:[#allocation2] sm:$0xff]  ;;  %v818_v34 = vld [vmem:[#allocation2 + $0x8] sm:$0xff] }
  0xa9   :  { %v687_v45 = vsel %vm633_vm5, %v684_v37, %v686_v38  ;;  %v695_v46 = vadd.f32 %v679_v40, %v654_v12  ;;  %v696_v47 = vadd.f32 %v681_v41, %v655_v13  ;;  %v697_v48 = vadd.f32 %v683_v42, %v656_v14  ;;  %v819_v42 = vld [vmem:[#allocation2 + $0x10] sm:$0xff] }
  0xaa   :  { %v698_v49 = vadd.f32 %v685_v44, %v657_v15  ;;  %v699_v50 = vadd.f32 %v687_v45, %v658_v16  ;;  %v704_v20 = vmul.f32 %v701_v35, %v3313_v22  ;;  %v705_v52 = vmul.f32 %v701_v35, %v3315_v23 }
  0xab   :  { %v706_v53 = vmul.f32 %v701_v35, %v3317_v24  ;;  %v707_v54 = vmul.f32 %v701_v35, %v3319_v25  ;;  %v708_v55 = vmul.f32 %v701_v35, %v3321_v26  ;;  %v717_v56 = vrot.slane %v702_v39, 7 }
  0xac   :  { %v718_v57 = vrot.slane %v703_v51, 7  ;;  %v743_v58 = vstv %s3530_s0  ;;  %v720_v59 = vrot.slane %v704_v20, 7  ;;  %v722_v60 = vrot.slane %v705_v52, 7  ;;  %v822_v52 = vld [vmem:[#allocation2 + $0x28] sm:$0xff]  ;;  %s3878_s0 = sld [smem:[#allocation8 + $0x110]] }
  0xad   :  { %v724_v61 = vrot.slane %v706_v53, 7  ;;  %v726_v62 = vrot.slane %v707_v54, 7  ;;  %v728_v0 = vrot.slane %v708_v55, 7  ;;  %v744_v1 = vmul.f32 %v743_v58, %v3311_v21  ;;  %v823_v53 = vld [vmem:[#allocation2 + $0x30] sm:$0xff]  ;;  %v824_v54 = vld [vmem:[#allocation2 + $0x38] sm:$0xff] }
  0xae   :  { %v719_v63 = vsel %vm716_vm6, %v717_v56, %v718_v57  ;;  %v745_v2 = vmul.f32 %v743_v58, %v3313_v22  ;;  %v721_v3 = vsel %vm716_vm6, %v718_v57, %v720_v59  ;;  %v723_v4 = vsel %vm716_vm6, %v720_v59, %v722_v60  ;;  %v835_v59 = vld [vmem:[#allocation2 + $0x40] sm:$0xff] }
  0xaf   :  { %v725_v5 = vsel %vm716_vm6, %v722_v60, %v724_v61  ;;  %v727_v6 = vsel %vm716_vm6, %v724_v61, %v726_v62  ;;  %v729_v7 = vsel %vm716_vm6, %v726_v62, %v728_v0  ;;  %v736_v8 = vadd.f32 %v719_v63, %v694_v43  ;;  %v820_v43 = vld [vmem:[#allocation2 + $0x18] sm:$0xff]  ;;  %v836_v60 = vld [vmem:[#allocation2 + $0x48] sm:$0xff] }
  0xb0   :  { %v737_v9 = vadd.f32 %v721_v3, %v695_v46  ;;  %v738_v10 = vadd.f32 %v723_v4, %v696_v47  ;;  %v739_v11 = vadd.f32 %v725_v5, %v697_v48  ;;  %v740_v12 = vadd.f32 %v727_v6, %v698_v49  ;;  %v821_v46 = vld [vmem:[#allocation2 + $0x20] sm:$0xff] }
  0xb1   :  { %v741_v13 = vadd.f32 %v729_v7, %v699_v50  ;;  %v746_v21 = vmul.f32 %v743_v58, %v3315_v23  ;;  %v747_v22 = vmul.f32 %v743_v58, %v3317_v24  ;;  %v748_v14 = vmul.f32 %v743_v58, %v3319_v25  ;;  %v839_v3 = vld [vmem:[#allocation2 + $0x60] sm:$0xff] }
  0xb2   :  { %v749_v15 = vmul.f32 %v743_v58, %v3321_v26  ;;  %v750_v16 = vmul.f32 %v743_v58, %v3323_v28  ;;  %v758_v17 = vrot.slane %v744_v1, 7  ;;  %v759_v18 = vrot.slane %v745_v2, 7  ;;  %v837_v1 = vld [vmem:[#allocation2 + $0x50] sm:$0xff]  ;;  %v838_v2 = vld [vmem:[#allocation2 + $0x58] sm:$0xff] }
  0xb3   :  { %v761_v19 = vrot.slane %v746_v21, 7  ;;  %v784_v29 = vstv %s3547_s13  ;;  %v763_v30 = vrot.slane %v747_v22, 7  ;;  %v765_v31 = vrot.slane %v748_v14, 7  ;;  %s3899_s13 = sld [smem:[#allocation8 + $0x101]] }
  0xb4   :  { %v767_v27 = vrot.slane %v749_v15, 7  ;;  %v769_v32 = vrot.slane %v750_v16, 7  ;;  %v760_v23 = vsel %vm716_vm6, %v758_v17, %v759_v18  ;;  %v825_v25 = vstv %s3551_s14  ;;  %s3914_s14 = sld [smem:[#allocation8 + $0x109]] }
  0xb5   :  { %v762_v24 = vsel %vm716_vm6, %v759_v18, %v761_v19  ;;  %v843_v35 = vstv %s3553_s15  ;;  %v764_v26 = vsel %vm716_vm6, %v761_v19, %v763_v30  ;;  %v766_v28 = vsel %vm716_vm6, %v763_v30, %v765_v31  ;;  %v861_v30 = vld [vmem:[#allocation2 + $0x80] sm:$0xff]  ;;  %s3929_s15 = sld [smem:[#allocation8 + $0x102]] }
  0xb6   :  { %v768_v36 = vsel %vm716_vm6, %v765_v31, %v767_v27  ;;  %v770_v37 = vsel %vm716_vm6, %v767_v27, %v769_v32  ;;  %v777_v38 = vadd.f32 %v760_v23, %v736_v8  ;;  %v778_v39 = vadd.f32 %v762_v24, %v737_v9  ;;  %v840_v8 = vld [vmem:[#allocation2 + $0x68] sm:$0xff]  ;;  %v841_v9 = vld [vmem:[#allocation2 + $0x70] sm:$0xff] }
  0xb7   :  { %v779_v40 = vadd.f32 %v764_v26, %v738_v10  ;;  %v780_v41 = vadd.f32 %v766_v28, %v739_v11  ;;  %v781_v44 = vadd.f32 %v768_v36, %v740_v12  ;;  %v782_v45 = vadd.f32 %v770_v37, %v741_v13  ;;  %v842_v10 = vld [vmem:[#allocation2 + $0x78] sm:$0xff]  ;;  %v862_v24 = vld [vmem:[#allocation2 + $0x88] sm:$0xff]  ;;  %v865_v37 = vld [vmem:[#allocation2 + $0xa0] sm:$0xff] }
  0xb8   :  { %v826_v47 = vmul.f32 %v825_v25, %v817_v33  ;;  %v827_v48 = vmul.f32 %v825_v25, %v818_v34  ;;  %v785_v49 = vadd.f32 %v784_v29, %v777_v38  ;;  %v786_v50 = vadd.f32 %v784_v29, %v778_v39  ;;  %v863_v33 = vld [vmem:[#allocation2 + $0x90] sm:$0xff]  ;;  %v864_v34 = vld [vmem:[#allocation2 + $0x98] sm:$0xff]  ;;  %v866_v38 = vld [vmem:[#allocation2 + $0xa8] sm:$0xff] }
  0xb9   :  { %v787_v51 = vadd.f32 %v784_v29, %v779_v40  ;;  %v788_v20 = vadd.f32 %v784_v29, %v780_v41  ;;  %v789_v55 = vadd.f32 %v784_v29, %v781_v44  ;;  %v790_v56 = vadd.f32 %v784_v29, %v782_v45  ;;  %v867_v39 = vld [vmem:[#allocation2 + $0xb0] sm:$0xff] }
  0xba   :  { %v828_v57 = vmul.f32 %v825_v25, %v819_v42  ;;  %v829_v58 = vmul.f32 %v825_v25, %v820_v43  ;;  %v791_v61 = vmul.f32 %v785_v49, %v785_v49  ;;  %v792_v62 = vmul.f32 %v786_v50, %v786_v50 }
  0xbb   :  { %v793_v63 = vmul.f32 %v787_v51, %v787_v51  ;;  %v794_v0 = vmul.f32 %v788_v20, %v788_v20  ;;  %v795_v4 = vmul.f32 %v789_v55, %v789_v55  ;;  %v796_v5 = vmul.f32 %v790_v56, %v790_v56  ;;  %v887_v20 = vld [vmem:[#allocation2 + $0xc0] sm:$0xff] }
  0xbc   :  { %v830_v6 = vmul.f32 %v825_v25, %v821_v46  ;;  %v831_v7 = vmul.f32 %v825_v25, %v822_v52  ;;  %v797_v11 = vadd.f32 %v792_v62, %v791_v61  ;;  %v832_v12 = vmul.f32 %v825_v25, %v823_v53  ;;  %v888_v52 = vld [vmem:[#allocation2 + $0xc8] sm:$0xff]  ;;  %v889_v53 = vld [vmem:[#allocation2 + $0xd0] sm:$0xff] }
  0xbd   :  { %v833_v13 = vmul.f32 %v825_v25, %v824_v54  ;;  %v844_v21 = vmul.f32 %v843_v35, %v835_v59  ;;  %v845_v22 = vmul.f32 %v843_v35, %v836_v60  ;;  %v846_v14 = vmul.f32 %v843_v35, %v837_v1  ;;  %v891_v59 = vld [vmem:[#allocation2 + $0xe0] sm:$0xff]  ;;  %v892_v60 = vld [vmem:[#allocation2 + $0xe8] sm:$0xff]  ;;  %v893_v1 = vld [vmem:[#allocation2 + $0xf0] sm:$0xff] }
  0xbe   :  { %v847_v15 = vmul.f32 %v843_v35, %v838_v2  ;;  %v848_v16 = vmul.f32 %v843_v35, %v839_v3  ;;  %v798_v17 = vadd.f32 %v797_v11, %v793_v63  ;;  %v849_v18 = vmul.f32 %v843_v35, %v840_v8  ;;  %v894_v2 = vld [vmem:[#allocation2 + $0xf8] sm:$0xff] }
  0xbf   :  { %v850_v19 = vmul.f32 %v843_v35, %v841_v9  ;;  %v851_v29 = vmul.f32 %v843_v35, %v842_v10  ;;  %v852_v31 = vadd.f32 %v844_v21, %v826_v47  ;;  %v853_v27 = vadd.f32 %v845_v22, %v827_v48  ;;  %v868_v35 = vld [vmem:[#allocation2 + $0xb8] sm:$0xff] }
  0xc0   :  { %v854_v32 = vadd.f32 %v846_v14, %v828_v57  ;;  %v855_v23 = vadd.f32 %v847_v15, %v829_v58  ;;  %v799_v25 = vadd.f32 %v798_v17, %v794_v0  ;;  %v856_v26 = vadd.f32 %v848_v16, %v830_v6  ;;  %v890_v58 = vld [vmem:[#allocation2 + $0xd8] sm:$0xff] }
  0xc1   :  { %v857_v28 = vadd.f32 %v849_v18, %v831_v7  ;;  %v858_v36 = vadd.f32 %v850_v19, %v832_v12  ;;  %v859_v40 = vadd.f32 %v851_v29, %v833_v13  ;;  %v869_v41 = vstv %s3577_s16  ;;  %s3946_s16 = sld [smem:[#allocation8 + $0x10a]] }
  0xc2   :  { %v895_v42 = vstv %s3579_s17  ;;  %v913_v43 = vstv %s3581_s18  ;;  %v800_v44 = vadd.f32 %v799_v25, %v795_v4  ;;  %v870_v45 = vmul.f32 %v869_v41, %v861_v30  ;;  %s3949_s17 = sld [smem:[#allocation8 + $0x103]] }
  0xc3   :  { %v871_v46 = vmul.f32 %v869_v41, %v862_v24  ;;  %v872_v47 = vmul.f32 %v869_v41, %v863_v33  ;;  %v873_v48 = vmul.f32 %v869_v41, %v864_v34  ;;  %v874_v49 = vmul.f32 %v869_v41, %v865_v37  ;;  %s3977_s18 = sld [smem:[#allocation8 + $0x10b]] }
  0xc4   :  { %v875_v50 = vmul.f32 %v869_v41, %v866_v38  ;;  %v876_v51 = vmul.f32 %v869_v41, %v867_v39  ;;  %v801_v54 = vadd.f32 %v800_v44, %v796_v5  ;;  %v877_v55 = vmul.f32 %v869_v41, %v868_v35 }
  0xc5   :  { %v878_v56 = vadd.f32 %v870_v45, %v852_v31  ;;  %v879_v57 = vadd.f32 %v871_v46, %v853_v27  ;;  %v880_v61 = vadd.f32 %v872_v47, %v854_v32  ;;  %v881_v62 = vadd.f32 %v873_v48, %v855_v23 }
  0xc6   :  { %v882_v63 = vadd.f32 %v874_v49, %v856_v26  ;;  %v883_v0 = vadd.f32 %v875_v50, %v857_v28  ;;  %v802_v3 = vrot.slane %v801_v54, 4  ;;  %v884_v4 = vadd.f32 %v876_v51, %v858_v36 }
  0xc7   :  { %v885_v5 = vadd.f32 %v877_v55, %v859_v40  ;;  %v896_v6 = vmul.f32 %v895_v42, %v887_v20  ;;  %v897_v7 = vmul.f32 %v895_v42, %v888_v52  ;;  %v898_v8 = vmul.f32 %v895_v42, %v889_v53 }
  0xc8   :  { %v899_v9 = vmul.f32 %v895_v42, %v890_v58  ;;  %v900_v10 = vmul.f32 %v895_v42, %v891_v59  ;;  %v803_v11 = vadd.f32 %v802_v3, %v801_v54  ;;  %v901_v12 = vmul.f32 %v895_v42, %v892_v60 }
  0xc9   :  { %v902_v13 = vmul.f32 %v895_v42, %v893_v1  ;;  %v903_v21 = vmul.f32 %v895_v42, %v894_v2  ;;  %v3594_v22 = vadd.f32 %v896_v6, %v878_v56  ;;  %v3596_v14 = vadd.f32 %v897_v7, %v879_v57 }
  0xca   :  { %v3598_v15 = vadd.f32 %v898_v8, %v880_v61  ;;  %v3600_v16 = vadd.f32 %v899_v9, %v881_v62  ;;  %v804_v17 = vrot.slane %v803_v11, 2  ;;  %v3602_v18 = vadd.f32 %v900_v10, %v882_v63 }
  0xcb   :  { %v3604_v19 = vadd.f32 %v901_v12, %v883_v0  ;;  %v3606_v29 = vadd.f32 %v902_v13, %v884_v4  ;;  %v3608_v30 = vadd.f32 %v903_v21, %v885_v5  ;;  %v914_v31 = vmul.f32 %v913_v43, %v3594_v22 }
  0xcc   :  { %v915_v27 = vmul.f32 %v913_v43, %v3596_v14  ;;  %v916_v32 = vmul.f32 %v913_v43, %v3598_v15  ;;  %v805_v23 = vadd.f32 %v804_v17, %v803_v11  ;;  %v917_v24 = vmul.f32 %v913_v43, %v3600_v16 }
  0xcd   :  { %v918_v33 = vmul.f32 %v913_v43, %v3602_v18  ;;  %v919_v34 = vmul.f32 %v913_v43, %v3604_v19  ;;  %v921_v25 = vstv %s3586_s19  ;;  %v935_v26 = vstv %s3588_s1  ;;  %s3993_s19 = sld [smem:[#allocation8 + $0x104]] }
  0xce   :  { %v949_v28 = vstv %s3590_s2  ;;  %v3620_v36 = vstv %s3592_s3  ;;  %v806_v37 = vrot.slane %v805_v23, 1  ;;  %v922_v38 = vmul.f32 %v921_v25, %v3596_v14  ;;  %s4007_s1 = sld [smem:[#allocation8 + $0x10c]]  ;;  %s4024_s2 = sld [smem:[#allocation8 + $0x105]] }
  0xcf   :  { %v923_v39 = vmul.f32 %v921_v25, %v3598_v15  ;;  %v924_v40 = vmul.f32 %v921_v25, %v3600_v16  ;;  %v925_v35 = vmul.f32 %v921_v25, %v3602_v18  ;;  %v926_v41 = vmul.f32 %v921_v25, %v3604_v19  ;;  %s4041_s3 = sld [smem:[#allocation8 + $0x10d]] }
  0xd0   :  { %v927_v42 = vmul.f32 %v921_v25, %v3606_v29  ;;  %v936_v43 = vmul.f32 %v935_v26, %v3598_v15  ;;  %v807_v44 = vadd.f32 %v806_v37, %v805_v23  ;;  %v928_v45 = vadd.f32 %v922_v38, %v914_v31 }
  0xd1   :  { %v929_v46 = vadd.f32 %v923_v39, %v915_v27  ;;  %v930_v47 = vadd.f32 %v924_v40, %v916_v32  ;;  %v931_v48 = vadd.f32 %v925_v35, %v917_v24  ;;  %v932_v49 = vadd.f32 %v926_v41, %v918_v33 }
  0xd2   :  { %v933_v50 = vadd.f32 %v927_v42, %v919_v34  ;;  %v937_v51 = vmul.f32 %v935_v26, %v3600_v16  ;;  %v809_v20 = vmax.f32 %v807_v44, 1e-07  ;;  %v938_v52 = vmul.f32 %v935_v26, %v3602_v18 }
  0xd3   :  { %v939_v53 = vmul.f32 %v935_v26, %v3604_v19  ;;  %v940_v54 = vmul.f32 %v935_v26, %v3606_v29  ;;  %v941_v55 = vmul.f32 %v935_v26, %v3608_v30  ;;  %v942_v56 = vadd.f32 %v936_v43, %v928_v45 }
  0xd4   :  { %v943_v57 = vadd.f32 %v937_v51, %v929_v46  ;;  %v950_v58 = vmul.f32 %v949_v28, %v3594_v22  ;;  %v810_v59 = vmin.f32 %v809_v20, 10000.0  ;;  %v944_v60 = vadd.f32 %v938_v52, %v930_v47 }
  0xd5   :  { %v945_v61 = vadd.f32 %v939_v53, %v931_v48  ;;  %v946_v62 = vadd.f32 %v940_v54, %v932_v49  ;;  %v947_v63 = vadd.f32 %v941_v55, %v933_v50  ;;  %v951_v0 = vmul.f32 %v949_v28, %v3596_v14 }
  0xd6   :  { %v952_v1 = vmul.f32 %v949_v28, %v3598_v15  ;;  %v953_v2 = vmul.f32 %v949_v28, %v3600_v16  ;;  %3143 = vlog2.f32 %v810_v59  ;;  %v954_v3 = vmul.f32 %v949_v28, %v3602_v18 }
  0xd7   :  { %v955_v4 = vmul.f32 %v949_v28, %v3604_v19  ;;  %v956_v5 = vmul.f32 %v949_v28, %v3606_v29  ;;  %v964_v6 = vrot.slane %v950_v58, 1  ;;  %v965_v7 = vrot.slane %v951_v0, 1 }
  0xd8   :  { %v967_v8 = vrot.slane %v952_v1, 1  ;;  %v969_v9 = vrot.slane %v953_v2, 1  ;;  %v971_v10 = vrot.slane %v954_v3, 1  ;;  %v991_v13 = vmul.f32 %v3620_v36, %v3596_v14 }
  0xd9   :  { %v973_v11 = vrot.slane %v955_v4, 1  ;;  %v975_v12 = vrot.slane %v956_v5, 1  ;;  %v966_v21 = vsel %vm218_vm0, %v964_v6, %v965_v7  ;;  %v992_v27 = vmul.f32 %v3620_v36, %v3598_v15 }
  0xda   :  { %v968_v17 = vsel %vm218_vm0, %v965_v7, %v967_v8  ;;  %v970_v31 = vsel %vm218_vm0, %v967_v8, %v969_v9  ;;  %v972_v32 = vsel %vm218_vm0, %v969_v9, %v971_v10  ;;  %v983_v33 = vadd.f32 %v966_v21, %v942_v56 }
  0xdb   :  { %v974_v23 = vsel %vm218_vm0, %v971_v10, %v973_v11  ;;  %v976_v24 = vsel %vm218_vm0, %v973_v11, %v975_v12  ;;  %v984_v34 = vadd.f32 %v968_v17, %v943_v57  ;;  %v985_v25 = vadd.f32 %v970_v31, %v944_v60 }
  0xdc   :  { %v986_v26 = vadd.f32 %v972_v32, %v945_v61  ;;  %v987_v28 = vadd.f32 %v974_v23, %v946_v62  ;;  %v988_v37 = vadd.f32 %v976_v24, %v947_v63  ;;  %v993_v38 = vmul.f32 %v3620_v36, %v3600_v16 }
  0xdd   :  { %v994_v39 = vmul.f32 %v3620_v36, %v3602_v18  ;;  %v995_v40 = vmul.f32 %v3620_v36, %v3604_v19  ;;  %v996_v35 = vmul.f32 %v3620_v36, %v3606_v29  ;;  %v997_v41 = vmul.f32 %v3620_v36, %v3608_v30 }
  0xde   :  { %v1005_v42 = vrot.slane %v991_v13, 1  ;;  %v1006_v43 = vrot.slane %v992_v27, 1  ;;  %v1008_v44 = vrot.slane %v993_v38, 1  ;;  %v1031_v47 = vstv %s3641_s20  ;;  %s4057_s20 = sld [smem:[#allocation8 + $0x106]] }
  0xdf   :  { %v1010_v45 = vrot.slane %v994_v39, 1  ;;  %v1012_v46 = vrot.slane %v995_v40, 1  ;;  %v1014_v49 = vrot.slane %v996_v35, 1  ;;  %v1016_v50 = vrot.slane %v997_v41, 1 }
  0xe0   :  { %v1007_v48 = vsel %vm218_vm0, %v1005_v42, %v1006_v43  ;;  %v1032_v51 = vmul.f32 %v1031_v47, %v3594_v22  ;;  %v3144_v20 = vpop.eup %3143  ;;  %v1009_v52 = vsel %vm218_vm0, %v1006_v43, %v1008_v44  ;;  %v1033_v0 = vmul.f32 %v1031_v47, %v3596_v14 }
  0xe1   :  { %v1011_v53 = vsel %vm218_vm0, %v1008_v44, %v1010_v45  ;;  %v1013_v36 = vsel %vm218_vm0, %v1010_v45, %v1012_v46  ;;  %v1024_v54 = vadd.f32 %v1007_v48, %v983_v33  ;;  %v812_v55 = vmul.f32 0.6931472, %v3144_v20 }
  0xe2   :  { %v1015_v56 = vsel %vm218_vm0, %v1012_v46, %v1014_v49  ;;  %v1017_v57 = vsel %vm218_vm0, %v1014_v49, %v1016_v50  ;;  %v1025_v58 = vadd.f32 %v1009_v52, %v984_v34  ;;  %v1026_v59 = vadd.f32 %v1011_v53, %v985_v25 }
  0xe3   :  { %v1027_v60 = vadd.f32 %v1013_v36, %v986_v26  ;;  %v1028_v61 = vadd.f32 %v1015_v56, %v987_v28  ;;  %v1029_v62 = vadd.f32 %v1017_v57, %v988_v37  ;;  %v813_v63 = vmul.f32 0.4342945, %v812_v55 }
  0xe4   :  { %v1034_v1 = vmul.f32 %v1031_v47, %v3598_v15  ;;  %v1035_v2 = vmul.f32 %v1031_v47, %v3600_v16  ;;  %v1036_v3 = vmul.f32 %v1031_v47, %v3602_v18  ;;  %v1037_v4 = vmul.f32 %v1031_v47, %v3604_v19 }
  0xe5   :  { %v1038_v5 = vmul.f32 %v1031_v47, %v3606_v29  ;;  %v1046_v6 = vrot.slane %v1032_v51, 2  ;;  %v814_v7 = vmul.f32 10.0, %v813_v63  ;;  %v1047_v8 = vrot.slane %v1033_v0, 2 }
  0xe6   :  { %v1049_v9 = vrot.slane %v1034_v1, 2  ;;  %v1051_v10 = vrot.slane %v1035_v2, 2  ;;  %v1053_v11 = vrot.slane %v1036_v3, 2  ;;  %v1055_v12 = vrot.slane %v1037_v4, 2 }
  0xe7   :  { %v1057_v13 = vrot.slane %v1038_v5, 2  ;;  %v1072_v21 = vstv %s3664_s21  ;;  %815 = vst [vmem:[#allocation11] sm:$0x1] %v814_v7  ;;  %v1048_v17 = vsel %vm301_vm1, %v1046_v6, %v1047_v8  ;;  %v1113_v48 = vstv %s3679_s22  ;;  %s4071_s21 = sld [smem:[#allocation8 + $0x10e]]  ;;  %s4088_s22 = sld [smem:[#allocation8 + $0x107]] }
  0xe8   :  { %v1050_v31 = vsel %vm301_vm1, %v1047_v8, %v1049_v9  ;;  %v1052_v27 = vsel %vm301_vm1, %v1049_v9, %v1051_v10  ;;  %v1073_v32 = vmul.f32 %v1072_v21, %v3596_v14  ;;  %v1054_v23 = vsel %vm301_vm1, %v1051_v10, %v1053_v11 }
  0xe9   :  { %v1056_v24 = vsel %vm301_vm1, %v1053_v11, %v1055_v12  ;;  %v1058_v33 = vsel %vm301_vm1, %v1055_v12, %v1057_v13  ;;  %v1065_v34 = vadd.f32 %v1048_v17, %v1024_v54  ;;  %v1066_v25 = vadd.f32 %v1050_v31, %v1025_v58 }
  0xea   :  { %v1067_v26 = vadd.f32 %v1052_v27, %v1026_v59  ;;  %v1068_v28 = vadd.f32 %v1054_v23, %v1027_v60  ;;  %v1069_v37 = vadd.f32 %v1056_v24, %v1028_v61  ;;  %v1070_v38 = vadd.f32 %v1058_v33, %v1029_v62 }
  0xeb   :  { %v1074_v39 = vmul.f32 %v1072_v21, %v3598_v15  ;;  %v1075_v40 = vmul.f32 %v1072_v21, %v3600_v16  ;;  %v1076_v35 = vmul.f32 %v1072_v21, %v3602_v18  ;;  %v1077_v41 = vmul.f32 %v1072_v21, %v3604_v19 }
  0xec   :  { %v1078_v42 = vmul.f32 %v1072_v21, %v3606_v29  ;;  %v1079_v43 = vmul.f32 %v1072_v21, %v3608_v30  ;;  %v1087_v44 = vrot.slane %v1073_v32, 2  ;;  %v1114_v20 = vmul.f32 %v1113_v48, %v3594_v22 }
  0xed   :  { %v1088_v45 = vrot.slane %v1074_v39, 2  ;;  %v1090_v46 = vrot.slane %v1075_v40, 2  ;;  %v1092_v47 = vrot.slane %v1076_v35, 2  ;;  %v1094_v49 = vrot.slane %v1077_v41, 2 }
  0xee   :  { %v1096_v50 = vrot.slane %v1078_v42, 2  ;;  %v1098_v51 = vrot.slane %v1079_v43, 2  ;;  %v1115_v54 = vmul.f32 %v1113_v48, %v3596_v14  ;;  %v1116_v0 = vmul.f32 %v1113_v48, %v3598_v15 }
  0xef   :  { %v1089_v52 = vsel %vm301_vm1, %v1087_v44, %v1088_v45  ;;  %v1091_v53 = vsel %vm301_vm1, %v1088_v45, %v1090_v46  ;;  %v1093_v36 = vsel %vm301_vm1, %v1090_v46, %v1092_v47  ;;  %v1095_v55 = vsel %vm301_vm1, %v1092_v47, %v1094_v49 }
  0xf0   :  { %v1097_v56 = vsel %vm301_vm1, %v1094_v49, %v1096_v50  ;;  %v1099_v57 = vsel %vm301_vm1, %v1096_v50, %v1098_v51  ;;  %v1106_v58 = vadd.f32 %v1089_v52, %v1065_v34  ;;  %v1107_v59 = vadd.f32 %v1091_v53, %v1066_v25 }
  0xf1   :  { %v1108_v60 = vadd.f32 %v1093_v36, %v1067_v26  ;;  %v1109_v61 = vadd.f32 %v1095_v55, %v1068_v28  ;;  %v1110_v62 = vadd.f32 %v1097_v56, %v1069_v37  ;;  %v1111_v63 = vadd.f32 %v1099_v57, %v1070_v38 }
  0xf2   :  { %v1117_v1 = vmul.f32 %v1113_v48, %v3600_v16  ;;  %v1118_v2 = vmul.f32 %v1113_v48, %v3602_v18  ;;  %v1119_v3 = vmul.f32 %v1113_v48, %v3604_v19  ;;  %v1120_v4 = vmul.f32 %v1113_v48, %v3606_v29 }
  0xf3   :  { %v1128_v5 = vrot.slane %v1114_v20, 3  ;;  %v1129_v6 = vrot.slane %v1115_v54, 3  ;;  %v1131_v7 = vrot.slane %v1116_v0, 3  ;;  %v1154_v10 = vstv %s3695_s23  ;;  %s4105_s23 = sld [smem:[#allocation8 + $0x10f]] }
  0xf4   :  { %v1133_v8 = vrot.slane %v1117_v1, 3  ;;  %v1135_v9 = vrot.slane %v1118_v2, 3  ;;  %v1137_v12 = vrot.slane %v1119_v3, 3  ;;  %v1139_v13 = vrot.slane %v1120_v4, 3 }
  0xf5   :  { %v1130_v11 = vsel %vm384_vm2, %v1128_v5, %v1129_v6  ;;  %v1155_v21 = vmul.f32 %v1154_v10, %v3596_v14  ;;  %v1132_v17 = vsel %vm384_vm2, %v1129_v6, %v1131_v7  ;;  %v1156_v37 = vmul.f32 %v1154_v10, %v3598_v15 }
  0xf6   :  { %v1134_v31 = vsel %vm384_vm2, %v1131_v7, %v1133_v8  ;;  %v1136_v27 = vsel %vm384_vm2, %v1133_v8, %v1135_v9  ;;  %v1147_v32 = vadd.f32 %v1130_v11, %v1106_v58  ;;  %v1138_v23 = vsel %vm384_vm2, %v1135_v9, %v1137_v12 }
  0xf7   :  { %v1140_v24 = vsel %vm384_vm2, %v1137_v12, %v1139_v13  ;;  %v1148_v33 = vadd.f32 %v1132_v17, %v1107_v59  ;;  %v1149_v34 = vadd.f32 %v1134_v31, %v1108_v60  ;;  %v1150_v25 = vadd.f32 %v1136_v27, %v1109_v61 }
  0xf8   :  { %v1151_v26 = vadd.f32 %v1138_v23, %v1110_v62  ;;  %v1152_v28 = vadd.f32 %v1140_v24, %v1111_v63  ;;  %v1157_v38 = vmul.f32 %v1154_v10, %v3600_v16  ;;  %v1158_v39 = vmul.f32 %v1154_v10, %v3602_v18 }
  0xf9   :  { %v1159_v40 = vmul.f32 %v1154_v10, %v3604_v19  ;;  %v1160_v35 = vmul.f32 %v1154_v10, %v3606_v29  ;;  %v1161_v41 = vmul.f32 %v1154_v10, %v3608_v30  ;;  %v1169_v42 = vrot.slane %v1155_v21, 3 }
  0xfa   :  { %v1170_v43 = vrot.slane %v1156_v37, 3  ;;  %v1195_v44 = vstv %s3709_s24  ;;  %v1172_v45 = vrot.slane %v1157_v38, 3  ;;  %v1174_v46 = vrot.slane %v1158_v39, 3  ;;  %s4121_s24 = sld [smem:[#allocation9 + $0x2]] }
  0xfb   :  { %v1176_v47 = vrot.slane %v1159_v40, 3  ;;  %v1178_v48 = vrot.slane %v1160_v35, 3  ;;  %v1180_v50 = vrot.slane %v1161_v41, 3  ;;  %v1196_v51 = vmul.f32 %v1195_v44, %v3594_v22 }
  0xfc   :  { %v1171_v49 = vsel %vm384_vm2, %v1169_v42, %v1170_v43  ;;  %v1197_v20 = vmul.f32 %v1195_v44, %v3596_v14  ;;  %v1173_v52 = vsel %vm384_vm2, %v1170_v43, %v1172_v45  ;;  %v1175_v53 = vsel %vm384_vm2, %v1172_v45, %v1174_v46 }
  0xfd   :  { %v1177_v36 = vsel %vm384_vm2, %v1174_v46, %v1176_v47  ;;  %v1179_v54 = vsel %vm384_vm2, %v1176_v47, %v1178_v48  ;;  %v1181_v55 = vsel %vm384_vm2, %v1178_v48, %v1180_v50  ;;  %v1188_v56 = vadd.f32 %v1171_v49, %v1147_v32 }
  0xfe   :  { %v1189_v57 = vadd.f32 %v1173_v52, %v1148_v33  ;;  %v1190_v58 = vadd.f32 %v1175_v53, %v1149_v34  ;;  %v1191_v59 = vadd.f32 %v1177_v36, %v1150_v25  ;;  %v1192_v60 = vadd.f32 %v1179_v54, %v1151_v26 }
  0xff   :  { %v1193_v61 = vadd.f32 %v1181_v55, %v1152_v28  ;;  %v1198_v62 = vmul.f32 %v1195_v44, %v3598_v15  ;;  %v1199_v63 = vmul.f32 %v1195_v44, %v3600_v16  ;;  %v1200_v0 = vmul.f32 %v1195_v44, %v3602_v18 }
 0x100   :  { %v1201_v1 = vmul.f32 %v1195_v44, %v3604_v19  ;;  %v1202_v2 = vmul.f32 %v1195_v44, %v3606_v29  ;;  %v1210_v3 = vrot.slane %v1196_v51, 4  ;;  %v1211_v4 = vrot.slane %v1197_v20, 4 }
 0x101   :  { %v1213_v5 = vrot.slane %v1198_v62, 4  ;;  %v1236_v6 = vstv %s3726_s25  ;;  %v1215_v7 = vrot.slane %v1199_v63, 4  ;;  %v1217_v8 = vrot.slane %v1200_v0, 4  ;;  %s4124_s25 = sld [smem:[#allocation7 + $0x180]] }
 0x102   :  { %v1219_v9 = vrot.slane %v1201_v1, 4  ;;  %v1221_v10 = vrot.slane %v1202_v2, 4  ;;  %v1212_v11 = vsel %vm467_vm3, %v1210_v3, %v1211_v4  ;;  %v1237_v13 = vmul.f32 %v1236_v6, %v3596_v14 }
 0x103   :  { %v1214_v12 = vsel %vm467_vm3, %v1211_v4, %v1213_v5  ;;  %v1238_v21 = vmul.f32 %v1236_v6, %v3598_v15  ;;  %v1216_v17 = vsel %vm467_vm3, %v1213_v5, %v1215_v7  ;;  %v1218_v31 = vsel %vm467_vm3, %v1215_v7, %v1217_v8 }
 0x104   :  { %v1220_v27 = vsel %vm467_vm3, %v1217_v8, %v1219_v9  ;;  %v1222_v32 = vsel %vm467_vm3, %v1219_v9, %v1221_v10  ;;  %v1229_v23 = vadd.f32 %v1212_v11, %v1188_v56  ;;  %v1230_v24 = vadd.f32 %v1214_v12, %v1189_v57 }
 0x105   :  { %v1231_v33 = vadd.f32 %v1216_v17, %v1190_v58  ;;  %v1232_v34 = vadd.f32 %v1218_v31, %v1191_v59  ;;  %v1233_v25 = vadd.f32 %v1220_v27, %v1192_v60  ;;  %v1234_v26 = vadd.f32 %v1222_v32, %v1193_v61 }
 0x106   :  { %v1239_v28 = vmul.f32 %v1236_v6, %v3600_v16  ;;  %v1240_v37 = vmul.f32 %v1236_v6, %v3602_v18  ;;  %v1241_v38 = vmul.f32 %v1236_v6, %v3604_v19  ;;  %v1242_v39 = vmul.f32 %v1236_v6, %v3606_v29 }
 0x107   :  { %v1243_v40 = vmul.f32 %v1236_v6, %v3608_v30  ;;  %v1251_v35 = vrot.slane %v1237_v13, 4  ;;  %v1252_v41 = vrot.slane %v1238_v21, 4  ;;  %v1277_v44 = vstv %s3743_s26  ;;  %s4142_s26 = sld [smem:[#allocation7 + $0x181]] }
 0x108   :  { %v1254_v42 = vrot.slane %v1239_v28, 4  ;;  %v1256_v43 = vrot.slane %v1240_v37, 4  ;;  %v1258_v45 = vrot.slane %v1241_v38, 4  ;;  %v1260_v46 = vrot.slane %v1242_v39, 4 }
 0x109   :  { %v1262_v47 = vrot.slane %v1243_v40, 4  ;;  %v1278_v48 = vmul.f32 %v1277_v44, %v3594_v22  ;;  %v1253_v49 = vsel %vm467_vm3, %v1251_v35, %v1252_v41  ;;  %v1279_v20 = vmul.f32 %v1277_v44, %v3596_v14 }
 0x10a   :  { %v1255_v50 = vsel %vm467_vm3, %v1252_v41, %v1254_v42  ;;  %v1257_v51 = vsel %vm467_vm3, %v1254_v42, %v1256_v43  ;;  %v1259_v52 = vsel %vm467_vm3, %v1256_v43, %v1258_v45  ;;  %v1261_v53 = vsel %vm467_vm3, %v1258_v45, %v1260_v46 }
 0x10b   :  { %v1263_v36 = vsel %vm467_vm3, %v1260_v46, %v1262_v47  ;;  %v1270_v54 = vadd.f32 %v1253_v49, %v1229_v23  ;;  %v1271_v55 = vadd.f32 %v1255_v50, %v1230_v24  ;;  %v1272_v56 = vadd.f32 %v1257_v51, %v1231_v33 }
 0x10c   :  { %v1273_v57 = vadd.f32 %v1259_v52, %v1232_v34  ;;  %v1274_v58 = vadd.f32 %v1261_v53, %v1233_v25  ;;  %v1275_v59 = vadd.f32 %v1263_v36, %v1234_v26  ;;  %v1280_v60 = vmul.f32 %v1277_v44, %v3598_v15 }
 0x10d   :  { %v1281_v61 = vmul.f32 %v1277_v44, %v3600_v16  ;;  %v1282_v62 = vmul.f32 %v1277_v44, %v3602_v18  ;;  %v1283_v63 = vmul.f32 %v1277_v44, %v3604_v19  ;;  %v1284_v0 = vmul.f32 %v1277_v44, %v3606_v29 }
 0x10e   :  { %v1292_v1 = vrot.slane %v1278_v48, 5  ;;  %v1293_v2 = vrot.slane %v1279_v20, 5  ;;  %v1295_v3 = vrot.slane %v1280_v60, 5  ;;  %v1318_v6 = vstv %s3759_s27  ;;  %s4144_s27 = sld [smem:[#allocation7 + $0x182]] }
 0x10f   :  { %v1297_v4 = vrot.slane %v1281_v61, 5  ;;  %v1299_v5 = vrot.slane %v1282_v62, 5  ;;  %v1301_v8 = vrot.slane %v1283_v63, 5  ;;  %v1303_v9 = vrot.slane %v1284_v0, 5 }
 0x110   :  { %v1294_v7 = vsel %vm550_vm4, %v1292_v1, %v1293_v2  ;;  %v1319_v10 = vmul.f32 %v1318_v6, %v3596_v14  ;;  %v1296_v11 = vsel %vm550_vm4, %v1293_v2, %v1295_v3  ;;  %v1320_v34 = vmul.f32 %v1318_v6, %v3598_v15 }
 0x111   :  { %v1298_v12 = vsel %vm550_vm4, %v1295_v3, %v1297_v4  ;;  %v1300_v13 = vsel %vm550_vm4, %v1297_v4, %v1299_v5  ;;  %v1311_v21 = vadd.f32 %v1294_v7, %v1270_v54  ;;  %v1302_v17 = vsel %vm550_vm4, %v1299_v5, %v1301_v8 }
 0x112   :  { %v1304_v31 = vsel %vm550_vm4, %v1301_v8, %v1303_v9  ;;  %v1312_v27 = vadd.f32 %v1296_v11, %v1271_v55  ;;  %v1313_v32 = vadd.f32 %v1298_v12, %v1272_v56  ;;  %v1314_v23 = vadd.f32 %v1300_v13, %v1273_v57 }
 0x113   :  { %v1315_v24 = vadd.f32 %v1302_v17, %v1274_v58  ;;  %v1316_v33 = vadd.f32 %v1304_v31, %v1275_v59  ;;  %v1321_v25 = vmul.f32 %v1318_v6, %v3600_v16  ;;  %v1322_v26 = vmul.f32 %v1318_v6, %v3602_v18 }
 0x114   :  { %v1323_v28 = vmul.f32 %v1318_v6, %v3604_v19  ;;  %v1324_v37 = vmul.f32 %v1318_v6, %v3606_v29  ;;  %v1325_v38 = vmul.f32 %v1318_v6, %v3608_v30  ;;  %v1333_v39 = vrot.slane %v1319_v10, 5 }
 0x115   :  { %v1334_v40 = vrot.slane %v1320_v34, 5  ;;  %v1359_v35 = vstv %s3773_s28  ;;  %v1336_v41 = vrot.slane %v1321_v25, 5  ;;  %v1338_v42 = vrot.slane %v1322_v26, 5  ;;  %s4149_s28 = sld [smem:[#allocation7 + $0x183]] }
 0x116   :  { %v1340_v43 = vrot.slane %v1323_v28, 5  ;;  %v1342_v44 = vrot.slane %v1324_v37, 5  ;;  %v1344_v46 = vrot.slane %v1325_v38, 5  ;;  %v1360_v47 = vmul.f32 %v1359_v35, %v3594_v22 }
 0x117   :  { %v1335_v45 = vsel %vm550_vm4, %v1333_v39, %v1334_v40  ;;  %v1361_v48 = vmul.f32 %v1359_v35, %v3596_v14  ;;  %v1337_v49 = vsel %vm550_vm4, %v1334_v40, %v1336_v41  ;;  %v1339_v50 = vsel %vm550_vm4, %v1336_v41, %v1338_v42 }
 0x118   :  { %v1341_v51 = vsel %vm550_vm4, %v1338_v42, %v1340_v43  ;;  %v1343_v20 = vsel %vm550_vm4, %v1340_v43, %v1342_v44  ;;  %v1345_v52 = vsel %vm550_vm4, %v1342_v44, %v1344_v46  ;;  %v1352_v53 = vadd.f32 %v1335_v45, %v1311_v21 }
 0x119   :  { %v1353_v36 = vadd.f32 %v1337_v49, %v1312_v27  ;;  %v1354_v54 = vadd.f32 %v1339_v50, %v1313_v32  ;;  %v1355_v55 = vadd.f32 %v1341_v51, %v1314_v23  ;;  %v1356_v56 = vadd.f32 %v1343_v20, %v1315_v24 }
 0x11a   :  { %v1357_v57 = vadd.f32 %v1345_v52, %v1316_v33  ;;  %v1362_v58 = vmul.f32 %v1359_v35, %v3598_v15  ;;  %v1363_v59 = vmul.f32 %v1359_v35, %v3600_v16  ;;  %v1364_v60 = vmul.f32 %v1359_v35, %v3602_v18 }
 0x11b   :  { %v1365_v61 = vmul.f32 %v1359_v35, %v3604_v19  ;;  %v1366_v62 = vmul.f32 %v1359_v35, %v3606_v29  ;;  %v1374_v63 = vrot.slane %v1360_v47, 6  ;;  %v1375_v0 = vrot.slane %v1361_v48, 6 }
 0x11c   :  { %v1377_v1 = vrot.slane %v1362_v58, 6  ;;  %v1400_v2 = vstv %s3790_s29  ;;  %v1379_v3 = vrot.slane %v1363_v59, 6  ;;  %v1381_v4 = vrot.slane %v1364_v60, 6  ;;  %s4151_s29 = sld [smem:[#allocation8 + $0x180]] }
 0x11d   :  { %v1383_v5 = vrot.slane %v1365_v61, 6  ;;  %v1385_v6 = vrot.slane %v1366_v62, 6  ;;  %v1376_v7 = vsel %vm633_vm5, %v1374_v63, %v1375_v0  ;;  %v1401_v9 = vmul.f32 %v1400_v2, %v3596_v14 }
 0x11e   :  { %v1378_v8 = vsel %vm633_vm5, %v1375_v0, %v1377_v1  ;;  %v1402_v10 = vmul.f32 %v1400_v2, %v3598_v15  ;;  %v1380_v11 = vsel %vm633_vm5, %v1377_v1, %v1379_v3  ;;  %v1382_v12 = vsel %vm633_vm5, %v1379_v3, %v1381_v4 }
 0x11f   :  { %v1384_v13 = vsel %vm633_vm5, %v1381_v4, %v1383_v5  ;;  %v1386_v21 = vsel %vm633_vm5, %v1383_v5, %v1385_v6  ;;  %v1393_v17 = vadd.f32 %v1376_v7, %v1352_v53  ;;  %v1394_v31 = vadd.f32 %v1378_v8, %v1353_v36 }
 0x120   :  { %v1395_v27 = vadd.f32 %v1380_v11, %v1354_v54  ;;  %v1396_v32 = vadd.f32 %v1382_v12, %v1355_v55  ;;  %v1397_v23 = vadd.f32 %v1384_v13, %v1356_v56  ;;  %v1398_v24 = vadd.f32 %v1386_v21, %v1357_v57 }
 0x121   :  { %v1403_v33 = vmul.f32 %v1400_v2, %v3600_v16  ;;  %v1404_v34 = vmul.f32 %v1400_v2, %v3602_v18  ;;  %v1405_v25 = vmul.f32 %v1400_v2, %v3604_v19  ;;  %v1406_v26 = vmul.f32 %v1400_v2, %v3606_v29 }
 0x122   :  { %v1407_v28 = vmul.f32 %v1400_v2, %v3608_v30  ;;  %v1415_v37 = vrot.slane %v1401_v9, 6  ;;  %v1416_v38 = vrot.slane %v1402_v10, 6  ;;  %v1441_v35 = vstv %s3807_s30  ;;  %s4163_s30 = sld [smem:[#allocation8 + $0x188]] }
 0x123   :  { %v1418_v39 = vrot.slane %v1403_v33, 6  ;;  %v1420_v40 = vrot.slane %v1404_v34, 6  ;;  %v1422_v41 = vrot.slane %v1405_v25, 6  ;;  %v1424_v42 = vrot.slane %v1406_v26, 6 }
 0x124   :  { %v1426_v43 = vrot.slane %v1407_v28, 6  ;;  %v1442_v44 = vmul.f32 %v1441_v35, %v3594_v22  ;;  %v1417_v45 = vsel %vm633_vm5, %v1415_v37, %v1416_v38  ;;  %v1443_v48 = vmul.f32 %v1441_v35, %v3596_v14 }
 0x125   :  { %v1419_v46 = vsel %vm633_vm5, %v1416_v38, %v1418_v39  ;;  %v1421_v47 = vsel %vm633_vm5, %v1418_v39, %v1420_v40  ;;  %v1423_v49 = vsel %vm633_vm5, %v1420_v40, %v1422_v41  ;;  %v1425_v50 = vsel %vm633_vm5, %v1422_v41, %v1424_v42 }
 0x126   :  { %v1427_v51 = vsel %vm633_vm5, %v1424_v42, %v1426_v43  ;;  %v1434_v20 = vadd.f32 %v1417_v45, %v1393_v17  ;;  %v1435_v52 = vadd.f32 %v1419_v46, %v1394_v31  ;;  %v1436_v53 = vadd.f32 %v1421_v47, %v1395_v27  ;;  %v1557_v42 = vld [vmem:[#allocation2 + $0x8] sm:$0xff]  ;;  %v1558_v47 = vld [vmem:[#allocation2 + $0x10] sm:$0xff] }
 0x127   :  { %v1437_v36 = vadd.f32 %v1423_v49, %v1396_v32  ;;  %v1438_v22 = vadd.f32 %v1425_v50, %v1397_v23  ;;  %v1439_v54 = vadd.f32 %v1427_v51, %v1398_v24  ;;  %v1444_v55 = vmul.f32 %v1441_v35, %v3598_v15  ;;  %v1559_v51 = vld [vmem:[#allocation2 + $0x18] sm:$0xff] }
 0x128   :  { %v1445_v56 = vmul.f32 %v1441_v35, %v3600_v16  ;;  %v1446_v57 = vmul.f32 %v1441_v35, %v3602_v18  ;;  %v1447_v58 = vmul.f32 %v1441_v35, %v3604_v19  ;;  %v1448_v59 = vmul.f32 %v1441_v35, %v3606_v29 }
 0x129   :  { %v1456_v60 = vrot.slane %v1442_v44, 7  ;;  %v1457_v61 = vrot.slane %v1443_v48, 7  ;;  %v1459_v62 = vrot.slane %v1444_v55, 7  ;;  %v1482_v1 = vstv %s3823_s5  ;;  %v1562_v55 = vld [vmem:[#allocation2 + $0x30] sm:$0xff]  ;;  %s4165_s5 = sld [smem:[#allocation8 + $0x190]] }
 0x12a   :  { %v1461_v63 = vrot.slane %v1445_v56, 7  ;;  %v1463_v0 = vrot.slane %v1446_v57, 7  ;;  %v1465_v3 = vrot.slane %v1447_v58, 7  ;;  %v1467_v4 = vrot.slane %v1448_v59, 7 }
 0x12b   :  { %v1458_v2 = vsel %vm716_vm6, %v1456_v60, %v1457_v61  ;;  %v1483_v5 = vmul.f32 %v1482_v1, %v3596_v14  ;;  %v1460_v6 = vsel %vm716_vm6, %v1457_v61, %v1459_v62  ;;  %v1484_v27 = vmul.f32 %v1482_v1, %v3598_v15  ;;  %v1563_v60 = vld [vmem:[#allocation2 + $0x38] sm:$0xff] }
 0x12c   :  { %v1462_v7 = vsel %vm716_vm6, %v1459_v62, %v1461_v63  ;;  %v1464_v8 = vsel %vm716_vm6, %v1461_v63, %v1463_v0  ;;  %v1475_v9 = vadd.f32 %v1458_v2, %v1434_v20  ;;  %v1466_v10 = vsel %vm716_vm6, %v1463_v0, %v1465_v3  ;;  %v1574_v62 = vld [vmem:[#allocation2 + $0x40] sm:$0xff] }
 0x12d   :  { %v1468_v11 = vsel %vm716_vm6, %v1465_v3, %v1467_v4  ;;  %v1476_v12 = vadd.f32 %v1460_v6, %v1435_v52  ;;  %v1477_v13 = vadd.f32 %v1462_v7, %v1436_v53  ;;  %v1478_v21 = vadd.f32 %v1464_v8, %v1437_v36  ;;  %v1575_v3 = vld [vmem:[#allocation2 + $0x48] sm:$0xff]  ;;  %v1576_v4 = vld [vmem:[#allocation2 + $0x50] sm:$0xff] }
 0x12e   :  { %v1479_v17 = vadd.f32 %v1466_v10, %v1438_v22  ;;  %v1480_v31 = vadd.f32 %v1468_v11, %v1439_v54  ;;  %v1485_v14 = vmul.f32 %v1482_v1, %v3600_v16  ;;  %v1486_v32 = vmul.f32 %v1482_v1, %v3602_v18  ;;  %v1556_v16 = vld [vmem:[#allocation2] sm:$0xff]  ;;  %v1561_v54 = vld [vmem:[#allocation2 + $0x28] sm:$0xff] }
 0x12f   :  { %v1487_v23 = vmul.f32 %v1482_v1, %v3604_v19  ;;  %v1488_v24 = vmul.f32 %v1482_v1, %v3606_v29  ;;  %v1489_v33 = vmul.f32 %v1482_v1, %v3608_v30  ;;  %v1497_v34 = vrot.slane %v1483_v5, 7  ;;  %v1560_v22 = vld [vmem:[#allocation2 + $0x20] sm:$0xff]  ;;  %v1577_v5 = vld [vmem:[#allocation2 + $0x58] sm:$0xff]  ;;  %v1579_v11 = vld [vmem:[#allocation2 + $0x68] sm:$0xff] }
 0x130   :  { %v1498_v25 = vrot.slane %v1484_v27, 7  ;;  %v1523_v26 = vstv %s3837_s6  ;;  %v1500_v28 = vrot.slane %v1485_v14, 7  ;;  %v1502_v37 = vrot.slane %v1486_v32, 7  ;;  %v1578_v10 = vld [vmem:[#allocation2 + $0x60] sm:$0xff]  ;;  %v1581_v27 = vld [vmem:[#allocation2 + $0x78] sm:$0xff]  ;;  %s4193_s6 = sld [smem:[#allocation8 + $0x181]] }
 0x131   :  { %v1504_v38 = vrot.slane %v1487_v23, 7  ;;  %v1506_v39 = vrot.slane %v1488_v24, 7  ;;  %v1508_v40 = vrot.slane %v1489_v33, 7  ;;  %v1564_v35 = vstv %s3841_s7  ;;  %s4214_s7 = sld [smem:[#allocation8 + $0x189]] }
 0x132   :  { %v1499_v15 = vsel %vm716_vm6, %v1497_v34, %v1498_v25  ;;  %v1582_v41 = vstv %s3844_s8  ;;  %v1501_v18 = vsel %vm716_vm6, %v1498_v25, %v1500_v28  ;;  %v1503_v19 = vsel %vm716_vm6, %v1500_v28, %v1502_v37  ;;  %v1600_v28 = vld [vmem:[#allocation2 + $0x80] sm:$0xff]  ;;  %s4228_s8 = sld [smem:[#allocation8 + $0x182]] }
 0x133   :  { %v1505_v29 = vsel %vm716_vm6, %v1502_v37, %v1504_v38  ;;  %v1507_v30 = vsel %vm716_vm6, %v1504_v38, %v1506_v39  ;;  %v1509_v43 = vsel %vm716_vm6, %v1506_v39, %v1508_v40  ;;  %v1516_v44 = vadd.f32 %v1499_v15, %v1475_v9  ;;  %v1601_v40 = vld [vmem:[#allocation2 + $0x88] sm:$0xff] }
 0x134   :  { %v1517_v45 = vadd.f32 %v1501_v18, %v1476_v12  ;;  %v1518_v46 = vadd.f32 %v1503_v19, %v1477_v13  ;;  %v1519_v48 = vadd.f32 %v1505_v29, %v1478_v21  ;;  %v1520_v49 = vadd.f32 %v1507_v30, %v1479_v17  ;;  %v1580_v12 = vld [vmem:[#allocation2 + $0x70] sm:$0xff]  ;;  %v1603_v18 = vld [vmem:[#allocation2 + $0x98] sm:$0xff] }
 0x135   :  { %v1521_v50 = vadd.f32 %v1509_v43, %v1480_v31  ;;  %v1565_v20 = vmul.f32 %v1564_v35, %v1556_v16  ;;  %v1524_v52 = vadd.f32 %v1523_v26, %v1516_v44  ;;  %v1566_v56 = vmul.f32 %v1564_v35, %v1557_v42  ;;  %v1602_v16 = vld [vmem:[#allocation2 + $0x90] sm:$0xff]  ;;  %v1604_v42 = vld [vmem:[#allocation2 + $0xa0] sm:$0xff]  ;;  %v1605_v43 = vld [vmem:[#allocation2 + $0xa8] sm:$0xff] }
 0x136   :  { %v1525_v53 = vadd.f32 %v1523_v26, %v1517_v45  ;;  %v1526_v36 = vadd.f32 %v1523_v26, %v1518_v46  ;;  %v1527_v57 = vadd.f32 %v1523_v26, %v1519_v48  ;;  %v1528_v58 = vadd.f32 %v1523_v26, %v1520_v49  ;;  %v1606_v44 = vld [vmem:[#allocation2 + $0xb0] sm:$0xff] }
 0x137   :  { %v1529_v59 = vadd.f32 %v1523_v26, %v1521_v50  ;;  %v1567_v61 = vmul.f32 %v1564_v35, %v1558_v47  ;;  %v1530_v63 = vmul.f32 %v1524_v52, %v1524_v52  ;;  %v1568_v2 = vmul.f32 %v1564_v35, %v1559_v51  ;;  %v1607_v47 = vld [vmem:[#allocation2 + $0xb8] sm:$0xff] }
 0x138   :  { %v1531_v0 = vmul.f32 %v1525_v53, %v1525_v53  ;;  %v1532_v1 = vmul.f32 %v1526_v36, %v1526_v36  ;;  %v1533_v6 = vmul.f32 %v1527_v57, %v1527_v57  ;;  %v1534_v7 = vmul.f32 %v1528_v58, %v1528_v58 }
 0x139   :  { %v1535_v8 = vmul.f32 %v1529_v59, %v1529_v59  ;;  %v1569_v9 = vmul.f32 %v1564_v35, %v1560_v22  ;;  %v1570_v21 = vmul.f32 %v1564_v35, %v1561_v54  ;;  %v1571_v17 = vmul.f32 %v1564_v35, %v1562_v55  ;;  %v1626_v54 = vld [vmem:[#allocation2 + $0xc0] sm:$0xff]  ;;  %v1627_v55 = vld [vmem:[#allocation2 + $0xc8] sm:$0xff] }
 0x13a   :  { %v1536_v13 = vadd.f32 %v1531_v0, %v1530_v63  ;;  %v1572_v31 = vmul.f32 %v1564_v35, %v1563_v60  ;;  %v1583_v14 = vmul.f32 %v1582_v41, %v1574_v62  ;;  %v1584_v32 = vmul.f32 %v1582_v41, %v1575_v3  ;;  %v1628_v60 = vld [vmem:[#allocation2 + $0xd0] sm:$0xff]  ;;  %v1630_v62 = vld [vmem:[#allocation2 + $0xe0] sm:$0xff]  ;;  %v1631_v3 = vld [vmem:[#allocation2 + $0xe8] sm:$0xff] }
 0x13b   :  { %v1585_v23 = vmul.f32 %v1582_v41, %v1576_v4  ;;  %v1586_v24 = vmul.f32 %v1582_v41, %v1577_v5  ;;  %v1587_v34 = vmul.f32 %v1582_v41, %v1578_v10  ;;  %v1588_v25 = vmul.f32 %v1582_v41, %v1579_v11  ;;  %v1632_v4 = vld [vmem:[#allocation2 + $0xf0] sm:$0xff]  ;;  %v1633_v5 = vld [vmem:[#allocation2 + $0xf8] sm:$0xff] }
 0x13c   :  { %v1537_v33 = vadd.f32 %v1536_v13, %v1532_v1  ;;  %v1589_v26 = vmul.f32 %v1582_v41, %v1580_v12  ;;  %v1590_v37 = vmul.f32 %v1582_v41, %v1581_v27  ;;  %v1591_v38 = vadd.f32 %v1583_v14, %v1565_v20 }
 0x13d   :  { %v1592_v39 = vadd.f32 %v1584_v32, %v1566_v56  ;;  %v1593_v15 = vadd.f32 %v1585_v23, %v1567_v61  ;;  %v1594_v19 = vadd.f32 %v1586_v24, %v1568_v2  ;;  %v1595_v29 = vadd.f32 %v1587_v34, %v1569_v9  ;;  %v1629_v61 = vld [vmem:[#allocation2 + $0xd8] sm:$0xff] }
 0x13e   :  { %v1538_v35 = vadd.f32 %v1537_v33, %v1533_v6  ;;  %v1596_v30 = vadd.f32 %v1588_v25, %v1570_v21  ;;  %v1597_v45 = vadd.f32 %v1589_v26, %v1571_v17  ;;  %v1598_v46 = vadd.f32 %v1590_v37, %v1572_v31 }
 0x13f   :  { %v1608_v48 = vstv %s3868_s9  ;;  %v1634_v41 = vstv %s3870_s10  ;;  %v1652_v37 = vstv %s3874_s11  ;;  %s4246_s9 = sld [smem:[#allocation8 + $0x18a]]  ;;  %s4254_s10 = sld [smem:[#allocation8 + $0x183]] }
 0x140   :  { %v1539_v49 = vadd.f32 %v1538_v35, %v1534_v7  ;;  %v1609_v50 = vmul.f32 %v1608_v48, %v1600_v28  ;;  %v1610_v51 = vmul.f32 %v1608_v48, %v1601_v40  ;;  %v1611_v20 = vmul.f32 %v1608_v48, %v1602_v16  ;;  %s4276_s11 = sld [smem:[#allocation8 + $0x18b]] }
 0x141   :  { %v1612_v52 = vmul.f32 %v1608_v48, %v1603_v18  ;;  %v1613_v53 = vmul.f32 %v1608_v48, %v1604_v42  ;;  %v1614_v36 = vmul.f32 %v1608_v48, %v1605_v43  ;;  %v1615_v22 = vmul.f32 %v1608_v48, %v1606_v44 }
 0x142   :  { %v1540_v56 = vadd.f32 %v1539_v49, %v1535_v8  ;;  %v1616_v57 = vmul.f32 %v1608_v48, %v1607_v47  ;;  %v1617_v58 = vadd.f32 %v1609_v50, %v1591_v38  ;;  %v1618_v59 = vadd.f32 %v1610_v51, %v1592_v39 }
 0x143   :  { %v1619_v63 = vadd.f32 %v1611_v20, %v1593_v15  ;;  %v1620_v0 = vadd.f32 %v1612_v52, %v1594_v19  ;;  %v1621_v1 = vadd.f32 %v1613_v53, %v1595_v29  ;;  %v1622_v2 = vadd.f32 %v1614_v36, %v1596_v30 }
 0x144   :  { %v1541_v6 = vrot.slane %v1540_v56, 4  ;;  %v1623_v7 = vadd.f32 %v1615_v22, %v1597_v45  ;;  %v1624_v9 = vadd.f32 %v1616_v57, %v1598_v46  ;;  %v1635_v10 = vmul.f32 %v1634_v41, %v1626_v54 }
 0x145   :  { %v1636_v11 = vmul.f32 %v1634_v41, %v1627_v55  ;;  %v1637_v12 = vmul.f32 %v1634_v41, %v1628_v60  ;;  %v1638_v8 = vmul.f32 %v1634_v41, %v1629_v61  ;;  %v1639_v13 = vmul.f32 %v1634_v41, %v1630_v62 }
 0x146   :  { %v1542_v21 = vadd.f32 %v1541_v6, %v1540_v56  ;;  %v1640_v17 = vmul.f32 %v1634_v41, %v1631_v3  ;;  %v1641_v31 = vmul.f32 %v1634_v41, %v1632_v4  ;;  %v1642_v27 = vmul.f32 %v1634_v41, %v1633_v5 }
 0x147   :  { %v3880_v14 = vadd.f32 %v1635_v10, %v1617_v58  ;;  %v3882_v32 = vadd.f32 %v1636_v11, %v1618_v59  ;;  %v3884_v23 = vadd.f32 %v1637_v12, %v1619_v63  ;;  %v3886_v24 = vadd.f32 %v1638_v8, %v1620_v0 }
 0x148   :  { %v1543_v33 = vrot.slane %v1542_v21, 2  ;;  %v3888_v34 = vadd.f32 %v1639_v13, %v1621_v1  ;;  %v3890_v25 = vadd.f32 %v1640_v17, %v1622_v2  ;;  %v3892_v26 = vadd.f32 %v1641_v31, %v1623_v7 }
 0x149   :  { %v3894_v28 = vadd.f32 %v1642_v27, %v1624_v9  ;;  %v1660_v38 = vstv %s3876_s12  ;;  %v1674_v39 = vstv %s3878_s0  ;;  %v1653_v40 = vmul.f32 %v1652_v37, %v3880_v14  ;;  %s4293_s12 = sld [smem:[#allocation8 + $0x184]] }
 0x14a   :  { %v1544_v15 = vadd.f32 %v1543_v33, %v1542_v21  ;;  %v1654_v16 = vmul.f32 %v1652_v37, %v3882_v32  ;;  %v1655_v18 = vmul.f32 %v1652_v37, %v3884_v23  ;;  %v1656_v35 = vmul.f32 %v1652_v37, %v3886_v24  ;;  %s4309_s0 = sld [smem:[#allocation8 + $0x18c]] }
 0x14b   :  { %v1657_v19 = vmul.f32 %v1652_v37, %v3888_v34  ;;  %v1658_v29 = vmul.f32 %v1652_v37, %v3890_v25  ;;  %v1661_v30 = vmul.f32 %v1660_v38, %v3882_v32  ;;  %v1662_v43 = vmul.f32 %v1660_v38, %v3884_v23 }
 0x14c   :  { %v1545_v42 = vrot.slane %v1544_v15, 1  ;;  %v1663_v44 = vmul.f32 %v1660_v38, %v3886_v24  ;;  %v1664_v45 = vmul.f32 %v1660_v38, %v3888_v34  ;;  %v1665_v46 = vmul.f32 %v1660_v38, %v3890_v25 }
 0x14d   :  { %v1666_v47 = vmul.f32 %v1660_v38, %v3892_v26  ;;  %v1667_v48 = vadd.f32 %v1661_v30, %v1653_v40  ;;  %v1675_v41 = vmul.f32 %v1674_v39, %v3884_v23  ;;  %v1668_v50 = vadd.f32 %v1662_v43, %v1654_v16 }
 0x14e   :  { %v1546_v49 = vadd.f32 %v1545_v42, %v1544_v15  ;;  %v1669_v51 = vadd.f32 %v1663_v44, %v1655_v18  ;;  %v1670_v20 = vadd.f32 %v1664_v45, %v1656_v35  ;;  %v1671_v52 = vadd.f32 %v1665_v46, %v1657_v19 }
 0x14f   :  { %v1672_v53 = vadd.f32 %v1666_v47, %v1658_v29  ;;  %v1676_v36 = vmul.f32 %v1674_v39, %v3886_v24  ;;  %v1677_v22 = vmul.f32 %v1674_v39, %v3888_v34  ;;  %v1678_v55 = vmul.f32 %v1674_v39, %v3890_v25 }
 0x150   :  { %v1548_v54 = vmax.f32 %v1546_v49, 1e-07  ;;  %v1679_v56 = vmul.f32 %v1674_v39, %v3892_v26  ;;  %v1680_v57 = vmul.f32 %v1674_v39, %v3894_v28  ;;  %v1681_v58 = vadd.f32 %v1675_v41, %v1667_v48 }
 0x151   :  { %v1682_v59 = vadd.f32 %v1676_v36, %v1668_v50  ;;  %v1683_v60 = vadd.f32 %v1677_v22, %v1669_v51  ;;  %v1688_v61 = vstv %s3899_s13  ;;  %v1684_v63 = vadd.f32 %v1678_v55, %v1670_v20  ;;  %s4323_s13 = sld [smem:[#allocation8 + $0x185]] }
 0x152   :  { %v1549_v62 = vmin.f32 %v1548_v54, 10000.0  ;;  %v1685_v0 = vadd.f32 %v1679_v56, %v1671_v52  ;;  %v1686_v1 = vadd.f32 %v1680_v57, %v1672_v53  ;;  %v1689_v2 = vmul.f32 %v1688_v61, %v3880_v14 }
 0x153   :  { %v1690_v3 = vmul.f32 %v1688_v61, %v3882_v32  ;;  %v1691_v4 = vmul.f32 %v1688_v61, %v3884_v23  ;;  %v1692_v5 = vmul.f32 %v1688_v61, %v3886_v24  ;;  %v1693_v6 = vmul.f32 %v1688_v61, %v3888_v34 }
 0x154   :  { %3145 = vlog2.f32 %v1549_v62  ;;  %v1694_v7 = vmul.f32 %v1688_v61, %v3890_v25  ;;  %v1695_v9 = vmul.f32 %v1688_v61, %v3892_v26  ;;  %v1703_v10 = vrot.slane %v1689_v2, 1 }
 0x155   :  { %v1704_v11 = vrot.slane %v1690_v3, 1  ;;  %v1706_v12 = vrot.slane %v1691_v4, 1  ;;  %v1708_v8 = vrot.slane %v1692_v5, 1  ;;  %v1710_v13 = vrot.slane %v1693_v6, 1 }
 0x156   :  { %v1712_v21 = vrot.slane %v1694_v7, 1  ;;  %v1714_v17 = vrot.slane %v1695_v9, 1  ;;  %v1729_v31 = vstv %s3914_s14  ;;  %v1770_v51 = vstv %s3929_s15  ;;  %s4340_s14 = sld [smem:[#allocation8 + $0x18d]]  ;;  %s4357_s15 = sld [smem:[#allocation8 + $0x186]] }
 0x157   :  { %v1705_v27 = vsel %vm218_vm0, %v1703_v10, %v1704_v11  ;;  %v1707_v33 = vsel %vm218_vm0, %v1704_v11, %v1706_v12  ;;  %v1709_v37 = vsel %vm218_vm0, %v1706_v12, %v1708_v8  ;;  %v1730_v38 = vmul.f32 %v1729_v31, %v3882_v32 }
 0x158   :  { %v1711_v39 = vsel %vm218_vm0, %v1708_v8, %v1710_v13  ;;  %v1713_v15 = vsel %vm218_vm0, %v1710_v13, %v1712_v21  ;;  %v1715_v40 = vsel %vm218_vm0, %v1712_v21, %v1714_v17  ;;  %v1722_v16 = vadd.f32 %v1705_v27, %v1681_v58 }
 0x159   :  { %v1723_v18 = vadd.f32 %v1707_v33, %v1682_v59  ;;  %v1724_v35 = vadd.f32 %v1709_v37, %v1683_v60  ;;  %v1725_v19 = vadd.f32 %v1711_v39, %v1684_v63  ;;  %v1726_v29 = vadd.f32 %v1713_v15, %v1685_v0 }
 0x15a   :  { %v1727_v30 = vadd.f32 %v1715_v40, %v1686_v1  ;;  %v1731_v42 = vmul.f32 %v1729_v31, %v3884_v23  ;;  %v1732_v43 = vmul.f32 %v1729_v31, %v3886_v24  ;;  %v1733_v44 = vmul.f32 %v1729_v31, %v3888_v34 }
 0x15b   :  { %v1734_v45 = vmul.f32 %v1729_v31, %v3890_v25  ;;  %v1735_v46 = vmul.f32 %v1729_v31, %v3892_v26  ;;  %v1736_v47 = vmul.f32 %v1729_v31, %v3894_v28  ;;  %v1744_v48 = vrot.slane %v1730_v38, 1 }
 0x15c   :  { %v1745_v41 = vrot.slane %v1731_v42, 1  ;;  %v1747_v49 = vrot.slane %v1732_v43, 1  ;;  %v1749_v50 = vrot.slane %v1733_v44, 1  ;;  %v1771_v36 = vmul.f32 %v1770_v51, %v3880_v14 }
 0x15d   :  { %v1751_v20 = vrot.slane %v1734_v45, 1  ;;  %v1753_v52 = vrot.slane %v1735_v46, 1  ;;  %v1755_v53 = vrot.slane %v1736_v47, 1  ;;  %v1772_v57 = vmul.f32 %v1770_v51, %v3882_v32 }
 0x15e   :  { %v3146_v22 = vpop.eup %3145  ;;  %v1746_v54 = vsel %vm218_vm0, %v1744_v48, %v1745_v41  ;;  %v1748_v55 = vsel %vm218_vm0, %v1745_v41, %v1747_v49  ;;  %v1750_v56 = vsel %vm218_vm0, %v1747_v49, %v1749_v50  ;;  %v1773_v5 = vmul.f32 %v1770_v51, %v3884_v23 }
 0x15f   :  { %v1551_v58 = vmul.f32 0.6931472, %v3146_v22  ;;  %v1752_v59 = vsel %vm218_vm0, %v1749_v50, %v1751_v20  ;;  %v1754_v60 = vsel %vm218_vm0, %v1751_v20, %v1753_v52  ;;  %v1756_v61 = vsel %vm218_vm0, %v1753_v52, %v1755_v53 }
 0x160   :  { %v1763_v62 = vadd.f32 %v1746_v54, %v1722_v16  ;;  %v1764_v63 = vadd.f32 %v1748_v55, %v1723_v18  ;;  %v1765_v0 = vadd.f32 %v1750_v56, %v1724_v35  ;;  %v1766_v1 = vadd.f32 %v1752_v59, %v1725_v19 }
 0x161   :  { %v1552_v2 = vmul.f32 0.4342945, %v1551_v58  ;;  %v1767_v3 = vadd.f32 %v1754_v60, %v1726_v29  ;;  %v1768_v4 = vadd.f32 %v1756_v61, %v1727_v30  ;;  %v1774_v6 = vmul.f32 %v1770_v51, %v3886_v24 }
 0x162   :  { %v1775_v7 = vmul.f32 %v1770_v51, %v3888_v34  ;;  %v1776_v9 = vmul.f32 %v1770_v51, %v3890_v25  ;;  %v1777_v10 = vmul.f32 %v1770_v51, %v3892_v26  ;;  %v1785_v12 = vrot.slane %v1771_v36, 2 }
 0x163   :  { %v1553_v11 = vmul.f32 10.0, %v1552_v2  ;;  %v1786_v8 = vrot.slane %v1772_v57, 2  ;;  %v1788_v13 = vrot.slane %v1773_v5, 2  ;;  %v1790_v21 = vrot.slane %v1774_v6, 2 }
 0x164   :  { %v1792_v17 = vrot.slane %v1775_v7, 2  ;;  %v1794_v31 = vrot.slane %v1776_v9, 2  ;;  %v1796_v27 = vrot.slane %v1777_v10, 2  ;;  %v1811_v38 = vstv %s3946_s16  ;;  %s4373_s16 = sld [smem:[#allocation8 + $0x18e]] }
 0x165   :  { %1554 = vst [vmem:[#allocation11 + $0x1] sm:$0x1] %v1553_v11  ;;  %v1787_v33 = vsel %vm301_vm1, %v1785_v12, %v1786_v8  ;;  %v1789_v37 = vsel %vm301_vm1, %v1786_v8, %v1788_v13  ;;  %v1852_v39 = vstv %s3949_s17  ;;  %v1791_v15 = vsel %vm301_vm1, %v1788_v13, %v1790_v21  ;;  %s4387_s17 = sld [smem:[#allocation8 + $0x187]] }
 0x166   :  { %v1793_v40 = vsel %vm301_vm1, %v1790_v21, %v1792_v17  ;;  %v1795_v16 = vsel %vm301_vm1, %v1792_v17, %v1794_v31  ;;  %v1797_v18 = vsel %vm301_vm1, %v1794_v31, %v1796_v27  ;;  %v1804_v35 = vadd.f32 %v1787_v33, %v1763_v62 }
 0x167   :  { %v1805_v19 = vadd.f32 %v1789_v37, %v1764_v63  ;;  %v1806_v29 = vadd.f32 %v1791_v15, %v1765_v0  ;;  %v1807_v30 = vadd.f32 %v1793_v40, %v1766_v1  ;;  %v1808_v42 = vadd.f32 %v1795_v16, %v1767_v3 }
 0x168   :  { %v1809_v43 = vadd.f32 %v1797_v18, %v1768_v4  ;;  %v1812_v44 = vmul.f32 %v1811_v38, %v3882_v32  ;;  %v1813_v45 = vmul.f32 %v1811_v38, %v3884_v23  ;;  %v1814_v46 = vmul.f32 %v1811_v38, %v3886_v24 }
 0x169   :  { %v1815_v47 = vmul.f32 %v1811_v38, %v3888_v34  ;;  %v1816_v48 = vmul.f32 %v1811_v38, %v3890_v25  ;;  %v1817_v41 = vmul.f32 %v1811_v38, %v3892_v26  ;;  %v1818_v49 = vmul.f32 %v1811_v38, %v3894_v28 }
 0x16a   :  { %v1826_v50 = vrot.slane %v1812_v44, 2  ;;  %v1827_v51 = vrot.slane %v1813_v45, 2  ;;  %v1853_v20 = vmul.f32 %v1852_v39, %v3880_v14  ;;  %v1829_v52 = vrot.slane %v1814_v46, 2 }
 0x16b   :  { %v1831_v53 = vrot.slane %v1815_v47, 2  ;;  %v1833_v36 = vrot.slane %v1816_v48, 2  ;;  %v1835_v22 = vrot.slane %v1817_v41, 2  ;;  %v1837_v55 = vrot.slane %v1818_v49, 2 }
 0x16c   :  { %v1828_v54 = vsel %vm301_vm1, %v1826_v50, %v1827_v51  ;;  %v1854_v56 = vmul.f32 %v1852_v39, %v3882_v32  ;;  %v1855_v57 = vmul.f32 %v1852_v39, %v3884_v23  ;;  %v1830_v58 = vsel %vm301_vm1, %v1827_v51, %v1829_v52 }
 0x16d   :  { %v1832_v59 = vsel %vm301_vm1, %v1829_v52, %v1831_v53  ;;  %v1834_v60 = vsel %vm301_vm1, %v1831_v53, %v1833_v36  ;;  %v1836_v61 = vsel %vm301_vm1, %v1833_v36, %v1835_v22  ;;  %v1838_v62 = vsel %vm301_vm1, %v1835_v22, %v1837_v55 }
 0x16e   :  { %v1845_v63 = vadd.f32 %v1828_v54, %v1804_v35  ;;  %v1846_v0 = vadd.f32 %v1830_v58, %v1805_v19  ;;  %v1847_v1 = vadd.f32 %v1832_v59, %v1806_v29  ;;  %v1848_v2 = vadd.f32 %v1834_v60, %v1807_v30 }
 0x16f   :  { %v1849_v3 = vadd.f32 %v1836_v61, %v1808_v42  ;;  %v1850_v4 = vadd.f32 %v1838_v62, %v1809_v43  ;;  %v1856_v5 = vmul.f32 %v1852_v39, %v3886_v24  ;;  %v1857_v6 = vmul.f32 %v1852_v39, %v3888_v34 }
 0x170   :  { %v1858_v7 = vmul.f32 %v1852_v39, %v3890_v25  ;;  %v1859_v9 = vmul.f32 %v1852_v39, %v3892_v26  ;;  %v1867_v10 = vrot.slane %v1853_v20, 3  ;;  %v1868_v11 = vrot.slane %v1854_v56, 3 }
 0x171   :  { %v1870_v12 = vrot.slane %v1855_v57, 3  ;;  %v1872_v8 = vrot.slane %v1856_v5, 3  ;;  %v1893_v13 = vstv %s3977_s18  ;;  %v1874_v21 = vrot.slane %v1857_v6, 3  ;;  %s4404_s18 = sld [smem:[#allocation8 + $0x18f]] }
 0x172   :  { %v1876_v17 = vrot.slane %v1858_v7, 3  ;;  %v1878_v31 = vrot.slane %v1859_v9, 3  ;;  %v1894_v27 = vmul.f32 %v1893_v13, %v3882_v32  ;;  %v1869_v33 = vsel %vm384_vm2, %v1867_v10, %v1868_v11 }
 0x173   :  { %v1871_v37 = vsel %vm384_vm2, %v1868_v11, %v1870_v12  ;;  %v1873_v38 = vsel %vm384_vm2, %v1870_v12, %v1872_v8  ;;  %v1895_v39 = vmul.f32 %v1893_v13, %v3884_v23  ;;  %v1875_v15 = vsel %vm384_vm2, %v1872_v8, %v1874_v21 }
 0x174   :  { %v1877_v40 = vsel %vm384_vm2, %v1874_v21, %v1876_v17  ;;  %v1879_v16 = vsel %vm384_vm2, %v1876_v17, %v1878_v31  ;;  %v1886_v18 = vadd.f32 %v1869_v33, %v1845_v63  ;;  %v1887_v35 = vadd.f32 %v1871_v37, %v1846_v0 }
 0x175   :  { %v1888_v19 = vadd.f32 %v1873_v38, %v1847_v1  ;;  %v1889_v29 = vadd.f32 %v1875_v15, %v1848_v2  ;;  %v1890_v30 = vadd.f32 %v1877_v40, %v1849_v3  ;;  %v1891_v42 = vadd.f32 %v1879_v16, %v1850_v4 }
 0x176   :  { %v1896_v43 = vmul.f32 %v1893_v13, %v3886_v24  ;;  %v1897_v44 = vmul.f32 %v1893_v13, %v3888_v34  ;;  %v1898_v45 = vmul.f32 %v1893_v13, %v3890_v25  ;;  %v1899_v46 = vmul.f32 %v1893_v13, %v3892_v26 }
 0x177   :  { %v1900_v47 = vmul.f32 %v1893_v13, %v3894_v28  ;;  %v1908_v48 = vrot.slane %v1894_v27, 3  ;;  %v1909_v41 = vrot.slane %v1895_v39, 3  ;;  %v1934_v20 = vstv %s3993_s19  ;;  %s4422_s19 = sld [smem:[#allocation9 + $0x3]] }
 0x178   :  { %v1911_v49 = vrot.slane %v1896_v43, 3  ;;  %v1913_v50 = vrot.slane %v1897_v44, 3  ;;  %v1915_v51 = vrot.slane %v1898_v45, 3  ;;  %v1917_v53 = vrot.slane %v1899_v46, 3 }
 0x179   :  { %v1910_v52 = vsel %vm384_vm2, %v1908_v48, %v1909_v41  ;;  %v1919_v36 = vrot.slane %v1900_v47, 3  ;;  %v1935_v22 = vmul.f32 %v1934_v20, %v3880_v14  ;;  %v1936_v1 = vmul.f32 %v1934_v20, %v3882_v32 }
 0x17a   :  { %v1912_v54 = vsel %vm384_vm2, %v1909_v41, %v1911_v49  ;;  %v1914_v55 = vsel %vm384_vm2, %v1911_v49, %v1913_v50  ;;  %v1916_v56 = vsel %vm384_vm2, %v1913_v50, %v1915_v51  ;;  %v1927_v57 = vadd.f32 %v1910_v52, %v1886_v18 }
 0x17b   :  { %v1918_v58 = vsel %vm384_vm2, %v1915_v51, %v1917_v53  ;;  %v1920_v59 = vsel %vm384_vm2, %v1917_v53, %v1919_v36  ;;  %v1928_v60 = vadd.f32 %v1912_v54, %v1887_v35  ;;  %v1929_v61 = vadd.f32 %v1914_v55, %v1888_v19 }
 0x17c   :  { %v1930_v62 = vadd.f32 %v1916_v56, %v1889_v29  ;;  %v1931_v63 = vadd.f32 %v1918_v58, %v1890_v30  ;;  %v1932_v0 = vadd.f32 %v1920_v59, %v1891_v42  ;;  %v1937_v2 = vmul.f32 %v1934_v20, %v3884_v23 }
 0x17d   :  { %v1938_v3 = vmul.f32 %v1934_v20, %v3886_v24  ;;  %v1939_v4 = vmul.f32 %v1934_v20, %v3888_v34  ;;  %v1940_v5 = vmul.f32 %v1934_v20, %v3890_v25  ;;  %v1941_v6 = vmul.f32 %v1934_v20, %v3892_v26 }
 0x17e   :  { %v1949_v7 = vrot.slane %v1935_v22, 4  ;;  %v1950_v9 = vrot.slane %v1936_v1, 4  ;;  %v1975_v10 = vstv %s4007_s1  ;;  %v1952_v11 = vrot.slane %v1937_v2, 4  ;;  %s3245_s1 = smov [#allocation11]  }
 0x17f   :  { %v1954_v12 = vrot.slane %v1938_v3, 4  ;;  %v1956_v8 = vrot.slane %v1939_v4, 4  ;;  %v1958_v13 = vrot.slane %v1940_v5, 4  ;;  %v1960_v17 = vrot.slane %v1941_v6, 4 }
 0x180   :  { %v1951_v21 = vsel %vm467_vm3, %v1949_v7, %v1950_v9  ;;  %v1976_v31 = vmul.f32 %v1975_v10, %v3882_v32  ;;  %v1977_v27 = vmul.f32 %v1975_v10, %v3884_v23  ;;  %v1953_v33 = vsel %vm467_vm3, %v1950_v9, %v1952_v11 }
 0x181   :  { %v1955_v37 = vsel %vm467_vm3, %v1952_v11, %v1954_v12  ;;  %v1957_v38 = vsel %vm467_vm3, %v1954_v12, %v1956_v8  ;;  %v1959_v39 = vsel %vm467_vm3, %v1956_v8, %v1958_v13  ;;  %v1961_v15 = vsel %vm467_vm3, %v1958_v13, %v1960_v17 }
 0x182   :  { %v1968_v40 = vadd.f32 %v1951_v21, %v1927_v57  ;;  %v1969_v16 = vadd.f32 %v1953_v33, %v1928_v60  ;;  %v1970_v18 = vadd.f32 %v1955_v37, %v1929_v61  ;;  %v1971_v35 = vadd.f32 %v1957_v38, %v1930_v62 }
 0x183   :  { %v1972_v19 = vadd.f32 %v1959_v39, %v1931_v63  ;;  %v1973_v29 = vadd.f32 %v1961_v15, %v1932_v0  ;;  %v1978_v30 = vmul.f32 %v1975_v10, %v3886_v24  ;;  %v1979_v42 = vmul.f32 %v1975_v10, %v3888_v34 }
 0x184   :  { %v1980_v43 = vmul.f32 %v1975_v10, %v3890_v25  ;;  %v1981_v44 = vmul.f32 %v1975_v10, %v3892_v26  ;;  %v1982_v45 = vmul.f32 %v1975_v10, %v3894_v28  ;;  %v1990_v46 = vrot.slane %v1976_v31, 4 }
 0x185   :  { %v1991_v47 = vrot.slane %v1977_v27, 4  ;;  %v1993_v48 = vrot.slane %v1978_v30, 4  ;;  %v2016_v41 = vstv %s4024_s2  ;;  %v1995_v49 = vrot.slane %v1979_v42, 4  ;;  %s3039_s2 = sshll.u32 %s3245_s1, 4  ;;  %s3040_s2 = int_to_ptr.vmem [resolvable:$true] %s3039_s2 }
 0x186   :  { %v1997_v50 = vrot.slane %v1980_v43, 4  ;;  %v1999_v51 = vrot.slane %v1981_v44, 4  ;;  %v2001_v20 = vrot.slane %v1982_v45, 4  ;;  %v2017_v36 = vmul.f32 %v2016_v41, %v3880_v14  ;;  %p3212_p8 = scmp.lt.s32.totalorder %s3040_s2, %s3040_s2 }
 0x187   :  { %v1992_v52 = vsel %vm467_vm3, %v1990_v46, %v1991_v47  ;;  %v1994_v53 = vsel %vm467_vm3, %v1991_v47, %v1993_v48  ;;  %v2018_v22 = vmul.f32 %v2016_v41, %v3882_v32  ;;  %v1996_v54 = vsel %vm467_vm3, %v1993_v48, %v1995_v49 }
 0x188   :  { %v1998_v55 = vsel %vm467_vm3, %v1995_v49, %v1997_v50  ;;  %v2000_v56 = vsel %vm467_vm3, %v1997_v50, %v1999_v51  ;;  %v2002_v57 = vsel %vm467_vm3, %v1999_v51, %v2001_v20  ;;  %v2009_v58 = vadd.f32 %v1992_v52, %v1968_v40 }
 0x189   :  { %v2010_v59 = vadd.f32 %v1994_v53, %v1969_v16  ;;  %v2011_v60 = vadd.f32 %v1996_v54, %v1970_v18  ;;  %v2012_v61 = vadd.f32 %v1998_v55, %v1971_v35  ;;  %v2013_v62 = vadd.f32 %v2000_v56, %v1972_v19 }
 0x18a   :  { %v2014_v63 = vadd.f32 %v2002_v57, %v1973_v29  ;;  %v2019_v0 = vmul.f32 %v2016_v41, %v3884_v23  ;;  %v2020_v1 = vmul.f32 %v2016_v41, %v3886_v24  ;;  %v2021_v2 = vmul.f32 %v2016_v41, %v3888_v34 }
 0x18b   :  { %v2022_v3 = vmul.f32 %v2016_v41, %v3890_v25  ;;  %v2023_v4 = vmul.f32 %v2016_v41, %v3892_v26  ;;  %v2031_v5 = vrot.slane %v2017_v36, 5  ;;  %v2032_v6 = vrot.slane %v2018_v22, 5 }
 0x18c   :  { %v2034_v7 = vrot.slane %v2019_v0, 5  ;;  %v2036_v9 = vrot.slane %v2020_v1, 5  ;;  %v2057_v10 = vstv %s4041_s3  ;;  %v2038_v11 = vrot.slane %v2021_v2, 5  ;;  %s3207_s3 = scalar_lea.vmem %s3040_s2, 64 }
 0x18d   :  { %v2040_v12 = vrot.slane %v2022_v3, 5  ;;  %v2042_v8 = vrot.slane %v2023_v4, 5  ;;  %v2058_v13 = vmul.f32 %v2057_v10, %v3882_v32  ;;  %v2033_v21 = vsel %vm550_vm4, %v2031_v5, %v2032_v6  ;;  %p3208_p7 = scmp.ne.s32.totalorder %s3040_s2, %s3207_s3  ;;  %p3213_p9 = scmp.lt.s32.totalorder %s3207_s3, %s3207_s3 }
 0x18e   :  { %v2035_v17 = vsel %vm550_vm4, %v2032_v6, %v2034_v7  ;;  %v2037_v31 = vsel %vm550_vm4, %v2034_v7, %v2036_v9  ;;  %v2059_v27 = vmul.f32 %v2057_v10, %v3884_v23  ;;  %v2039_v33 = vsel %vm550_vm4, %v2036_v9, %v2038_v11 }
 0x18f   :  { %v2041_v37 = vsel %vm550_vm4, %v2038_v11, %v2040_v12  ;;  %v2043_v38 = vsel %vm550_vm4, %v2040_v12, %v2042_v8  ;;  %v2050_v39 = vadd.f32 %v2033_v21, %v2009_v58  ;;  %v2051_v15 = vadd.f32 %v2035_v17, %v2010_v59  ;;  %p3214_p10 = por %p3213_p9, %p3212_p8 }
 0x190   :  { %v2052_v40 = vadd.f32 %v2037_v31, %v2011_v60  ;;  %v2053_v16 = vadd.f32 %v2039_v33, %v2012_v61  ;;  %v2054_v18 = vadd.f32 %v2041_v37, %v2013_v62  ;;  %v2055_v35 = vadd.f32 %v2043_v38, %v2014_v63 }
 0x191   :  { %v2060_v19 = vmul.f32 %v2057_v10, %v3886_v24  ;;  %v2061_v29 = vmul.f32 %v2057_v10, %v3888_v34  ;;  %v2062_v30 = vmul.f32 %v2057_v10, %v3890_v25  ;;  %v2063_v42 = vmul.f32 %v2057_v10, %v3892_v26  ;;  %p3215_p11 = pnand %p3214_p10, %p3208_p7 }
 0x192   :  { %v2064_v43 = vmul.f32 %v2057_v10, %v3894_v28  ;;  %v2072_v44 = vrot.slane %v2058_v13, 5  ;;  %v2073_v45 = vrot.slane %v2059_v27, 5  ;;  %v2098_v41 = vstv %s4057_s20 }
 0x193   :  { %v2075_v46 = vrot.slane %v2060_v19, 5  ;;  %v2077_v47 = vrot.slane %v2061_v29, 5  ;;  %v2079_v48 = vrot.slane %v2062_v30, 5  ;;  %v2081_v50 = vrot.slane %v2063_v42, 5 }
 0x194   :  { %v2074_v49 = vsel %vm550_vm4, %v2072_v44, %v2073_v45  ;;  %v2083_v51 = vrot.slane %v2064_v43, 5  ;;  %v2099_v20 = vmul.f32 %v2098_v41, %v3880_v14  ;;  %v2100_v61 = vmul.f32 %v2098_v41, %v3882_v32 }
 0x195   :  { %v2076_v52 = vsel %vm550_vm4, %v2073_v45, %v2075_v46  ;;  %v2078_v53 = vsel %vm550_vm4, %v2075_v46, %v2077_v47  ;;  %v2080_v36 = vsel %vm550_vm4, %v2077_v47, %v2079_v48  ;;  %v2091_v22 = vadd.f32 %v2074_v49, %v2050_v39 }
 0x196   :  { %v2082_v54 = vsel %vm550_vm4, %v2079_v48, %v2081_v50  ;;  %v2084_v55 = vsel %vm550_vm4, %v2081_v50, %v2083_v51  ;;  %v2092_v56 = vadd.f32 %v2076_v52, %v2051_v15  ;;  %v2093_v57 = vadd.f32 %v2078_v53, %v2052_v40 }
 0x197   :  { %v2094_v58 = vadd.f32 %v2080_v36, %v2053_v16  ;;  %v2095_v59 = vadd.f32 %v2082_v54, %v2054_v18  ;;  %v2096_v60 = vadd.f32 %v2084_v55, %v2055_v35  ;;  %v2101_v62 = vmul.f32 %v2098_v41, %v3884_v23 }
 0x198   :  { %v2102_v63 = vmul.f32 %v2098_v41, %v3886_v24  ;;  %v2103_v0 = vmul.f32 %v2098_v41, %v3888_v34  ;;  %v2104_v1 = vmul.f32 %v2098_v41, %v3890_v25  ;;  %v2105_v2 = vmul.f32 %v2098_v41, %v3892_v26 }
 0x199   :  { %v2113_v3 = vrot.slane %v2099_v20, 6  ;;  %v2114_v4 = vrot.slane %v2100_v61, 6  ;;  %v2139_v5 = vstv %s4071_s21  ;;  %v2116_v6 = vrot.slane %v2101_v62, 6 }
 0x19a   :  { %v2118_v7 = vrot.slane %v2102_v63, 6  ;;  %v2120_v9 = vrot.slane %v2103_v0, 6  ;;  %v2122_v10 = vrot.slane %v2104_v1, 6  ;;  %v2124_v12 = vrot.slane %v2105_v2, 6 }
 0x19b   :  { %v2115_v11 = vsel %vm633_vm5, %v2113_v3, %v2114_v4  ;;  %v2140_v8 = vmul.f32 %v2139_v5, %v3882_v32  ;;  %v2141_v13 = vmul.f32 %v2139_v5, %v3884_v23  ;;  %v2117_v21 = vsel %vm633_vm5, %v2114_v4, %v2116_v6 }
 0x19c   :  { %v2119_v17 = vsel %vm633_vm5, %v2116_v6, %v2118_v7  ;;  %v2121_v31 = vsel %vm633_vm5, %v2118_v7, %v2120_v9  ;;  %v2123_v27 = vsel %vm633_vm5, %v2120_v9, %v2122_v10  ;;  %v2125_v33 = vsel %vm633_vm5, %v2122_v10, %v2124_v12 }
 0x19d   :  { %v2132_v37 = vadd.f32 %v2115_v11, %v2091_v22  ;;  %v2133_v38 = vadd.f32 %v2117_v21, %v2092_v56  ;;  %v2134_v39 = vadd.f32 %v2119_v17, %v2093_v57  ;;  %v2135_v15 = vadd.f32 %v2121_v31, %v2094_v58 }
 0x19e   :  { %v2136_v40 = vadd.f32 %v2123_v27, %v2095_v59  ;;  %v2137_v16 = vadd.f32 %v2125_v33, %v2096_v60  ;;  %v2142_v18 = vmul.f32 %v2139_v5, %v3886_v24  ;;  %v2143_v35 = vmul.f32 %v2139_v5, %v3888_v34 }
 0x19f   :  { %v2144_v19 = vmul.f32 %v2139_v5, %v3890_v25  ;;  %v2145_v29 = vmul.f32 %v2139_v5, %v3892_v26  ;;  %v2146_v30 = vmul.f32 %v2139_v5, %v3894_v28  ;;  %v2154_v42 = vrot.slane %v2140_v8, 6 }
 0x1a0   :  { %v2155_v43 = vrot.slane %v2141_v13, 6  ;;  %v2157_v44 = vrot.slane %v2142_v18, 6  ;;  %v2180_v45 = vstv %s4088_s22  ;;  %v2159_v46 = vrot.slane %v2143_v35, 6 }
 0x1a1   :  { %v2161_v47 = vrot.slane %v2144_v19, 6  ;;  %v2163_v48 = vrot.slane %v2145_v29, 6  ;;  %v2165_v41 = vrot.slane %v2146_v30, 6  ;;  %v2181_v51 = vmul.f32 %v2180_v45, %v3880_v14 }
 0x1a2   :  { %v2156_v49 = vsel %vm633_vm5, %v2154_v42, %v2155_v43  ;;  %v2158_v50 = vsel %vm633_vm5, %v2155_v43, %v2157_v44  ;;  %v2182_v20 = vmul.f32 %v2180_v45, %v3882_v32  ;;  %v2160_v52 = vsel %vm633_vm5, %v2157_v44, %v2159_v46 }
 0x1a3   :  { %v2162_v53 = vsel %vm633_vm5, %v2159_v46, %v2161_v47  ;;  %v2164_v36 = vsel %vm633_vm5, %v2161_v47, %v2163_v48  ;;  %v2166_v22 = vsel %vm633_vm5, %v2163_v48, %v2165_v41  ;;  %v2173_v54 = vadd.f32 %v2156_v49, %v2132_v37  ;;  %v2296_v47 = vld [vmem:[#allocation2 + $0x8] sm:$0xff] }
 0x1a4   :  { %v2174_v55 = vadd.f32 %v2158_v50, %v2133_v38  ;;  %v2175_v56 = vadd.f32 %v2160_v52, %v2134_v39  ;;  %v2176_v57 = vadd.f32 %v2162_v53, %v2135_v15  ;;  %v2177_v58 = vadd.f32 %v2164_v36, %v2136_v40  ;;  %v2297_v36 = vld [vmem:[#allocation2 + $0x10] sm:$0xff] }
 0x1a5   :  { %v2178_v59 = vadd.f32 %v2166_v22, %v2137_v16  ;;  %v2183_v60 = vmul.f32 %v2180_v45, %v3884_v23  ;;  %v2184_v14 = vmul.f32 %v2180_v45, %v3886_v24  ;;  %v2185_v61 = vmul.f32 %v2180_v45, %v3888_v34  ;;  %v2298_v22 = vld [vmem:[#allocation2 + $0x18] sm:$0xff] }
 0x1a6   :  { %v2186_v62 = vmul.f32 %v2180_v45, %v3890_v25  ;;  %v2187_v63 = vmul.f32 %v2180_v45, %v3892_v26  ;;  %v2195_v0 = vrot.slane %v2181_v51, 7  ;;  %v2196_v1 = vrot.slane %v2182_v20, 7 }
 0x1a7   :  { %v2198_v2 = vrot.slane %v2183_v60, 7  ;;  %v2200_v3 = vrot.slane %v2184_v14, 7  ;;  %v2221_v4 = vstv %s4105_s23  ;;  %v2202_v5 = vrot.slane %v2185_v61, 7 }
 0x1a8   :  { %v2204_v6 = vrot.slane %v2186_v62, 7  ;;  %v2206_v7 = vrot.slane %v2187_v63, 7  ;;  %v2222_v9 = vmul.f32 %v2221_v4, %v3882_v32  ;;  %v2197_v10 = vsel %vm716_vm6, %v2195_v0, %v2196_v1  ;;  %v2300_v62 = vld [vmem:[#allocation2 + $0x28] sm:$0xff]  ;;  %v2301_v63 = vld [vmem:[#allocation2 + $0x30] sm:$0xff]  ;;  %v2302_v0 = vld [vmem:[#allocation2 + $0x38] sm:$0xff] }
 0x1a9   :  { %v2199_v11 = vsel %vm716_vm6, %v2196_v1, %v2198_v2  ;;  %v2201_v12 = vsel %vm716_vm6, %v2198_v2, %v2200_v3  ;;  %v2223_v8 = vmul.f32 %v2221_v4, %v3884_v23  ;;  %v2203_v13 = vsel %vm716_vm6, %v2200_v3, %v2202_v5 }
 0x1aa   :  { %v2205_v21 = vsel %vm716_vm6, %v2202_v5, %v2204_v6  ;;  %v2207_v17 = vsel %vm716_vm6, %v2204_v6, %v2206_v7  ;;  %v2214_v31 = vadd.f32 %v2197_v10, %v2173_v54  ;;  %v2215_v27 = vadd.f32 %v2199_v11, %v2174_v55  ;;  %v2313_v5 = vld [vmem:[#allocation2 + $0x40] sm:$0xff]  ;;  %v2314_v11 = vld [vmem:[#allocation2 + $0x48] sm:$0xff] }
 0x1ab   :  { %v2216_v33 = vadd.f32 %v2201_v12, %v2175_v56  ;;  %v2217_v37 = vadd.f32 %v2203_v13, %v2176_v57  ;;  %v2218_v32 = vadd.f32 %v2205_v21, %v2177_v58  ;;  %v2219_v38 = vadd.f32 %v2207_v17, %v2178_v59  ;;  %v2299_v56 = vld [vmem:[#allocation2 + $0x20] sm:$0xff]  ;;  %v2315_v12 = vld [vmem:[#allocation2 + $0x50] sm:$0xff] }
 0x1ac   :  { %v2224_v39 = vmul.f32 %v2221_v4, %v3886_v24  ;;  %v2225_v15 = vmul.f32 %v2221_v4, %v3888_v34  ;;  %v2226_v23 = vmul.f32 %v2221_v4, %v3890_v25  ;;  %v2227_v40 = vmul.f32 %v2221_v4, %v3892_v26 }
 0x1ad   :  { %v2228_v16 = vmul.f32 %v2221_v4, %v3894_v28  ;;  %v2236_v18 = vrot.slane %v2222_v9, 7  ;;  %v2237_v35 = vrot.slane %v2223_v8, 7  ;;  %v2262_v42 = vstv %s4121_s24  ;;  %v2295_v28 = vld [vmem:[#allocation2] sm:$0xff]  ;;  %v2316_v8 = vld [vmem:[#allocation2 + $0x58] sm:$0xff] }
 0x1ae   :  { %v2239_v19 = vrot.slane %v2224_v39, 7  ;;  %v2241_v29 = vrot.slane %v2225_v15, 7  ;;  %v2243_v30 = vrot.slane %v2226_v23, 7  ;;  %v2245_v44 = vrot.slane %v2227_v40, 7 }
 0x1af   :  { %v2238_v43 = vsel %vm716_vm6, %v2236_v18, %v2237_v35  ;;  %v2247_v45 = vrot.slane %v2228_v16, 7  ;;  %v2303_v46 = vstv %s4124_s25  ;;  %v2347_v39 = vstv %s4144_s27 }
 0x1b0   :  { %v2240_v24 = vsel %vm716_vm6, %v2237_v35, %v2239_v19  ;;  %v2242_v34 = vsel %vm716_vm6, %v2239_v19, %v2241_v29  ;;  %v2244_v25 = vsel %vm716_vm6, %v2241_v29, %v2243_v30  ;;  %v2255_v26 = vadd.f32 %v2238_v43, %v2214_v31  ;;  %v2339_v43 = vld [vmem:[#allocation2 + $0x80] sm:$0xff] }
 0x1b1   :  { %v2246_v48 = vsel %vm716_vm6, %v2243_v30, %v2245_v44  ;;  %v2248_v41 = vsel %vm716_vm6, %v2245_v44, %v2247_v45  ;;  %v2256_v49 = vadd.f32 %v2240_v24, %v2215_v27  ;;  %v2257_v50 = vadd.f32 %v2242_v34, %v2216_v33  ;;  %v2317_v27 = vld [vmem:[#allocation2 + $0x60] sm:$0xff]  ;;  %v2318_v33 = vld [vmem:[#allocation2 + $0x68] sm:$0xff] }
 0x1b2   :  { %v2258_v51 = vadd.f32 %v2244_v25, %v2217_v37  ;;  %v2259_v20 = vadd.f32 %v2246_v48, %v2218_v32  ;;  %v2260_v52 = vadd.f32 %v2248_v41, %v2219_v38  ;;  %v2263_v53 = vadd.f32 %v2262_v42, %v2255_v26  ;;  %v2319_v37 = vld [vmem:[#allocation2 + $0x70] sm:$0xff]  ;;  %v2320_v32 = vld [vmem:[#allocation2 + $0x78] sm:$0xff]  ;;  %v2340_v44 = vld [vmem:[#allocation2 + $0x88] sm:$0xff] }
 0x1b3   :  { %v2264_v54 = vadd.f32 %v2262_v42, %v2256_v49  ;;  %v2265_v55 = vadd.f32 %v2262_v42, %v2257_v50  ;;  %v2304_v57 = vmul.f32 %v2303_v46, %v2295_v28  ;;  %v2305_v58 = vmul.f32 %v2303_v46, %v2296_v47  ;;  %v2341_v25 = vld [vmem:[#allocation2 + $0x90] sm:$0xff]  ;;  %v2342_v26 = vld [vmem:[#allocation2 + $0x98] sm:$0xff]  ;;  %v2343_v28 = vld [vmem:[#allocation2 + $0xa0] sm:$0xff] }
 0x1b4   :  { %v2266_v59 = vadd.f32 %v2262_v42, %v2258_v51  ;;  %v2267_v60 = vadd.f32 %v2262_v42, %v2259_v20  ;;  %v2268_v14 = vadd.f32 %v2262_v42, %v2260_v52  ;;  %v2269_v61 = vmul.f32 %v2263_v53, %v2263_v53  ;;  %v2344_v50 = vld [vmem:[#allocation2 + $0xa8] sm:$0xff]  ;;  %v2345_v51 = vld [vmem:[#allocation2 + $0xb0] sm:$0xff]  ;;  %v2346_v20 = vld [vmem:[#allocation2 + $0xb8] sm:$0xff] }
 0x1b5   :  { %v2270_v1 = vmul.f32 %v2264_v54, %v2264_v54  ;;  %v2271_v2 = vmul.f32 %v2265_v55, %v2265_v55  ;;  %v2306_v3 = vmul.f32 %v2303_v46, %v2297_v36  ;;  %v2307_v4 = vmul.f32 %v2303_v46, %v2298_v22 }
 0x1b6   :  { %v2272_v6 = vmul.f32 %v2266_v59, %v2266_v59  ;;  %v2273_v7 = vmul.f32 %v2267_v60, %v2267_v60  ;;  %v2274_v9 = vmul.f32 %v2268_v14, %v2268_v14  ;;  %v2308_v10 = vmul.f32 %v2303_v46, %v2299_v56 }
 0x1b7   :  { %v2275_v13 = vadd.f32 %v2270_v1, %v2269_v61  ;;  %v2309_v21 = vmul.f32 %v2303_v46, %v2300_v62  ;;  %v2310_v17 = vmul.f32 %v2303_v46, %v2301_v63  ;;  %v2311_v31 = vmul.f32 %v2303_v46, %v2302_v0  ;;  %v2365_v61 = vld [vmem:[#allocation2 + $0xc0] sm:$0xff]  ;;  %v2366_v62 = vld [vmem:[#allocation2 + $0xc8] sm:$0xff]  ;;  %v2367_v63 = vld [vmem:[#allocation2 + $0xd0] sm:$0xff] }
 0x1b8   :  { %v2321_v38 = vstv %s4142_s26  ;;  %v4158_v15 = vstv %s4149_s28  ;;  %v4161_v23 = vstv %s4151_s29  ;;  %v2348_v22 = vmul.f32 %v2347_v39, %v2339_v43 }
 0x1b9   :  { %v2276_v40 = vadd.f32 %v2275_v13, %v2271_v2  ;;  %v2322_v16 = vmul.f32 %v2321_v38, %v2313_v5  ;;  %v2323_v18 = vmul.f32 %v2321_v38, %v2314_v11  ;;  %v2324_v35 = vmul.f32 %v2321_v38, %v2315_v12  ;;  %v2369_v5 = vld [vmem:[#allocation2 + $0xe0] sm:$0xff]  ;;  %v2371_v12 = vld [vmem:[#allocation2 + $0xf0] sm:$0xff] }
 0x1ba   :  { %v2325_v19 = vmul.f32 %v2321_v38, %v2316_v8  ;;  %v2326_v29 = vmul.f32 %v2321_v38, %v2317_v27  ;;  %v2327_v30 = vmul.f32 %v2321_v38, %v2318_v33  ;;  %v2328_v42 = vmul.f32 %v2321_v38, %v2319_v37  ;;  %v2372_v8 = vld [vmem:[#allocation2 + $0xf8] sm:$0xff] }
 0x1bb   :  { %v2277_v45 = vadd.f32 %v2276_v40, %v2272_v6  ;;  %v2329_v46 = vmul.f32 %v2321_v38, %v2320_v32  ;;  %v2330_v24 = vadd.f32 %v2322_v16, %v2304_v57  ;;  %v2331_v34 = vadd.f32 %v2323_v18, %v2305_v58  ;;  %v2370_v6 = vld [vmem:[#allocation2 + $0xe8] sm:$0xff] }
 0x1bc   :  { %v2332_v47 = vadd.f32 %v2324_v35, %v2306_v3  ;;  %v2333_v48 = vadd.f32 %v2325_v19, %v2307_v4  ;;  %v2334_v41 = vadd.f32 %v2326_v29, %v2308_v10  ;;  %v2335_v49 = vadd.f32 %v2327_v30, %v2309_v21  ;;  %v2368_v4 = vld [vmem:[#allocation2 + $0xd8] sm:$0xff] }
 0x1bd   :  { %v2278_v52 = vadd.f32 %v2277_v45, %v2273_v7  ;;  %v2336_v53 = vadd.f32 %v2328_v42, %v2310_v17  ;;  %v2337_v36 = vadd.f32 %v2329_v46, %v2311_v31  ;;  %v2349_v54 = vmul.f32 %v2347_v39, %v2340_v44 }
 0x1be   :  { %v2350_v55 = vmul.f32 %v2347_v39, %v2341_v25  ;;  %v2351_v56 = vmul.f32 %v2347_v39, %v2342_v26  ;;  %v2352_v59 = vmul.f32 %v2347_v39, %v2343_v28  ;;  %v2353_v58 = vmul.f32 %v2347_v39, %v2344_v50 }
 0x1bf   :  { %v2279_v57 = vadd.f32 %v2278_v52, %v2274_v9  ;;  %v2354_v60 = vmul.f32 %v2347_v39, %v2345_v51  ;;  %v2355_v14 = vmul.f32 %v2347_v39, %v2346_v20  ;;  %v2356_v0 = vadd.f32 %v2348_v22, %v2330_v24 }
 0x1c0   :  { %v2357_v1 = vadd.f32 %v2349_v54, %v2331_v34  ;;  %v2358_v2 = vadd.f32 %v2350_v55, %v2332_v47  ;;  %v2359_v3 = vadd.f32 %v2351_v56, %v2333_v48  ;;  %v2360_v10 = vadd.f32 %v2352_v59, %v2334_v41 }
 0x1c1   :  { %v2280_v7 = vrot.slane %v2279_v57, 4  ;;  %v2361_v9 = vadd.f32 %v2353_v58, %v2335_v49  ;;  %v2362_v11 = vadd.f32 %v2354_v60, %v2336_v53  ;;  %v2363_v13 = vadd.f32 %v2355_v14, %v2337_v36 }
 0x1c2   :  { %v2374_v21 = vmul.f32 %v4158_v15, %v2365_v61  ;;  %v2375_v17 = vmul.f32 %v4158_v15, %v2366_v62  ;;  %v2376_v31 = vmul.f32 %v4158_v15, %v2367_v63  ;;  %v2377_v33 = vmul.f32 %v4158_v15, %v2368_v4 }
 0x1c3   :  { %v2281_v27 = vadd.f32 %v2280_v7, %v2279_v57  ;;  %v2378_v37 = vmul.f32 %v4158_v15, %v2369_v5  ;;  %v2379_v32 = vmul.f32 %v4158_v15, %v2370_v6  ;;  %v2380_v38 = vmul.f32 %v4158_v15, %v2371_v12 }
 0x1c4   :  { %v2381_v39 = vmul.f32 %v4158_v15, %v2372_v8  ;;  %v4175_v40 = vadd.f32 %v2374_v21, %v2356_v0  ;;  %v4177_v16 = vadd.f32 %v2375_v17, %v2357_v1  ;;  %v4179_v35 = vadd.f32 %v2376_v31, %v2358_v2 }
 0x1c5   :  { %v2282_v18 = vrot.slane %v2281_v27, 2  ;;  %v4181_v19 = vadd.f32 %v2377_v33, %v2359_v3  ;;  %v4183_v29 = vadd.f32 %v2378_v37, %v2360_v10  ;;  %v4185_v30 = vadd.f32 %v2379_v32, %v2361_v9 }
 0x1c6   :  { %v4187_v42 = vadd.f32 %v2380_v38, %v2362_v11  ;;  %v4189_v43 = vadd.f32 %v2381_v39, %v2363_v13  ;;  %v2392_v15 = vmul.f32 %v4161_v23, %v4175_v40  ;;  %v2393_v45 = vmul.f32 %v4161_v23, %v4177_v16 }
 0x1c7   :  { %v2283_v44 = vadd.f32 %v2282_v18, %v2281_v27  ;;  %v2394_v46 = vmul.f32 %v4161_v23, %v4179_v35  ;;  %v2395_v24 = vmul.f32 %v4161_v23, %v4181_v19  ;;  %v2396_v34 = vmul.f32 %v4161_v23, %v4183_v29 }
 0x1c8   :  { %v2397_v25 = vmul.f32 %v4161_v23, %v4185_v30  ;;  %v2399_v26 = vstv %s4163_s30  ;;  %v2413_v28 = vstv %s4165_s5  ;;  %v2427_v62 = vstv %s4193_s6 }
 0x1c9   :  { %v2284_v47 = vrot.slane %v2283_v44, 1  ;;  %v2400_v48 = vmul.f32 %v2399_v26, %v4177_v16  ;;  %v2401_v41 = vmul.f32 %v2399_v26, %v4179_v35  ;;  %v2402_v49 = vmul.f32 %v2399_v26, %v4181_v19 }
 0x1ca   :  { %v2403_v50 = vmul.f32 %v2399_v26, %v4183_v29  ;;  %v2404_v51 = vmul.f32 %v2399_v26, %v4185_v30  ;;  %v2405_v20 = vmul.f32 %v2399_v26, %v4187_v42  ;;  %v2414_v52 = vmul.f32 %v2413_v28, %v4179_v35 }
 0x1cb   :  { %v2285_v53 = vadd.f32 %v2284_v47, %v2283_v44  ;;  %v2406_v23 = vadd.f32 %v2400_v48, %v2392_v15  ;;  %v2407_v36 = vadd.f32 %v2401_v41, %v2393_v45  ;;  %v2408_v22 = vadd.f32 %v2402_v49, %v2394_v46 }
 0x1cc   :  { %v2409_v54 = vadd.f32 %v2403_v50, %v2395_v24  ;;  %v2415_v55 = vmul.f32 %v2413_v28, %v4181_v19  ;;  %v2410_v59 = vadd.f32 %v2404_v51, %v2396_v34  ;;  %v2416_v57 = vmul.f32 %v2413_v28, %v4183_v29 }
 0x1cd   :  { %v2287_v56 = vmax.f32 %v2285_v53, 1e-07  ;;  %v2417_v58 = vmul.f32 %v2413_v28, %v4185_v30  ;;  %v2411_v60 = vadd.f32 %v2405_v20, %v2397_v25  ;;  %v2418_v14 = vmul.f32 %v2413_v28, %v4187_v42 }
 0x1ce   :  { %v2419_v61 = vmul.f32 %v2413_v28, %v4189_v43  ;;  %v2420_v0 = vadd.f32 %v2414_v52, %v2406_v23  ;;  %v2421_v1 = vadd.f32 %v2415_v55, %v2407_v36  ;;  %v2422_v2 = vadd.f32 %v2416_v57, %v2408_v22 }
 0x1cf   :  { %v2288_v63 = vmin.f32 %v2287_v56, 10000.0  ;;  %v2423_v3 = vadd.f32 %v2417_v58, %v2409_v54  ;;  %v2428_v4 = vmul.f32 %v2427_v62, %v4175_v40  ;;  %v2429_v5 = vmul.f32 %v2427_v62, %v4177_v16 }
 0x1d0   :  { %v2430_v6 = vmul.f32 %v2427_v62, %v4179_v35  ;;  %v2431_v7 = vmul.f32 %v2427_v62, %v4181_v19  ;;  %v2432_v10 = vmul.f32 %v2427_v62, %v4183_v29  ;;  %v2433_v9 = vmul.f32 %v2427_v62, %v4185_v30 }
 0x1d1   :  { %3147 = vlog2.f32 %v2288_v63  ;;  %v2434_v11 = vmul.f32 %v2427_v62, %v4187_v42  ;;  %v2442_v12 = vrot.slane %v2428_v4, 1  ;;  %v2443_v8 = vrot.slane %v2429_v5, 1 }
 0x1d2   :  { %v2445_v13 = vrot.slane %v2430_v6, 1  ;;  %v2447_v21 = vrot.slane %v2431_v7, 1  ;;  %v2449_v17 = vrot.slane %v2432_v10, 1  ;;  %v2451_v31 = vrot.slane %v2433_v9, 1 }
 0x1d3   :  { %v2468_v27 = vstv %s4214_s7  ;;  %v2424_v33 = vadd.f32 %v2418_v14, %v2410_v59  ;;  %v2444_v37 = vsel %vm218_vm0, %v2442_v12, %v2443_v8  ;;  %v2453_v38 = vrot.slane %v2434_v11, 1 }
 0x1d4   :  { %v2446_v32 = vsel %vm218_vm0, %v2443_v8, %v2445_v13  ;;  %v2425_v39 = vadd.f32 %v2419_v61, %v2411_v60  ;;  %v2448_v18 = vsel %vm218_vm0, %v2445_v13, %v2447_v21  ;;  %v2450_v15 = vsel %vm218_vm0, %v2447_v21, %v2449_v17 }
 0x1d5   :  { %v2469_v44 = vmul.f32 %v2468_v27, %v4177_v16  ;;  %v2452_v45 = vsel %vm218_vm0, %v2449_v17, %v2451_v31  ;;  %v2454_v46 = vsel %vm218_vm0, %v2451_v31, %v2453_v38  ;;  %v2461_v24 = vadd.f32 %v2444_v37, %v2420_v0 }
 0x1d6   :  { %v2462_v34 = vadd.f32 %v2446_v32, %v2421_v1  ;;  %v2463_v25 = vadd.f32 %v2448_v18, %v2422_v2  ;;  %v2464_v26 = vadd.f32 %v2450_v15, %v2423_v3  ;;  %v2470_v28 = vmul.f32 %v2468_v27, %v4179_v35 }
 0x1d7   :  { %v2471_v47 = vmul.f32 %v2468_v27, %v4181_v19  ;;  %v2472_v48 = vmul.f32 %v2468_v27, %v4183_v29  ;;  %v2473_v41 = vmul.f32 %v2468_v27, %v4185_v30  ;;  %v2474_v49 = vmul.f32 %v2468_v27, %v4187_v42 }
 0x1d8   :  { %v2475_v50 = vmul.f32 %v2468_v27, %v4189_v43  ;;  %v2483_v51 = vrot.slane %v2469_v44, 1  ;;  %v2484_v20 = vrot.slane %v2470_v28, 1  ;;  %v2509_v53 = vstv %s4228_s8 }
 0x1d9   :  { %v2486_v52 = vrot.slane %v2471_v47, 1  ;;  %v2488_v23 = vrot.slane %v2472_v48, 1  ;;  %v2490_v36 = vrot.slane %v2473_v41, 1  ;;  %v2492_v22 = vrot.slane %v2474_v49, 1 }
 0x1da   :  { %v2494_v54 = vrot.slane %v2475_v50, 1  ;;  %v2465_v56 = vadd.f32 %v2452_v45, %v2424_v33  ;;  %v2485_v59 = vsel %vm218_vm0, %v2483_v51, %v2484_v20  ;;  %v2510_v58 = vmul.f32 %v2509_v53, %v4175_v40 }
 0x1db   :  { %v3148_v55 = vpop.eup %3147  ;;  %v2487_v57 = vsel %vm218_vm0, %v2484_v20, %v2486_v52  ;;  %v2489_v14 = vsel %vm218_vm0, %v2486_v52, %v2488_v23  ;;  %v2491_v61 = vsel %vm218_vm0, %v2488_v23, %v2490_v36  ;;  %v2511_v62 = vmul.f32 %v2509_v53, %v4177_v16 }
 0x1dc   :  { %v2290_v60 = vmul.f32 0.6931472, %v3148_v55  ;;  %v2466_v63 = vadd.f32 %v2454_v46, %v2425_v39  ;;  %v2493_v0 = vsel %vm218_vm0, %v2490_v36, %v2492_v22  ;;  %v2495_v1 = vsel %vm218_vm0, %v2492_v22, %v2494_v54 }
 0x1dd   :  { %v2502_v2 = vadd.f32 %v2485_v59, %v2461_v24  ;;  %v2503_v4 = vadd.f32 %v2487_v57, %v2462_v34  ;;  %v2504_v5 = vadd.f32 %v2489_v14, %v2463_v25  ;;  %v2505_v6 = vadd.f32 %v2491_v61, %v2464_v26 }
 0x1de   :  { %v2291_v3 = vmul.f32 0.4342945, %v2290_v60  ;;  %v2512_v7 = vmul.f32 %v2509_v53, %v4179_v35  ;;  %v2513_v10 = vmul.f32 %v2509_v53, %v4181_v19  ;;  %v2514_v9 = vmul.f32 %v2509_v53, %v4183_v29 }
 0x1df   :  { %v2515_v11 = vmul.f32 %v2509_v53, %v4185_v30  ;;  %v2516_v8 = vmul.f32 %v2509_v53, %v4187_v42  ;;  %v2524_v13 = vrot.slane %v2510_v58, 2  ;;  %v2525_v21 = vrot.slane %v2511_v62, 2 }
 0x1e0   :  { %v2292_v12 = vmul.f32 10.0, %v2291_v3  ;;  %v2527_v17 = vrot.slane %v2512_v7, 2  ;;  %v2529_v31 = vrot.slane %v2513_v10, 2  ;;  %v2531_v27 = vrot.slane %v2514_v9, 2 }
 0x1e1   :  { %v2533_v33 = vrot.slane %v2515_v11, 2  ;;  %v2506_v37 = vadd.f32 %v2493_v0, %v2465_v56  ;;  %v2526_v32 = vsel %vm301_vm1, %v2524_v13, %v2525_v21  ;;  %v2535_v38 = vrot.slane %v2516_v8, 2 }
 0x1e2   :  { %2293 = vst [vmem:[#allocation11 + $0x2] sm:$0x1] %v2292_v12  ;;  %v2550_v39 = vstv %s4246_s9  ;;  %v2507_v18 = vadd.f32 %v2495_v1, %v2466_v63  ;;  %v2528_v15 = vsel %vm301_vm1, %v2525_v21, %v2527_v17  ;;  %v2530_v44 = vsel %vm301_vm1, %v2527_v17, %v2529_v31 }
 0x1e3   :  { %v2532_v45 = vsel %vm301_vm1, %v2529_v31, %v2531_v27  ;;  %v2534_v46 = vsel %vm301_vm1, %v2531_v27, %v2533_v33  ;;  %v2536_v24 = vsel %vm301_vm1, %v2533_v33, %v2535_v38  ;;  %v2543_v34 = vadd.f32 %v2526_v32, %v2502_v2 }
 0x1e4   :  { %v2591_v25 = vstv %s4254_s10  ;;  %v2544_v26 = vadd.f32 %v2528_v15, %v2503_v4  ;;  %v2545_v28 = vadd.f32 %v2530_v44, %v2504_v5  ;;  %v2546_v47 = vadd.f32 %v2532_v45, %v2505_v6 }
 0x1e5   :  { %v2551_v48 = vmul.f32 %v2550_v39, %v4177_v16  ;;  %v2552_v41 = vmul.f32 %v2550_v39, %v4179_v35  ;;  %v2553_v49 = vmul.f32 %v2550_v39, %v4181_v19  ;;  %v2554_v50 = vmul.f32 %v2550_v39, %v4183_v29 }
 0x1e6   :  { %v2555_v51 = vmul.f32 %v2550_v39, %v4185_v30  ;;  %v2556_v20 = vmul.f32 %v2550_v39, %v4187_v42  ;;  %v2557_v52 = vmul.f32 %v2550_v39, %v4189_v43  ;;  %v2592_v23 = vmul.f32 %v2591_v25, %v4175_v40 }
 0x1e7   :  { %v2565_v53 = vrot.slane %v2551_v48, 2  ;;  %v2566_v36 = vrot.slane %v2552_v41, 2  ;;  %v2568_v22 = vrot.slane %v2553_v49, 2  ;;  %v2570_v54 = vrot.slane %v2554_v50, 2 }
 0x1e8   :  { %v2572_v55 = vrot.slane %v2555_v51, 2  ;;  %v2574_v56 = vrot.slane %v2556_v20, 2  ;;  %v2576_v59 = vrot.slane %v2557_v52, 2  ;;  %v2593_v57 = vmul.f32 %v2591_v25, %v4177_v16 }
 0x1e9   :  { %v2594_v58 = vmul.f32 %v2591_v25, %v4179_v35  ;;  %v2567_v60 = vsel %vm301_vm1, %v2565_v53, %v2566_v36  ;;  %v2569_v14 = vsel %vm301_vm1, %v2566_v36, %v2568_v22  ;;  %v2571_v61 = vsel %vm301_vm1, %v2568_v22, %v2570_v54 }
 0x1ea   :  { %v2573_v62 = vsel %vm301_vm1, %v2570_v54, %v2572_v55  ;;  %v2547_v63 = vadd.f32 %v2534_v46, %v2506_v37  ;;  %v2548_v0 = vadd.f32 %v2536_v24, %v2507_v18  ;;  %v2575_v1 = vsel %vm301_vm1, %v2572_v55, %v2574_v56 }
 0x1eb   :  { %v2577_v2 = vsel %vm301_vm1, %v2574_v56, %v2576_v59  ;;  %v2584_v3 = vadd.f32 %v2567_v60, %v2543_v34  ;;  %v2585_v4 = vadd.f32 %v2569_v14, %v2544_v26  ;;  %v2586_v5 = vadd.f32 %v2571_v61, %v2545_v28 }
 0x1ec   :  { %v2587_v6 = vadd.f32 %v2573_v62, %v2546_v47  ;;  %v2595_v7 = vmul.f32 %v2591_v25, %v4181_v19  ;;  %v2596_v10 = vmul.f32 %v2591_v25, %v4183_v29  ;;  %v2597_v9 = vmul.f32 %v2591_v25, %v4185_v30 }
 0x1ed   :  { %v2598_v11 = vmul.f32 %v2591_v25, %v4187_v42  ;;  %v2606_v12 = vrot.slane %v2592_v23, 3  ;;  %v2607_v8 = vrot.slane %v2593_v57, 3  ;;  %v2609_v13 = vrot.slane %v2594_v58, 3 }
 0x1ee   :  { %v2632_v21 = vstv %s4276_s11  ;;  %v2611_v17 = vrot.slane %v2595_v7, 3  ;;  %v2613_v31 = vrot.slane %v2596_v10, 3  ;;  %v2615_v27 = vrot.slane %v2597_v9, 3 }
 0x1ef   :  { %v2617_v33 = vrot.slane %v2598_v11, 3  ;;  %v2588_v37 = vadd.f32 %v2575_v1, %v2547_v63  ;;  %v2608_v32 = vsel %vm384_vm2, %v2606_v12, %v2607_v8  ;;  %v2610_v38 = vsel %vm384_vm2, %v2607_v8, %v2609_v13 }
 0x1f0   :  { %v2633_v39 = vmul.f32 %v2632_v21, %v4177_v16  ;;  %v2589_v18 = vadd.f32 %v2577_v2, %v2548_v0  ;;  %v2612_v15 = vsel %vm384_vm2, %v2609_v13, %v2611_v17  ;;  %v2614_v44 = vsel %vm384_vm2, %v2611_v17, %v2613_v31 }
 0x1f1   :  { %v2634_v45 = vmul.f32 %v2632_v21, %v4179_v35  ;;  %v2616_v46 = vsel %vm384_vm2, %v2613_v31, %v2615_v27  ;;  %v2618_v24 = vsel %vm384_vm2, %v2615_v27, %v2617_v33  ;;  %v2625_v34 = vadd.f32 %v2608_v32, %v2584_v3 }
 0x1f2   :  { %v2626_v25 = vadd.f32 %v2610_v38, %v2585_v4  ;;  %v2627_v26 = vadd.f32 %v2612_v15, %v2586_v5  ;;  %v2628_v28 = vadd.f32 %v2614_v44, %v2587_v6  ;;  %v2635_v47 = vmul.f32 %v2632_v21, %v4181_v19 }
 0x1f3   :  { %v2636_v48 = vmul.f32 %v2632_v21, %v4183_v29  ;;  %v2637_v41 = vmul.f32 %v2632_v21, %v4185_v30  ;;  %v2638_v49 = vmul.f32 %v2632_v21, %v4187_v42  ;;  %v2639_v50 = vmul.f32 %v2632_v21, %v4189_v43 }
 0x1f4   :  { %v2647_v51 = vrot.slane %v2633_v39, 3  ;;  %v2648_v20 = vrot.slane %v2634_v45, 3  ;;  %v2650_v52 = vrot.slane %v2635_v47, 3  ;;  %v2673_v23 = vstv %s4293_s12 }
 0x1f5   :  { %v2652_v53 = vrot.slane %v2636_v48, 3  ;;  %v2654_v36 = vrot.slane %v2637_v41, 3  ;;  %v2656_v22 = vrot.slane %v2638_v49, 3  ;;  %v2658_v54 = vrot.slane %v2639_v50, 3 }
 0x1f6   :  { %v2674_v55 = vmul.f32 %v2673_v23, %v4175_v40  ;;  %v2649_v56 = vsel %vm384_vm2, %v2647_v51, %v2648_v20  ;;  %v2651_v59 = vsel %vm384_vm2, %v2648_v20, %v2650_v52  ;;  %v2675_v58 = vmul.f32 %v2673_v23, %v4177_v16 }
 0x1f7   :  { %v2653_v57 = vsel %vm384_vm2, %v2650_v52, %v2652_v53  ;;  %v2629_v60 = vadd.f32 %v2616_v46, %v2588_v37  ;;  %v2630_v14 = vadd.f32 %v2618_v24, %v2589_v18  ;;  %v2655_v61 = vsel %vm384_vm2, %v2652_v53, %v2654_v36 }
 0x1f8   :  { %v2657_v62 = vsel %vm384_vm2, %v2654_v36, %v2656_v22  ;;  %v2659_v63 = vsel %vm384_vm2, %v2656_v22, %v2658_v54  ;;  %v2666_v0 = vadd.f32 %v2649_v56, %v2625_v34  ;;  %v2667_v1 = vadd.f32 %v2651_v59, %v2626_v25 }
 0x1f9   :  { %v2668_v2 = vadd.f32 %v2653_v57, %v2627_v26  ;;  %v2669_v3 = vadd.f32 %v2655_v61, %v2628_v28  ;;  %v2676_v4 = vmul.f32 %v2673_v23, %v4179_v35  ;;  %v2677_v5 = vmul.f32 %v2673_v23, %v4181_v19 }
 0x1fa   :  { %v2678_v6 = vmul.f32 %v2673_v23, %v4183_v29  ;;  %v2679_v7 = vmul.f32 %v2673_v23, %v4185_v30  ;;  %v2680_v10 = vmul.f32 %v2673_v23, %v4187_v42  ;;  %v2688_v9 = vrot.slane %v2674_v55, 4 }
 0x1fb   :  { %v2689_v11 = vrot.slane %v2675_v58, 4  ;;  %v2691_v12 = vrot.slane %v2676_v4, 4  ;;  %v2693_v8 = vrot.slane %v2677_v5, 4  ;;  %v2714_v21 = vstv %s4309_s0 }
 0x1fc   :  { %v2695_v13 = vrot.slane %v2678_v6, 4  ;;  %v2670_v17 = vadd.f32 %v2657_v62, %v2629_v60  ;;  %v2697_v27 = vrot.slane %v2679_v7, 4  ;;  %v2699_v33 = vrot.slane %v2680_v10, 4 }
 0x1fd   :  { %v2690_v31 = vsel %vm467_vm3, %v2688_v9, %v2689_v11  ;;  %v2692_v37 = vsel %vm467_vm3, %v2689_v11, %v2691_v12  ;;  %v2694_v32 = vsel %vm467_vm3, %v2691_v12, %v2693_v8  ;;  %v2715_v39 = vmul.f32 %v2714_v21, %v4177_v16 }
 0x1fe   :  { %v2696_v38 = vsel %vm467_vm3, %v2693_v8, %v2695_v13  ;;  %v2671_v18 = vadd.f32 %v2659_v63, %v2630_v14  ;;  %v2698_v15 = vsel %vm467_vm3, %v2695_v13, %v2697_v27  ;;  %v2700_v44 = vsel %vm467_vm3, %v2697_v27, %v2699_v33 }
 0x1ff   :  { %v2707_v45 = vadd.f32 %v2690_v31, %v2666_v0  ;;  %v2708_v46 = vadd.f32 %v2692_v37, %v2667_v1  ;;  %v2709_v24 = vadd.f32 %v2694_v32, %v2668_v2  ;;  %v2710_v34 = vadd.f32 %v2696_v38, %v2669_v3 }
 0x200   :  { %v2716_v25 = vmul.f32 %v2714_v21, %v4179_v35  ;;  %v2717_v26 = vmul.f32 %v2714_v21, %v4181_v19  ;;  %v2718_v28 = vmul.f32 %v2714_v21, %v4183_v29  ;;  %v2719_v47 = vmul.f32 %v2714_v21, %v4185_v30 }
 0x201   :  { %v2720_v48 = vmul.f32 %v2714_v21, %v4187_v42  ;;  %v2721_v41 = vmul.f32 %v2714_v21, %v4189_v43  ;;  %v2729_v49 = vrot.slane %v2715_v39, 4  ;;  %v2755_v51 = vstv %s4323_s13 }
 0x202   :  { %v2730_v50 = vrot.slane %v2716_v25, 4  ;;  %v2732_v20 = vrot.slane %v2717_v26, 4  ;;  %v2734_v52 = vrot.slane %v2718_v28, 4  ;;  %v2736_v53 = vrot.slane %v2719_v47, 4 }
 0x203   :  { %v2738_v23 = vrot.slane %v2720_v48, 4  ;;  %v2711_v36 = vadd.f32 %v2698_v15, %v2670_v17  ;;  %v2740_v54 = vrot.slane %v2721_v41, 4  ;;  %v2756_v55 = vmul.f32 %v2755_v51, %v4175_v40 }
 0x204   :  { %v2731_v22 = vsel %vm467_vm3, %v2729_v49, %v2730_v50  ;;  %v2733_v56 = vsel %vm467_vm3, %v2730_v50, %v2732_v20  ;;  %v2735_v59 = vsel %vm467_vm3, %v2732_v20, %v2734_v52  ;;  %v2737_v57 = vsel %vm467_vm3, %v2734_v52, %v2736_v53 }
 0x205   :  { %v2757_v58 = vmul.f32 %v2755_v51, %v4177_v16  ;;  %v2712_v60 = vadd.f32 %v2700_v44, %v2671_v18  ;;  %v2739_v14 = vsel %vm467_vm3, %v2736_v53, %v2738_v23  ;;  %v2741_v61 = vsel %vm467_vm3, %v2738_v23, %v2740_v54 }
 0x206   :  { %v2748_v62 = vadd.f32 %v2731_v22, %v2707_v45  ;;  %v2749_v63 = vadd.f32 %v2733_v56, %v2708_v46  ;;  %v2750_v0 = vadd.f32 %v2735_v59, %v2709_v24  ;;  %v2751_v1 = vadd.f32 %v2737_v57, %v2710_v34 }
 0x207   :  { %v2758_v2 = vmul.f32 %v2755_v51, %v4179_v35  ;;  %v2759_v3 = vmul.f32 %v2755_v51, %v4181_v19  ;;  %v2760_v4 = vmul.f32 %v2755_v51, %v4183_v29  ;;  %v2761_v5 = vmul.f32 %v2755_v51, %v4185_v30 }
 0x208   :  { %v2762_v6 = vmul.f32 %v2755_v51, %v4187_v42  ;;  %v2770_v7 = vrot.slane %v2756_v55, 5  ;;  %v2771_v10 = vrot.slane %v2757_v58, 5  ;;  %v2796_v11 = vstv %s4340_s14 }
 0x209   :  { %v2773_v9 = vrot.slane %v2758_v2, 5  ;;  %v2775_v12 = vrot.slane %v2759_v3, 5  ;;  %v2777_v8 = vrot.slane %v2760_v4, 5  ;;  %v2779_v13 = vrot.slane %v2761_v5, 5 }
 0x20a   :  { %v2781_v21 = vrot.slane %v2762_v6, 5  ;;  %v2752_v17 = vadd.f32 %v2739_v14, %v2711_v36  ;;  %v2772_v31 = vsel %vm550_vm4, %v2770_v7, %v2771_v10  ;;  %v2797_v33 = vmul.f32 %v2796_v11, %v4177_v16 }
 0x20b   :  { %v2774_v27 = vsel %vm550_vm4, %v2771_v10, %v2773_v9  ;;  %v2753_v37 = vadd.f32 %v2741_v61, %v2712_v60  ;;  %v2776_v32 = vsel %vm550_vm4, %v2773_v9, %v2775_v12  ;;  %v2778_v38 = vsel %vm550_vm4, %v2775_v12, %v2777_v8 }
 0x20c   :  { %v2798_v39 = vmul.f32 %v2796_v11, %v4179_v35  ;;  %v2780_v18 = vsel %vm550_vm4, %v2777_v8, %v2779_v13  ;;  %v2782_v15 = vsel %vm550_vm4, %v2779_v13, %v2781_v21  ;;  %v2789_v44 = vadd.f32 %v2772_v31, %v2748_v62 }
 0x20d   :  { %v2790_v45 = vadd.f32 %v2774_v27, %v2749_v63  ;;  %v2791_v46 = vadd.f32 %v2776_v32, %v2750_v0  ;;  %v2792_v24 = vadd.f32 %v2778_v38, %v2751_v1  ;;  %v2799_v34 = vmul.f32 %v2796_v11, %v4181_v19 }
 0x20e   :  { %v2800_v25 = vmul.f32 %v2796_v11, %v4183_v29  ;;  %v2801_v26 = vmul.f32 %v2796_v11, %v4185_v30  ;;  %v2802_v28 = vmul.f32 %v2796_v11, %v4187_v42  ;;  %v2803_v47 = vmul.f32 %v2796_v11, %v4189_v43 }
 0x20f   :  { %v2811_v48 = vrot.slane %v2797_v33, 5  ;;  %v2812_v41 = vrot.slane %v2798_v39, 5  ;;  %v2814_v49 = vrot.slane %v2799_v34, 5  ;;  %v2837_v51 = vstv %s4357_s15 }
 0x210   :  { %v2816_v50 = vrot.slane %v2800_v25, 5  ;;  %v2818_v20 = vrot.slane %v2801_v26, 5  ;;  %v2820_v52 = vrot.slane %v2802_v28, 5  ;;  %v2822_v53 = vrot.slane %v2803_v47, 5 }
 0x211   :  { %v2838_v23 = vmul.f32 %v2837_v51, %v4175_v40  ;;  %v2813_v36 = vsel %vm550_vm4, %v2811_v48, %v2812_v41  ;;  %v2815_v22 = vsel %vm550_vm4, %v2812_v41, %v2814_v49  ;;  %v2839_v55 = vmul.f32 %v2837_v51, %v4177_v16 }
 0x212   :  { %v2817_v54 = vsel %vm550_vm4, %v2814_v49, %v2816_v50  ;;  %v2793_v56 = vadd.f32 %v2780_v18, %v2752_v17  ;;  %v2794_v59 = vadd.f32 %v2782_v15, %v2753_v37  ;;  %v2819_v57 = vsel %vm550_vm4, %v2816_v50, %v2818_v20 }
 0x213   :  { %v2821_v58 = vsel %vm550_vm4, %v2818_v20, %v2820_v52  ;;  %v2823_v60 = vsel %vm550_vm4, %v2820_v52, %v2822_v53  ;;  %v2830_v14 = vadd.f32 %v2813_v36, %v2789_v44  ;;  %v2831_v61 = vadd.f32 %v2815_v22, %v2790_v45 }
 0x214   :  { %v2832_v62 = vadd.f32 %v2817_v54, %v2791_v46  ;;  %v2833_v63 = vadd.f32 %v2819_v57, %v2792_v24  ;;  %v2840_v0 = vmul.f32 %v2837_v51, %v4179_v35  ;;  %v2841_v1 = vmul.f32 %v2837_v51, %v4181_v19 }
 0x215   :  { %v2842_v2 = vmul.f32 %v2837_v51, %v4183_v29  ;;  %v2843_v3 = vmul.f32 %v2837_v51, %v4185_v30  ;;  %v2844_v4 = vmul.f32 %v2837_v51, %v4187_v42  ;;  %v2852_v5 = vrot.slane %v2838_v23, 6 }
 0x216   :  { %v2853_v6 = vrot.slane %v2839_v55, 6  ;;  %v2855_v7 = vrot.slane %v2840_v0, 6  ;;  %v2857_v10 = vrot.slane %v2841_v1, 6  ;;  %v2878_v11 = vstv %s4373_s16 }
 0x217   :  { %v2859_v9 = vrot.slane %v2842_v2, 6  ;;  %v2834_v12 = vadd.f32 %v2821_v58, %v2793_v56  ;;  %v2861_v13 = vrot.slane %v2843_v3, 6  ;;  %v2863_v21 = vrot.slane %v2844_v4, 6 }
 0x218   :  { %v2854_v8 = vsel %vm633_vm5, %v2852_v5, %v2853_v6  ;;  %v2856_v17 = vsel %vm633_vm5, %v2853_v6, %v2855_v7  ;;  %v2858_v31 = vsel %vm633_vm5, %v2855_v7, %v2857_v10  ;;  %v2879_v33 = vmul.f32 %v2878_v11, %v4177_v16 }
 0x219   :  { %v2860_v27 = vsel %vm633_vm5, %v2857_v10, %v2859_v9  ;;  %v2835_v37 = vadd.f32 %v2823_v60, %v2794_v59  ;;  %v2862_v32 = vsel %vm633_vm5, %v2859_v9, %v2861_v13  ;;  %v2864_v38 = vsel %vm633_vm5, %v2861_v13, %v2863_v21 }
 0x21a   :  { %v2871_v39 = vadd.f32 %v2854_v8, %v2830_v14  ;;  %v2872_v18 = vadd.f32 %v2856_v17, %v2831_v61  ;;  %v2873_v15 = vadd.f32 %v2858_v31, %v2832_v62  ;;  %v2874_v44 = vadd.f32 %v2860_v27, %v2833_v63 }
 0x21b   :  { %v2880_v45 = vmul.f32 %v2878_v11, %v4179_v35  ;;  %v2881_v46 = vmul.f32 %v2878_v11, %v4181_v19  ;;  %v2882_v24 = vmul.f32 %v2878_v11, %v4183_v29  ;;  %v2883_v34 = vmul.f32 %v2878_v11, %v4185_v30 }
 0x21c   :  { %v2884_v25 = vmul.f32 %v2878_v11, %v4187_v42  ;;  %v2885_v26 = vmul.f32 %v2878_v11, %v4189_v43  ;;  %v2893_v28 = vrot.slane %v2879_v33, 6  ;;  %v2919_v48 = vstv %s4387_s17 }
 0x21d   :  { %v2894_v47 = vrot.slane %v2880_v45, 6  ;;  %v2896_v41 = vrot.slane %v2881_v46, 6  ;;  %v2898_v49 = vrot.slane %v2882_v24, 6  ;;  %v2900_v50 = vrot.slane %v2883_v34, 6 }
 0x21e   :  { %v2902_v51 = vrot.slane %v2884_v25, 6  ;;  %v2875_v20 = vadd.f32 %v2862_v32, %v2834_v12  ;;  %v2904_v53 = vrot.slane %v2885_v26, 6  ;;  %v2920_v23 = vmul.f32 %v2919_v48, %v4175_v40 }
 0x21f   :  { %v2895_v52 = vsel %vm633_vm5, %v2893_v28, %v2894_v47  ;;  %v2897_v36 = vsel %vm633_vm5, %v2894_v47, %v2896_v41  ;;  %v2899_v22 = vsel %vm633_vm5, %v2896_v41, %v2898_v49  ;;  %v2901_v54 = vsel %vm633_vm5, %v2898_v49, %v2900_v50 }
 0x220   :  { %v2921_v55 = vmul.f32 %v2919_v48, %v4177_v16  ;;  %v2876_v56 = vadd.f32 %v2864_v38, %v2835_v37  ;;  %v2903_v59 = vsel %vm633_vm5, %v2900_v50, %v2902_v51  ;;  %v2905_v57 = vsel %vm633_vm5, %v2902_v51, %v2904_v53 }
 0x221   :  { %v2912_v58 = vadd.f32 %v2895_v52, %v2871_v39  ;;  %v2913_v60 = vadd.f32 %v2897_v36, %v2872_v18  ;;  %v2914_v14 = vadd.f32 %v2899_v22, %v2873_v15  ;;  %v2915_v61 = vadd.f32 %v2901_v54, %v2874_v44 }
 0x222   :  { %v2922_v40 = vmul.f32 %v2919_v48, %v4179_v35  ;;  %v2923_v62 = vmul.f32 %v2919_v48, %v4181_v19  ;;  %v2924_v63 = vmul.f32 %v2919_v48, %v4183_v29  ;;  %v2925_v0 = vmul.f32 %v2919_v48, %v4185_v30 }
 0x223   :  { %v2926_v1 = vmul.f32 %v2919_v48, %v4187_v42  ;;  %v2934_v2 = vrot.slane %v2920_v23, 7  ;;  %v2935_v3 = vrot.slane %v2921_v55, 7  ;;  %v2960_v5 = vstv %s4404_s18 }
 0x224   :  { %v2937_v4 = vrot.slane %v2922_v40, 7  ;;  %v2939_v6 = vrot.slane %v2923_v62, 7  ;;  %v2941_v7 = vrot.slane %v2924_v63, 7  ;;  %v2943_v10 = vrot.slane %v2925_v0, 7 }
 0x225   :  { %v2945_v9 = vrot.slane %v2926_v1, 7  ;;  %v2916_v11 = vadd.f32 %v2903_v59, %v2875_v20  ;;  %v2936_v12 = vsel %vm716_vm6, %v2934_v2, %v2935_v3  ;;  %v2961_v13 = vmul.f32 %v2960_v5, %v4177_v16 }
 0x226   :  { %v2938_v8 = vsel %vm716_vm6, %v2935_v3, %v2937_v4  ;;  %v2917_v21 = vadd.f32 %v2905_v57, %v2876_v56  ;;  %v2940_v17 = vsel %vm716_vm6, %v2937_v4, %v2939_v6  ;;  %v2942_v31 = vsel %vm716_vm6, %v2939_v6, %v2941_v7 }
 0x227   :  { %v2962_v27 = vmul.f32 %v2960_v5, %v4179_v35  ;;  %v2944_v33 = vsel %vm716_vm6, %v2941_v7, %v2943_v10  ;;  %v2946_v37 = vsel %vm716_vm6, %v2943_v10, %v2945_v9  ;;  %v2953_v32 = vadd.f32 %v2936_v12, %v2912_v58 }
 0x228   :  { %v2954_v38 = vadd.f32 %v2938_v8, %v2913_v60  ;;  %v2955_v39 = vadd.f32 %v2940_v17, %v2914_v14  ;;  %v2956_v18 = vadd.f32 %v2942_v31, %v2915_v61  ;;  %v2963_v15 = vmul.f32 %v2960_v5, %v4181_v19 }
 0x229   :  { %v2964_v44 = vmul.f32 %v2960_v5, %v4183_v29  ;;  %v2965_v16 = vmul.f32 %v2960_v5, %v4185_v30  ;;  %v2966_v45 = vmul.f32 %v2960_v5, %v4187_v42  ;;  %v2967_v46 = vmul.f32 %v2960_v5, %v4189_v43 }
 0x22a   :  { %v2975_v35 = vrot.slane %v2961_v13, 7  ;;  %v2957_v24 = vadd.f32 %v2944_v33, %v2916_v11  ;;  %v2976_v34 = vrot.slane %v2962_v27, 7  ;;  %v2978_v25 = vrot.slane %v2963_v15, 7 }
 0x22b   :  { %v2980_v26 = vrot.slane %v2964_v44, 7  ;;  %v2958_v28 = vadd.f32 %v2946_v37, %v2917_v21  ;;  %v2982_v47 = vrot.slane %v2965_v16, 7  ;;  %v2984_v48 = vrot.slane %v2966_v45, 7 }
 0x22c   :  { %v2986_v41 = vrot.slane %v2967_v46, 7  ;;  %v2977_v19 = vsel %vm716_vm6, %v2975_v35, %v2976_v34  ;;  %v2979_v29 = vsel %vm716_vm6, %v2976_v34, %v2978_v25  ;;  %v3001_v30 = vstv %s4422_s19 }
 0x22d   :  { %v2981_v49 = vsel %vm716_vm6, %v2978_v25, %v2980_v26  ;;  %v2983_v42 = vsel %vm716_vm6, %v2980_v26, %v2982_v47  ;;  %v2985_v43 = vsel %vm716_vm6, %v2982_v47, %v2984_v48  ;;  %v2994_v51 = vadd.f32 %v2977_v19, %v2953_v32 }
 0x22e   :  { %v2987_v50 = vsel %vm716_vm6, %v2984_v48, %v2986_v41  ;;  %v2995_v20 = vadd.f32 %v2979_v29, %v2954_v38  ;;  %v2996_v52 = vadd.f32 %v2981_v49, %v2955_v39  ;;  %v2997_v53 = vadd.f32 %v2983_v42, %v2956_v18 }
 0x22f   :  { %v2998_v23 = vadd.f32 %v2985_v43, %v2957_v24  ;;  %v3002_v36 = vadd.f32 %v3001_v30, %v2994_v51  ;;  %v2999_v22 = vadd.f32 %v2987_v50, %v2958_v28 }
 0x230   :  { %v3003_v54 = vadd.f32 %v3001_v30, %v2995_v20  ;;  %v3004_v55 = vadd.f32 %v3001_v30, %v2996_v52  ;;  %v3005_v56 = vadd.f32 %v3001_v30, %v2997_v53 }
 0x231   :  { %v3008_v59 = vmul.f32 %v3002_v36, %v3002_v36  ;;  %v3006_v57 = vadd.f32 %v3001_v30, %v2998_v23  ;;  %v3007_v14 = vadd.f32 %v3001_v30, %v2999_v22 }
 0x232   :  { %v3009_v58 = vmul.f32 %v3003_v54, %v3003_v54  ;;  %v3010_v60 = vmul.f32 %v3004_v55, %v3004_v55  ;;  %v3011_v61 = vmul.f32 %v3005_v56, %v3005_v56 }
 0x233   :  { %v3012_v62 = vmul.f32 %v3006_v57, %v3006_v57  ;;  %v3013_v0 = vmul.f32 %v3007_v14, %v3007_v14 }
 0x234   :  { %v3014_v40 = vadd.f32 %v3009_v58, %v3008_v59 }
 0x236   :  { %v3015_v63 = vadd.f32 %v3014_v40, %v3010_v60 }
 0x238   :  { %v3016_v1 = vadd.f32 %v3015_v63, %v3011_v61 }
 0x23a   :  { %v3017_v2 = vadd.f32 %v3016_v1, %v3012_v62 }
 0x23c   :  { %v3018_v3 = vadd.f32 %v3017_v2, %v3013_v0 }
 0x23e   :  { %v3019_v4 = vrot.slane %v3018_v3, 4 }
 0x240   :  { %v3020_v5 = vadd.f32 %v3019_v4, %v3018_v3 }
 0x242   :  { %v3021_v6 = vrot.slane %v3020_v5, 2 }
 0x244   :  { %v3022_v7 = vadd.f32 %v3021_v6, %v3020_v5 }
 0x246   :  { %v3023_v10 = vrot.slane %v3022_v7, 1 }
 0x248   :  { %v3024_v9 = vadd.f32 %v3023_v10, %v3022_v7 }
 0x24a   :  { %v3026_v11 = vmax.f32 %v3024_v9, 1e-07 }
 0x24c   :  { %v3027_v12 = vmin.f32 %v3026_v11, 10000.0 }
 0x24e   :  { %3149 = vlog2.f32 %v3027_v12 }
 0x258   :  { %v3150_v8 = vpop.eup %3149 }
 0x259   :  { %v3029_v13 = vmul.f32 0.6931472, %v3150_v8 }
 0x25b   :  { %v3030_v21 = vmul.f32 0.4342945, %v3029_v13 }
 0x25d   :  { %v3031_v17 = vmul.f32 10.0, %v3030_v21 }
 0x25f   :  { %3032 = vst [vmem:[#allocation11 + $0x3] sm:$0x1] %v3031_v17 }
 0x260   :  { %3218 = shalt.err (!%p3215_p11)
}
 0x261   :  { %s3219_s22 = scalar_lea.hbm %s4460_s4, 64 }
 0x262   :  { %p3220_p12 = scmp.ne.s32.totalorder %s4460_s4, %s3219_s22  ;;  %p3223_p13 = scmp.lt.u32.totalorder %s3219_s22, %s4460_s4 }
 0x264   :  { %p3225_p0 = pnand %p3223_p13, %p3220_p12 }
 0x266   :  { %3228 = shalt.err (!%p3225_p0)
}
 0x267   :  { %3042 = dma.vmem_to_hbm [thread:$0]  %s3040_s2, 64, %s4460_s4, [#allocation4]  }
 0x268   :  { %3237 = dma.done.wait [#allocation4], 64  }
 0x269   :  { %3238 = vsyncadd [#allocation4], 4294967232 }
 0x26a   :  { %3046 = vsyncpa [#allocation3], 1 }
 0x26b   :  { %3047 = vsyncpa [#allocation4], 1 }
 0x26c   :  { %3048 = vsyncpa [#allocation5], 1 }
 0x26d   :  { %3049 = vsyncpa [#allocation6], 1 }
 0x26e   :  { %3050 = vsyncpa [#allocation10], 1 }

</bundles_post_ra>
